<compile_context>
chip_gen: v6e
topology: v6e:2x2x1
jax: 0.10.0
libtpu: 0.0.40
codegen_flags: <defaults>
</compile_context>

<pallas_src>
import jax
import jax.numpy as jnp
from jax.experimental import pallas as pl
from jax.experimental.pallas import tpu as pltpu

# ----------------------------- config ---------------------------------------
B = 2            # batch
S = 8            # sequence length
H = 64           # hidden size        (roberta-base: 768)
NH = 4           # attention heads    (roberta-base: 12)
DH = H // NH     # head dim
I = 128          # intermediate size  (roberta-base: 3072)
L = 2            # layers             (roberta-base: 12)
V = 50           # vocab size
P = 16           # max position embeddings
PAD_IDX = 1      # RoBERTa padding_idx for positions
LN_EPS = 1e-5
ATTN_SCALE = 1.0 / (DH ** 0.5)


# --------------------------- in-kernel helpers -------------------------------
def _layer_norm(x, g, b):
    """Row-wise LayerNorm in f32; g/b are [1, H]."""
    mean = jnp.mean(x, axis=-1, keepdims=True)
    xc = x - mean
    var = jnp.mean(xc * xc, axis=-1, keepdims=True)
    return xc * jax.lax.rsqrt(var + LN_EPS) * g + b


def _gelu(x):
    # TODO(synk): HF RoBERTa uses exact erf-GELU; tanh approximation used here.
    return 0.5 * x * (1.0 + jnp.tanh(0.7978845608028654 * (x + 0.044715 * x * x * x)))


# --------------------------- fused encoder kernel ----------------------------
def _encoder_kernel(emb_ref, bias_ref, eg_ref, eb_ref,
                    wqkv_ref, bqkv_ref, wo_ref, bo_ref,
                    ln1g_ref, ln1b_ref, w1_ref, b1_ref,
                    w2_ref, b2_ref, ln2g_ref, ln2b_ref,
                    out_ref):
    """Whole encoder in one invocation; all operands resident in VMEM.

    emb_ref:  [B*S, H]  f32   (word + pos + type embeddings)
    bias_ref: [B, 1, S] f32   (additive attention-mask bias, per batch)
    weights:  stacked per layer, matmul weights in bf16, biases/LN in f32
    out_ref:  [B, H]    f32   (CLS hidden states only)
    """
    # --- embedding LayerNorm (dropout = identity in eval mode) ---
    h = _layer_norm(emb_ref[...], eg_ref[...], eb_ref[...])            # [B*S, H] f32

    for li in range(L):
        res = h

        # --- fused QKV projection: one lane-dense (N = 3H = 192) MXU matmul ---
        qkv = jnp.dot(h.astype(jnp.bfloat16), wqkv_ref[li],
                      preferred_element_type=jnp.float32) + bqkv_ref[li]  # [B*S, 3H]

        # --- attention: all B*NH (batch, head) slices in-kernel, output
        #     projection folded per head so ctx never hits HBM ---
        wo_l = wo_ref[li]                                               # [H, H] bf16
        attn_rows = []
        for b in range(B):
            qkv_b = qkv[b * S:(b + 1) * S, :]                           # [S, 3H]
            bias_b = bias_ref[b]                                        # [1, S]
            acc = jnp.zeros((S, H), jnp.float32)
            for hh in range(NH):
                q = qkv_b[:, hh * DH:(hh + 1) * DH]                     # [S, DH]
                k = qkv_b[:, H + hh * DH:H + (hh + 1) * DH]             # [S, DH]
                v = qkv_b[:, 2 * H + hh * DH:2 * H + (hh + 1) * DH]     # [S, DH]
                s = jnp.dot(q, k.T, preferred_element_type=jnp.float32)
                s = s * ATTN_SCALE + bias_b                             # [S, S] f32
                m = jnp.max(s, axis=-1, keepdims=True)
                p = jnp.exp(s - m)
                p = p * pl.reciprocal(jnp.sum(p, axis=-1, keepdims=True),
                                      approx=True)
                ctx = jnp.dot(p, v, preferred_element_type=jnp.float32)  # [S, DH]
                # fold output projection: ctx @ wo[rows of this head]
                acc = acc + jnp.dot(ctx.astype(jnp.bfloat16),
                                    wo_l[hh * DH:(hh + 1) * DH, :],
                                    preferred_element_type=jnp.float32)
            attn_rows.append(acc)
        attn_out = jnp.concatenate(attn_rows, axis=0) + bo_ref[li]      # [B*S, H]

        # --- residual + LN1 ---
        h = _layer_norm(attn_out + res, ln1g_ref[li], ln1b_ref[li])

        # --- FFN (lane-dense I = 128 intermediate) ---
        ff = jnp.dot(h.astype(jnp.bfloat16), w1_ref[li],
                     preferred_element_type=jnp.float32) + b1_ref[li]   # [B*S, I]
        ff = _gelu(ff)
        ff2 = jnp.dot(ff.astype(jnp.bfloat16), w2_ref[li],
                      preferred_element_type=jnp.float32) + b2_ref[li]  # [B*S, H]
        pre_ln = ff2 + h

        if li < L - 1:
            h = _layer_norm(pre_ln, ln2g_ref[li], ln2b_ref[li])
        else:
            # Only the CLS rows are ever consumed: gather rows {b*S} with a
            # one-hot selection matmul, LayerNorm just those B rows, and write
            # the [B, H] result (no [B*S, H] writeback).
            r = jax.lax.broadcasted_iota(jnp.int32, (B, B * S), 0)
            c = jax.lax.broadcasted_iota(jnp.int32, (B, B * S), 1)
            sel = (c == r * S).astype(jnp.float32)                      # [B, B*S]
            cls = jnp.dot(sel, pre_ln, preferred_element_type=jnp.float32)  # [B, H]
            out_ref[...] = _layer_norm(cls, ln2g_ref[li],
                                       ln2b_ref[li]).astype(out_ref.dtype)


# --------------------------- parameter init ----------------------------------
def init_params(key):
    def dense(k, fan_in, fan_out):
        return 0.02 * jax.random.normal(k, (fan_in, fan_out), jnp.float32)

    keys = jax.random.split(key, 4 + L)
    params = {
        "word_emb": 0.02 * jax.random.normal(keys[0], (V, H), jnp.float32),
        "pos_emb": 0.02 * jax.random.normal(keys[1], (P, H), jnp.float32),
        "type_emb": 0.02 * jax.random.normal(keys[2], (1, H), jnp.float32),
        "emb_ln_g": jnp.ones((1, H), jnp.float32),
        "emb_ln_b": jnp.zeros((1, H), jnp.float32),
    }
    wqkv, bqkv, wo, bo = [], [], [], []
    w1, b1, w2, b2 = [], [], [], []
    ln1_g, ln1_b, ln2_g, ln2_b = [], [], [], []
    for li in range(L):
        lk = jax.random.split(keys[4 + li], 6)
        wq, wk, wv = dense(lk[0], H, H), dense(lk[1], H, H), dense(lk[2], H, H)
        wqkv.append(jnp.concatenate([wq, wk, wv], axis=1))        # [H, 3H]
        bqkv.append(jnp.zeros((1, 3 * H), jnp.float32))
        wo.append(dense(lk[3], H, H))
        bo.append(jnp.zeros((1, H), jnp.float32))
        w1.append(dense(lk[4], H, I))
        b1.append(jnp.zeros((1, I), jnp.float32))
        w2.append(dense(lk[5], I, H))
        b2.append(jnp.zeros((1, H), jnp.float32))
        ln1_g.append(jnp.ones((1, H), jnp.float32))
        ln1_b.append(jnp.zeros((1, H), jnp.float32))
        ln2_g.append(jnp.ones((1, H), jnp.float32))
        ln2_b.append(jnp.zeros((1, H), jnp.float32))

    # Matmul weights in bf16 (MXU-friendly, halves weight traffic at real
    # sizes); biases and LayerNorm params stay f32.
    params.update({
        "wqkv": jnp.stack(wqkv).astype(jnp.bfloat16),   # [L, H, 3H]
        "bqkv": jnp.stack(bqkv),                        # [L, 1, 3H]
        "wo":   jnp.stack(wo).astype(jnp.bfloat16),     # [L, H, H]
        "bo":   jnp.stack(bo),                          # [L, 1, H]
        "ln1_g": jnp.stack(ln1_g), "ln1_b": jnp.stack(ln1_b),
        "w1":   jnp.stack(w1).astype(jnp.bfloat16),     # [L, H, I]
        "b1":   jnp.stack(b1),                          # [L, 1, I]
        "w2":   jnp.stack(w2).astype(jnp.bfloat16),     # [L, I, H]
        "b2":   jnp.stack(b2),                          # [L, 1, H]
        "ln2_g": jnp.stack(ln2_g), "ln2_b": jnp.stack(ln2_b),
    })
    return params


# --------------------------- full forward pass --------------------------------
def roberta_encoder_forward(params, input_ids, attn_mask):
    """input_ids:[B,S] int32, attn_mask:[B,S] {0,1}.  Returns [B,H] (CLS states)."""
    mask_f = attn_mask.astype(jnp.float32)

    # --- embeddings (gather glue stays in plain JAX) ---
    # TODO(synk): embedding-table gathers kept in JAX (no clean Pallas gather
    # needed at these sizes); tokenizer / pretrained checkpoint have no Pallas
    # equivalent.
    pos_ids = (jnp.cumsum(attn_mask, axis=1) * attn_mask + PAD_IDX).astype(jnp.int32)
    emb = (params["word_emb"][input_ids]
           + params["pos_emb"][pos_ids]
           + params["type_emb"][0]).reshape(B * S, H)                  # [B*S, H]

    # additive attention-mask bias, one row per batch (no per-head duplication)
    mask_bias = ((1.0 - mask_f) * -1e9).reshape(B, 1, S)               # [B, 1, S]

    return pl.pallas_call(
        _encoder_kernel,
        out_shape=jax.ShapeDtypeStruct((B, H), jnp.float32),
        compiler_params=pltpu.CompilerParams(vmem_limit_bytes=64 * 1024 * 1024),
    )(emb, mask_bias,
      params["emb_ln_g"], params["emb_ln_b"],
      params["wqkv"], params["bqkv"], params["wo"], params["bo"],
      params["ln1_g"], params["ln1_b"], params["w1"], params["b1"],
      params["w2"], params["b2"], params["ln2_g"], params["ln2_b"])


# ------------------------------ main ------------------------------------------
if __name__ == "__main__":
    key = jax.random.PRNGKey(0)
    pkey, ikey = jax.random.split(key)
    params = init_params(pkey)

    input_ids = jax.random.randint(ikey, (B, S), 2, V, dtype=jnp.int32)
    attn_mask = jnp.ones((B, S), jnp.int32)
    attn_mask = attn_mask.at[1, -2:].set(0)   # pad tail of second example

    out = jax.jit(roberta_encoder_forward)(params, input_ids, attn_mask)
    out = jax.block_until_ready(out)
    assert out.shape == (B, H) and out.dtype == jnp.float32
    print("KERNEL_OK")
</pallas_src>

<mosaic_0001>
module attributes {stable_mosaic.version = 11 : i64} {
  func.func @_encoder_kernel(%arg0: memref<16x64xf32, #tpu.memory_space<vmem>>, %arg1: memref<2x1x8xf32, #tpu.memory_space<vmem>>, %arg2: memref<1x64xf32, #tpu.memory_space<vmem>>, %arg3: memref<1x64xf32, #tpu.memory_space<vmem>>, %arg4: memref<2x64x192xbf16, #tpu.memory_space<vmem>>, %arg5: memref<2x1x192xf32, #tpu.memory_space<vmem>>, %arg6: memref<2x64x64xbf16, #tpu.memory_space<vmem>>, %arg7: memref<2x1x64xf32, #tpu.memory_space<vmem>>, %arg8: memref<2x1x64xf32, #tpu.memory_space<vmem>>, %arg9: memref<2x1x64xf32, #tpu.memory_space<vmem>>, %arg10: memref<2x64x128xbf16, #tpu.memory_space<vmem>>, %arg11: memref<2x1x128xf32, #tpu.memory_space<vmem>>, %arg12: memref<2x128x64xbf16, #tpu.memory_space<vmem>>, %arg13: memref<2x1x64xf32, #tpu.memory_space<vmem>>, %arg14: memref<2x1x64xf32, #tpu.memory_space<vmem>>, %arg15: memref<2x1x64xf32, #tpu.memory_space<vmem>>, %arg16: memref<2x64xf32, #tpu.memory_space<vmem>>) attributes {dimension_semantics = [], scalar_prefetch = 0 : i64, scratch_operands = 0 : i64, tpu.core_type = #tpu.core_type<tc>} {
    %c0 = arith.constant 0 : index
    %c0_0 = arith.constant 0 : index
    %0 = vector.load %arg0[%c0, %c0_0] : memref<16x64xf32, #tpu.memory_space<vmem>>, vector<16x64xf32>
    %c0_1 = arith.constant 0 : index
    %c0_2 = arith.constant 0 : index
    %1 = vector.load %arg2[%c0_1, %c0_2] : memref<1x64xf32, #tpu.memory_space<vmem>>, vector<1x64xf32>
    %c0_3 = arith.constant 0 : index
    %c0_4 = arith.constant 0 : index
    %2 = vector.load %arg3[%c0_3, %c0_4] : memref<1x64xf32, #tpu.memory_space<vmem>>, vector<1x64xf32>
    %cst = arith.constant dense<0.000000e+00> : vector<16xf32>
    %3 = vector.multi_reduction <add>, %0, %cst [1] : vector<16x64xf32> to vector<16xf32>
    %4 = vector.shape_cast %3 : vector<16xf32> to vector<16x1xf32>
    %cst_5 = arith.constant 6.400000e+01 : f32
    %5 = vector.broadcast %cst_5 : f32 to vector<16x1xf32>
    %6 = arith.divf %4, %5 : vector<16x1xf32>
    %7 = vector.broadcast %6 : vector<16x1xf32> to vector<16x64xf32>
    %8 = arith.subf %0, %7 : vector<16x64xf32>
    %9 = arith.mulf %8, %8 : vector<16x64xf32>
    %cst_6 = arith.constant dense<0.000000e+00> : vector<16xf32>
    %10 = vector.multi_reduction <add>, %9, %cst_6 [1] : vector<16x64xf32> to vector<16xf32>
    %11 = vector.shape_cast %10 : vector<16xf32> to vector<16x1xf32>
    %cst_7 = arith.constant 6.400000e+01 : f32
    %12 = vector.broadcast %cst_7 : f32 to vector<16x1xf32>
    %13 = arith.divf %11, %12 : vector<16x1xf32>
    %cst_8 = arith.constant 9.99999974E-6 : f32
    %14 = vector.broadcast %cst_8 : f32 to vector<16x1xf32>
    %15 = arith.addf %13, %14 : vector<16x1xf32>
    %16 = math.rsqrt %15 : vector<16x1xf32>
    %17 = vector.broadcast %16 : vector<16x1xf32> to vector<16x64xf32>
    %18 = arith.mulf %8, %17 : vector<16x64xf32>
    %19 = vector.broadcast %1 : vector<1x64xf32> to vector<16x64xf32>
    %20 = arith.mulf %18, %19 : vector<16x64xf32>
    %21 = vector.broadcast %2 : vector<1x64xf32> to vector<16x64xf32>
    %22 = arith.addf %20, %21 : vector<16x64xf32>
    %23 = arith.truncf %22 : vector<16x64xf32> to vector<16x64xbf16>
    %c0_9 = arith.constant 0 : index
    %c0_10 = arith.constant 0 : index
    %c0_11 = arith.constant 0 : index
    %24 = vector.load %arg4[%c0_9, %c0_10, %c0_11] : memref<2x64x192xbf16, #tpu.memory_space<vmem>>, vector<1x64x192xbf16>
    %25 = vector.shape_cast %24 : vector<1x64x192xbf16> to vector<64x192xbf16>
    %cst_12 = arith.constant dense<0.000000e+00> : vector<16x192xf32>
    %26 = tpu.matmul %23, %25, %cst_12 {dimension_numbers = #tpu.dot_dimension_numbers<[1], [0], [0], [1], [0, 0, 1, 1], [], []>} : vector<16x64xbf16>, vector<64x192xbf16>, vector<16x192xf32> -> vector<16x192xf32>
    %c0_13 = arith.constant 0 : index
    %c0_14 = arith.constant 0 : index
    %c0_15 = arith.constant 0 : index
    %27 = vector.load %arg5[%c0_13, %c0_14, %c0_15] : memref<2x1x192xf32, #tpu.memory_space<vmem>>, vector<1x1x192xf32>
    %28 = vector.shape_cast %27 : vector<1x1x192xf32> to vector<1x192xf32>
    %29 = vector.broadcast %28 : vector<1x192xf32> to vector<16x192xf32>
    %30 = arith.addf %26, %29 : vector<16x192xf32>
    %c0_16 = arith.constant 0 : index
    %c0_17 = arith.constant 0 : index
    %c0_18 = arith.constant 0 : index
    %31 = vector.load %arg6[%c0_16, %c0_17, %c0_18] : memref<2x64x64xbf16, #tpu.memory_space<vmem>>, vector<1x64x64xbf16>
    %32 = vector.shape_cast %31 : vector<1x64x64xbf16> to vector<64x64xbf16>
    %33 = vector.extract_strided_slice %30 {offsets = [0, 0], sizes = [8, 192], strides = [1, 1]} : vector<16x192xf32> to vector<8x192xf32>
    %c0_19 = arith.constant 0 : index
    %c0_20 = arith.constant 0 : index
    %c0_21 = arith.constant 0 : index
    %34 = vector.load %arg1[%c0_19, %c0_20, %c0_21] : memref<2x1x8xf32, #tpu.memory_space<vmem>>, vector<1x1x8xf32>
    %35 = vector.shape_cast %34 : vector<1x1x8xf32> to vector<1x8xf32>
    %cst_22 = arith.constant 0.000000e+00 : f32
    %36 = vector.broadcast %cst_22 : f32 to vector<8x64xf32>
    %37 = vector.extract_strided_slice %33 {offsets = [0, 0], sizes = [8, 16], strides = [1, 1]} : vector<8x192xf32> to vector<8x16xf32>
    %38 = vector.extract_strided_slice %33 {offsets = [0, 64], sizes = [8, 16], strides = [1, 1]} : vector<8x192xf32> to vector<8x16xf32>
    %39 = vector.extract_strided_slice %33 {offsets = [0, 128], sizes = [8, 16], strides = [1, 1]} : vector<8x192xf32> to vector<8x16xf32>
    %40 = tpu.transpose %38, [1, 0] : vector<8x16xf32> -> vector<16x8xf32>
    %cst_23 = arith.constant dense<0.000000e+00> : vector<8x8xf32>
    %41 = tpu.matmul %37, %40, %cst_23 {dimension_numbers = #tpu.dot_dimension_numbers<[1], [0], [0], [1], [0, 0, 1, 1], [], []>} : vector<8x16xf32>, vector<16x8xf32>, vector<8x8xf32> -> vector<8x8xf32>
    %cst_24 = arith.constant 2.500000e-01 : f32
    %42 = vector.broadcast %cst_24 : f32 to vector<8x8xf32>
    %43 = arith.mulf %41, %42 : vector<8x8xf32>
    %44 = vector.broadcast %35 : vector<1x8xf32> to vector<8x8xf32>
    %45 = arith.addf %43, %44 : vector<8x8xf32>
    %cst_25 = arith.constant dense<0xFF800000> : vector<8xf32>
    %46 = vector.multi_reduction <maximumf>, %45, %cst_25 [1] : vector<8x8xf32> to vector<8xf32>
    %47 = vector.shape_cast %46 : vector<8xf32> to vector<8x1xf32>
    %48 = vector.broadcast %47 : vector<8x1xf32> to vector<8x8xf32>
    %49 = arith.subf %45, %48 : vector<8x8xf32>
    %50 = math.exp %49 : vector<8x8xf32>
    %cst_26 = arith.constant dense<0.000000e+00> : vector<8xf32>
    %51 = vector.multi_reduction <add>, %50, %cst_26 [1] : vector<8x8xf32> to vector<8xf32>
    %52 = vector.shape_cast %51 : vector<8xf32> to vector<8x1xf32>
    %53 = tpu.reciprocal %52 {approx = true} : vector<8x1xf32> -> vector<8x1xf32>
    %54 = vector.broadcast %53 : vector<8x1xf32> to vector<8x8xf32>
    %55 = arith.mulf %50, %54 : vector<8x8xf32>
    %cst_27 = arith.constant dense<0.000000e+00> : vector<8x16xf32>
    %56 = tpu.matmul %55, %39, %cst_27 {dimension_numbers = #tpu.dot_dimension_numbers<[1], [0], [0], [1], [0, 0, 1, 1], [], []>} : vector<8x8xf32>, vector<8x16xf32>, vector<8x16xf32> -> vector<8x16xf32>
    %57 = arith.truncf %56 : vector<8x16xf32> to vector<8x16xbf16>
    %58 = vector.extract_strided_slice %32 {offsets = [0, 0], sizes = [16, 64], strides = [1, 1]} : vector<64x64xbf16> to vector<16x64xbf16>
    %cst_28 = arith.constant dense<0.000000e+00> : vector<8x64xf32>
    %59 = tpu.matmul %57, %58, %cst_28 {dimension_numbers = #tpu.dot_dimension_numbers<[1], [0], [0], [1], [0, 0, 1, 1], [], []>} : vector<8x16xbf16>, vector<16x64xbf16>, vector<8x64xf32> -> vector<8x64xf32>
    %60 = arith.addf %36, %59 : vector<8x64xf32>
    %61 = vector.extract_strided_slice %33 {offsets = [0, 16], sizes = [8, 16], strides = [1, 1]} : vector<8x192xf32> to vector<8x16xf32>
    %62 = vector.extract_strided_slice %33 {offsets = [0, 80], sizes = [8, 16], strides = [1, 1]} : vector<8x192xf32> to vector<8x16xf32>
    %63 = vector.extract_strided_slice %33 {offsets = [0, 144], sizes = [8, 16], strides = [1, 1]} : vector<8x192xf32> to vector<8x16xf32>
    %64 = tpu.transpose %62, [1, 0] : vector<8x16xf32> -> vector<16x8xf32>
    %cst_29 = arith.constant dense<0.000000e+00> : vector<8x8xf32>
    %65 = tpu.matmul %61, %64, %cst_29 {dimension_numbers = #tpu.dot_dimension_numbers<[1], [0], [0], [1], [0, 0, 1, 1], [], []>} : vector<8x16xf32>, vector<16x8xf32>, vector<8x8xf32> -> vector<8x8xf32>
    %cst_30 = arith.constant 2.500000e-01 : f32
    %66 = vector.broadcast %cst_30 : f32 to vector<8x8xf32>
    %67 = arith.mulf %65, %66 : vector<8x8xf32>
    %68 = vector.broadcast %35 : vector<1x8xf32> to vector<8x8xf32>
    %69 = arith.addf %67, %68 : vector<8x8xf32>
    %cst_31 = arith.constant dense<0xFF800000> : vector<8xf32>
    %70 = vector.multi_reduction <maximumf>, %69, %cst_31 [1] : vector<8x8xf32> to vector<8xf32>
    %71 = vector.shape_cast %70 : vector<8xf32> to vector<8x1xf32>
    %72 = vector.broadcast %71 : vector<8x1xf32> to vector<8x8xf32>
    %73 = arith.subf %69, %72 : vector<8x8xf32>
    %74 = math.exp %73 : vector<8x8xf32>
    %cst_32 = arith.constant dense<0.000000e+00> : vector<8xf32>
    %75 = vector.multi_reduction <add>, %74, %cst_32 [1] : vector<8x8xf32> to vector<8xf32>
    %76 = vector.shape_cast %75 : vector<8xf32> to vector<8x1xf32>
    %77 = tpu.reciprocal %76 {approx = true} : vector<8x1xf32> -> vector<8x1xf32>
    %78 = vector.broadcast %77 : vector<8x1xf32> to vector<8x8xf32>
    %79 = arith.mulf %74, %78 : vector<8x8xf32>
    %cst_33 = arith.constant dense<0.000000e+00> : vector<8x16xf32>
    %80 = tpu.matmul %79, %63, %cst_33 {dimension_numbers = #tpu.dot_dimension_numbers<[1], [0], [0], [1], [0, 0, 1, 1], [], []>} : vector<8x8xf32>, vector<8x16xf32>, vector<8x16xf32> -> vector<8x16xf32>
    %81 = arith.truncf %80 : vector<8x16xf32> to vector<8x16xbf16>
    %82 = vector.extract_strided_slice %32 {offsets = [16, 0], sizes = [16, 64], strides = [1, 1]} : vector<64x64xbf16> to vector<16x64xbf16>
    %cst_34 = arith.constant dense<0.000000e+00> : vector<8x64xf32>
    %83 = tpu.matmul %81, %82, %cst_34 {dimension_numbers = #tpu.dot_dimension_numbers<[1], [0], [0], [1], [0, 0, 1, 1], [], []>} : vector<8x16xbf16>, vector<16x64xbf16>, vector<8x64xf32> -> vector<8x64xf32>
    %84 = arith.addf %60, %83 : vector<8x64xf32>
    %85 = vector.extract_strided_slice %33 {offsets = [0, 32], sizes = [8, 16], strides = [1, 1]} : vector<8x192xf32> to vector<8x16xf32>
    %86 = vector.extract_strided_slice %33 {offsets = [0, 96], sizes = [8, 16], strides = [1, 1]} : vector<8x192xf32> to vector<8x16xf32>
    %87 = vector.extract_strided_slice %33 {offsets = [0, 160], sizes = [8, 16], strides = [1, 1]} : vector<8x192xf32> to vector<8x16xf32>
    %88 = tpu.transpose %86, [1, 0] : vector<8x16xf32> -> vector<16x8xf32>
    %cst_35 = arith.constant dense<0.000000e+00> : vector<8x8xf32>
    %89 = tpu.matmul %85, %88, %cst_35 {dimension_numbers = #tpu.dot_dimension_numbers<[1], [0], [0], [1], [0, 0, 1, 1], [], []>} : vector<8x16xf32>, vector<16x8xf32>, vector<8x8xf32> -> vector<8x8xf32>
    %cst_36 = arith.constant 2.500000e-01 : f32
    %90 = vector.broadcast %cst_36 : f32 to vector<8x8xf32>
    %91 = arith.mulf %89, %90 : vector<8x8xf32>
    %92 = vector.broadcast %35 : vector<1x8xf32> to vector<8x8xf32>
    %93 = arith.addf %91, %92 : vector<8x8xf32>
    %cst_37 = arith.constant dense<0xFF800000> : vector<8xf32>
    %94 = vector.multi_reduction <maximumf>, %93, %cst_37 [1] : vector<8x8xf32> to vector<8xf32>
    %95 = vector.shape_cast %94 : vector<8xf32> to vector<8x1xf32>
    %96 = vector.broadcast %95 : vector<8x1xf32> to vector<8x8xf32>
    %97 = arith.subf %93, %96 : vector<8x8xf32>
    %98 = math.exp %97 : vector<8x8xf32>
    %cst_38 = arith.constant dense<0.000000e+00> : vector<8xf32>
    %99 = vector.multi_reduction <add>, %98, %cst_38 [1] : vector<8x8xf32> to vector<8xf32>
    %100 = vector.shape_cast %99 : vector<8xf32> to vector<8x1xf32>
    %101 = tpu.reciprocal %100 {approx = true} : vector<8x1xf32> -> vector<8x1xf32>
    %102 = vector.broadcast %101 : vector<8x1xf32> to vector<8x8xf32>
    %103 = arith.mulf %98, %102 : vector<8x8xf32>
    %cst_39 = arith.constant dense<0.000000e+00> : vector<8x16xf32>
    %104 = tpu.matmul %103, %87, %cst_39 {dimension_numbers = #tpu.dot_dimension_numbers<[1], [0], [0], [1], [0, 0, 1, 1], [], []>} : vector<8x8xf32>, vector<8x16xf32>, vector<8x16xf32> -> vector<8x16xf32>
    %105 = arith.truncf %104 : vector<8x16xf32> to vector<8x16xbf16>
    %106 = vector.extract_strided_slice %32 {offsets = [32, 0], sizes = [16, 64], strides = [1, 1]} : vector<64x64xbf16> to vector<16x64xbf16>
    %cst_40 = arith.constant dense<0.000000e+00> : vector<8x64xf32>
    %107 = tpu.matmul %105, %106, %cst_40 {dimension_numbers = #tpu.dot_dimension_numbers<[1], [0], [0], [1], [0, 0, 1, 1], [], []>} : vector<8x16xbf16>, vector<16x64xbf16>, vector<8x64xf32> -> vector<8x64xf32>
    %108 = arith.addf %84, %107 : vector<8x64xf32>
    %109 = vector.extract_strided_slice %33 {offsets = [0, 48], sizes = [8, 16], strides = [1, 1]} : vector<8x192xf32> to vector<8x16xf32>
    %110 = vector.extract_strided_slice %33 {offsets = [0, 112], sizes = [8, 16], strides = [1, 1]} : vector<8x192xf32> to vector<8x16xf32>
    %111 = vector.extract_strided_slice %33 {offsets = [0, 176], sizes = [8, 16], strides = [1, 1]} : vector<8x192xf32> to vector<8x16xf32>
    %112 = tpu.transpose %110, [1, 0] : vector<8x16xf32> -> vector<16x8xf32>
    %cst_41 = arith.constant dense<0.000000e+00> : vector<8x8xf32>
    %113 = tpu.matmul %109, %112, %cst_41 {dimension_numbers = #tpu.dot_dimension_numbers<[1], [0], [0], [1], [0, 0, 1, 1], [], []>} : vector<8x16xf32>, vector<16x8xf32>, vector<8x8xf32> -> vector<8x8xf32>
    %cst_42 = arith.constant 2.500000e-01 : f32
    %114 = vector.broadcast %cst_42 : f32 to vector<8x8xf32>
    %115 = arith.mulf %113, %114 : vector<8x8xf32>
    %116 = vector.broadcast %35 : vector<1x8xf32> to vector<8x8xf32>
    %117 = arith.addf %115, %116 : vector<8x8xf32>
    %cst_43 = arith.constant dense<0xFF800000> : vector<8xf32>
    %118 = vector.multi_reduction <maximumf>, %117, %cst_43 [1] : vector<8x8xf32> to vector<8xf32>
    %119 = vector.shape_cast %118 : vector<8xf32> to vector<8x1xf32>
    %120 = vector.broadcast %119 : vector<8x1xf32> to vector<8x8xf32>
    %121 = arith.subf %117, %120 : vector<8x8xf32>
    %122 = math.exp %121 : vector<8x8xf32>
    %cst_44 = arith.constant dense<0.000000e+00> : vector<8xf32>
    %123 = vector.multi_reduction <add>, %122, %cst_44 [1] : vector<8x8xf32> to vector<8xf32>
    %124 = vector.shape_cast %123 : vector<8xf32> to vector<8x1xf32>
    %125 = tpu.reciprocal %124 {approx = true} : vector<8x1xf32> -> vector<8x1xf32>
    %126 = vector.broadcast %125 : vector<8x1xf32> to vector<8x8xf32>
    %127 = arith.mulf %122, %126 : vector<8x8xf32>
    %cst_45 = arith.constant dense<0.000000e+00> : vector<8x16xf32>
    %128 = tpu.matmul %127, %111, %cst_45 {dimension_numbers = #tpu.dot_dimension_numbers<[1], [0], [0], [1], [0, 0, 1, 1], [], []>} : vector<8x8xf32>, vector<8x16xf32>, vector<8x16xf32> -> vector<8x16xf32>
    %129 = arith.truncf %128 : vector<8x16xf32> to vector<8x16xbf16>
    %130 = vector.extract_strided_slice %32 {offsets = [48, 0], sizes = [16, 64], strides = [1, 1]} : vector<64x64xbf16> to vector<16x64xbf16>
    %cst_46 = arith.constant dense<0.000000e+00> : vector<8x64xf32>
    %131 = tpu.matmul %129, %130, %cst_46 {dimension_numbers = #tpu.dot_dimension_numbers<[1], [0], [0], [1], [0, 0, 1, 1], [], []>} : vector<8x16xbf16>, vector<16x64xbf16>, vector<8x64xf32> -> vector<8x64xf32>
    %132 = arith.addf %108, %131 : vector<8x64xf32>
    %133 = vector.extract_strided_slice %30 {offsets = [8, 0], sizes = [8, 192], strides = [1, 1]} : vector<16x192xf32> to vector<8x192xf32>
    %c1 = arith.constant 1 : index
    %c0_47 = arith.constant 0 : index
    %c0_48 = arith.constant 0 : index
    %134 = vector.load %arg1[%c1, %c0_47, %c0_48] : memref<2x1x8xf32, #tpu.memory_space<vmem>>, vector<1x1x8xf32>
    %135 = vector.shape_cast %134 : vector<1x1x8xf32> to vector<1x8xf32>
    %cst_49 = arith.constant 0.000000e+00 : f32
    %136 = vector.broadcast %cst_49 : f32 to vector<8x64xf32>
    %137 = vector.extract_strided_slice %133 {offsets = [0, 0], sizes = [8, 16], strides = [1, 1]} : vector<8x192xf32> to vector<8x16xf32>
    %138 = vector.extract_strided_slice %133 {offsets = [0, 64], sizes = [8, 16], strides = [1, 1]} : vector<8x192xf32> to vector<8x16xf32>
    %139 = vector.extract_strided_slice %133 {offsets = [0, 128], sizes = [8, 16], strides = [1, 1]} : vector<8x192xf32> to vector<8x16xf32>
    %140 = tpu.transpose %138, [1, 0] : vector<8x16xf32> -> vector<16x8xf32>
    %cst_50 = arith.constant dense<0.000000e+00> : vector<8x8xf32>
    %141 = tpu.matmul %137, %140, %cst_50 {dimension_numbers = #tpu.dot_dimension_numbers<[1], [0], [0], [1], [0, 0, 1, 1], [], []>} : vector<8x16xf32>, vector<16x8xf32>, vector<8x8xf32> -> vector<8x8xf32>
    %cst_51 = arith.constant 2.500000e-01 : f32
    %142 = vector.broadcast %cst_51 : f32 to vector<8x8xf32>
    %143 = arith.mulf %141, %142 : vector<8x8xf32>
    %144 = vector.broadcast %135 : vector<1x8xf32> to vector<8x8xf32>
    %145 = arith.addf %143, %144 : vector<8x8xf32>
    %cst_52 = arith.constant dense<0xFF800000> : vector<8xf32>
    %146 = vector.multi_reduction <maximumf>, %145, %cst_52 [1] : vector<8x8xf32> to vector<8xf32>
    %147 = vector.shape_cast %146 : vector<8xf32> to vector<8x1xf32>
    %148 = vector.broadcast %147 : vector<8x1xf32> to vector<8x8xf32>
    %149 = arith.subf %145, %148 : vector<8x8xf32>
    %150 = math.exp %149 : vector<8x8xf32>
    %cst_53 = arith.constant dense<0.000000e+00> : vector<8xf32>
    %151 = vector.multi_reduction <add>, %150, %cst_53 [1] : vector<8x8xf32> to vector<8xf32>
    %152 = vector.shape_cast %151 : vector<8xf32> to vector<8x1xf32>
    %153 = tpu.reciprocal %152 {approx = true} : vector<8x1xf32> -> vector<8x1xf32>
    %154 = vector.broadcast %153 : vector<8x1xf32> to vector<8x8xf32>
    %155 = arith.mulf %150, %154 : vector<8x8xf32>
    %cst_54 = arith.constant dense<0.000000e+00> : vector<8x16xf32>
    %156 = tpu.matmul %155, %139, %cst_54 {dimension_numbers = #tpu.dot_dimension_numbers<[1], [0], [0], [1], [0, 0, 1, 1], [], []>} : vector<8x8xf32>, vector<8x16xf32>, vector<8x16xf32> -> vector<8x16xf32>
    %157 = arith.truncf %156 : vector<8x16xf32> to vector<8x16xbf16>
    %158 = vector.extract_strided_slice %32 {offsets = [0, 0], sizes = [16, 64], strides = [1, 1]} : vector<64x64xbf16> to vector<16x64xbf16>
    %cst_55 = arith.constant dense<0.000000e+00> : vector<8x64xf32>
    %159 = tpu.matmul %157, %158, %cst_55 {dimension_numbers = #tpu.dot_dimension_numbers<[1], [0], [0], [1], [0, 0, 1, 1], [], []>} : vector<8x16xbf16>, vector<16x64xbf16>, vector<8x64xf32> -> vector<8x64xf32>
    %160 = arith.addf %136, %159 : vector<8x64xf32>
    %161 = vector.extract_strided_slice %133 {offsets = [0, 16], sizes = [8, 16], strides = [1, 1]} : vector<8x192xf32> to vector<8x16xf32>
    %162 = vector.extract_strided_slice %133 {offsets = [0, 80], sizes = [8, 16], strides = [1, 1]} : vector<8x192xf32> to vector<8x16xf32>
    %163 = vector.extract_strided_slice %133 {offsets = [0, 144], sizes = [8, 16], strides = [1, 1]} : vector<8x192xf32> to vector<8x16xf32>
    %164 = tpu.transpose %162, [1, 0] : vector<8x16xf32> -> vector<16x8xf32>
    %cst_56 = arith.constant dense<0.000000e+00> : vector<8x8xf32>
    %165 = tpu.matmul %161, %164, %cst_56 {dimension_numbers = #tpu.dot_dimension_numbers<[1], [0], [0], [1], [0, 0, 1, 1], [], []>} : vector<8x16xf32>, vector<16x8xf32>, vector<8x8xf32> -> vector<8x8xf32>
    %cst_57 = arith.constant 2.500000e-01 : f32
    %166 = vector.broadcast %cst_57 : f32 to vector<8x8xf32>
    %167 = arith.mulf %165, %166 : vector<8x8xf32>
    %168 = vector.broadcast %135 : vector<1x8xf32> to vector<8x8xf32>
    %169 = arith.addf %167, %168 : vector<8x8xf32>
    %cst_58 = arith.constant dense<0xFF800000> : vector<8xf32>
    %170 = vector.multi_reduction <maximumf>, %169, %cst_58 [1] : vector<8x8xf32> to vector<8xf32>
    %171 = vector.shape_cast %170 : vector<8xf32> to vector<8x1xf32>
    %172 = vector.broadcast %171 : vector<8x1xf32> to vector<8x8xf32>
    %173 = arith.subf %169, %172 : vector<8x8xf32>
    %174 = math.exp %173 : vector<8x8xf32>
    %cst_59 = arith.constant dense<0.000000e+00> : vector<8xf32>
    %175 = vector.multi_reduction <add>, %174, %cst_59 [1] : vector<8x8xf32> to vector<8xf32>
    %176 = vector.shape_cast %175 : vector<8xf32> to vector<8x1xf32>
    %177 = tpu.reciprocal %176 {approx = true} : vector<8x1xf32> -> vector<8x1xf32>
    %178 = vector.broadcast %177 : vector<8x1xf32> to vector<8x8xf32>
    %179 = arith.mulf %174, %178 : vector<8x8xf32>
    %cst_60 = arith.constant dense<0.000000e+00> : vector<8x16xf32>
    %180 = tpu.matmul %179, %163, %cst_60 {dimension_numbers = #tpu.dot_dimension_numbers<[1], [0], [0], [1], [0, 0, 1, 1], [], []>} : vector<8x8xf32>, vector<8x16xf32>, vector<8x16xf32> -> vector<8x16xf32>
    %181 = arith.truncf %180 : vector<8x16xf32> to vector<8x16xbf16>
    %182 = vector.extract_strided_slice %32 {offsets = [16, 0], sizes = [16, 64], strides = [1, 1]} : vector<64x64xbf16> to vector<16x64xbf16>
    %cst_61 = arith.constant dense<0.000000e+00> : vector<8x64xf32>
    %183 = tpu.matmul %181, %182, %cst_61 {dimension_numbers = #tpu.dot_dimension_numbers<[1], [0], [0], [1], [0, 0, 1, 1], [], []>} : vector<8x16xbf16>, vector<16x64xbf16>, vector<8x64xf32> -> vector<8x64xf32>
    %184 = arith.addf %160, %183 : vector<8x64xf32>
    %185 = vector.extract_strided_slice %133 {offsets = [0, 32], sizes = [8, 16], strides = [1, 1]} : vector<8x192xf32> to vector<8x16xf32>
    %186 = vector.extract_strided_slice %133 {offsets = [0, 96], sizes = [8, 16], strides = [1, 1]} : vector<8x192xf32> to vector<8x16xf32>
    %187 = vector.extract_strided_slice %133 {offsets = [0, 160], sizes = [8, 16], strides = [1, 1]} : vector<8x192xf32> to vector<8x16xf32>
    %188 = tpu.transpose %186, [1, 0] : vector<8x16xf32> -> vector<16x8xf32>
    %cst_62 = arith.constant dense<0.000000e+00> : vector<8x8xf32>
    %189 = tpu.matmul %185, %188, %cst_62 {dimension_numbers = #tpu.dot_dimension_numbers<[1], [0], [0], [1], [0, 0, 1, 1], [], []>} : vector<8x16xf32>, vector<16x8xf32>, vector<8x8xf32> -> vector<8x8xf32>
    %cst_63 = arith.constant 2.500000e-01 : f32
    %190 = vector.broadcast %cst_63 : f32 to vector<8x8xf32>
    %191 = arith.mulf %189, %190 : vector<8x8xf32>
    %192 = vector.broadcast %135 : vector<1x8xf32> to vector<8x8xf32>
    %193 = arith.addf %191, %192 : vector<8x8xf32>
    %cst_64 = arith.constant dense<0xFF800000> : vector<8xf32>
    %194 = vector.multi_reduction <maximumf>, %193, %cst_64 [1] : vector<8x8xf32> to vector<8xf32>
    %195 = vector.shape_cast %194 : vector<8xf32> to vector<8x1xf32>
    %196 = vector.broadcast %195 : vector<8x1xf32> to vector<8x8xf32>
    %197 = arith.subf %193, %196 : vector<8x8xf32>
    %198 = math.exp %197 : vector<8x8xf32>
    %cst_65 = arith.constant dense<0.000000e+00> : vector<8xf32>
    %199 = vector.multi_reduction <add>, %198, %cst_65 [1] : vector<8x8xf32> to vector<8xf32>
    %200 = vector.shape_cast %199 : vector<8xf32> to vector<8x1xf32>
    %201 = tpu.reciprocal %200 {approx = true} : vector<8x1xf32> -> vector<8x1xf32>
    %202 = vector.broadcast %201 : vector<8x1xf32> to vector<8x8xf32>
    %203 = arith.mulf %198, %202 : vector<8x8xf32>
    %cst_66 = arith.constant dense<0.000000e+00> : vector<8x16xf32>
    %204 = tpu.matmul %203, %187, %cst_66 {dimension_numbers = #tpu.dot_dimension_numbers<[1], [0], [0], [1], [0, 0, 1, 1], [], []>} : vector<8x8xf32>, vector<8x16xf32>, vector<8x16xf32> -> vector<8x16xf32>
    %205 = arith.truncf %204 : vector<8x16xf32> to vector<8x16xbf16>
    %206 = vector.extract_strided_slice %32 {offsets = [32, 0], sizes = [16, 64], strides = [1, 1]} : vector<64x64xbf16> to vector<16x64xbf16>
    %cst_67 = arith.constant dense<0.000000e+00> : vector<8x64xf32>
    %207 = tpu.matmul %205, %206, %cst_67 {dimension_numbers = #tpu.dot_dimension_numbers<[1], [0], [0], [1], [0, 0, 1, 1], [], []>} : vector<8x16xbf16>, vector<16x64xbf16>, vector<8x64xf32> -> vector<8x64xf32>
    %208 = arith.addf %184, %207 : vector<8x64xf32>
    %209 = vector.extract_strided_slice %133 {offsets = [0, 48], sizes = [8, 16], strides = [1, 1]} : vector<8x192xf32> to vector<8x16xf32>
    %210 = vector.extract_strided_slice %133 {offsets = [0, 112], sizes = [8, 16], strides = [1, 1]} : vector<8x192xf32> to vector<8x16xf32>
    %211 = vector.extract_strided_slice %133 {offsets = [0, 176], sizes = [8, 16], strides = [1, 1]} : vector<8x192xf32> to vector<8x16xf32>
    %212 = tpu.transpose %210, [1, 0] : vector<8x16xf32> -> vector<16x8xf32>
    %cst_68 = arith.constant dense<0.000000e+00> : vector<8x8xf32>
    %213 = tpu.matmul %209, %212, %cst_68 {dimension_numbers = #tpu.dot_dimension_numbers<[1], [0], [0], [1], [0, 0, 1, 1], [], []>} : vector<8x16xf32>, vector<16x8xf32>, vector<8x8xf32> -> vector<8x8xf32>
    %cst_69 = arith.constant 2.500000e-01 : f32
    %214 = vector.broadcast %cst_69 : f32 to vector<8x8xf32>
    %215 = arith.mulf %213, %214 : vector<8x8xf32>
    %216 = vector.broadcast %135 : vector<1x8xf32> to vector<8x8xf32>
    %217 = arith.addf %215, %216 : vector<8x8xf32>
    %cst_70 = arith.constant dense<0xFF800000> : vector<8xf32>
    %218 = vector.multi_reduction <maximumf>, %217, %cst_70 [1] : vector<8x8xf32> to vector<8xf32>
    %219 = vector.shape_cast %218 : vector<8xf32> to vector<8x1xf32>
    %220 = vector.broadcast %219 : vector<8x1xf32> to vector<8x8xf32>
    %221 = arith.subf %217, %220 : vector<8x8xf32>
    %222 = math.exp %221 : vector<8x8xf32>
    %cst_71 = arith.constant dense<0.000000e+00> : vector<8xf32>
    %223 = vector.multi_reduction <add>, %222, %cst_71 [1] : vector<8x8xf32> to vector<8xf32>
    %224 = vector.shape_cast %223 : vector<8xf32> to vector<8x1xf32>
    %225 = tpu.reciprocal %224 {approx = true} : vector<8x1xf32> -> vector<8x1xf32>
    %226 = vector.broadcast %225 : vector<8x1xf32> to vector<8x8xf32>
    %227 = arith.mulf %222, %226 : vector<8x8xf32>
    %cst_72 = arith.constant dense<0.000000e+00> : vector<8x16xf32>
    %228 = tpu.matmul %227, %211, %cst_72 {dimension_numbers = #tpu.dot_dimension_numbers<[1], [0], [0], [1], [0, 0, 1, 1], [], []>} : vector<8x8xf32>, vector<8x16xf32>, vector<8x16xf32> -> vector<8x16xf32>
    %229 = arith.truncf %228 : vector<8x16xf32> to vector<8x16xbf16>
    %230 = vector.extract_strided_slice %32 {offsets = [48, 0], sizes = [16, 64], strides = [1, 1]} : vector<64x64xbf16> to vector<16x64xbf16>
    %cst_73 = arith.constant dense<0.000000e+00> : vector<8x64xf32>
    %231 = tpu.matmul %229, %230, %cst_73 {dimension_numbers = #tpu.dot_dimension_numbers<[1], [0], [0], [1], [0, 0, 1, 1], [], []>} : vector<8x16xbf16>, vector<16x64xbf16>, vector<8x64xf32> -> vector<8x64xf32>
    %232 = arith.addf %208, %231 : vector<8x64xf32>
    %233 = tpu.concatenate %132, %232 in 0 : vector<8x64xf32>, vector<8x64xf32> -> vector<16x64xf32>
    %c0_74 = arith.constant 0 : index
    %c0_75 = arith.constant 0 : index
    %c0_76 = arith.constant 0 : index
    %234 = vector.load %arg7[%c0_74, %c0_75, %c0_76] : memref<2x1x64xf32, #tpu.memory_space<vmem>>, vector<1x1x64xf32>
    %235 = vector.shape_cast %234 : vector<1x1x64xf32> to vector<1x64xf32>
    %236 = vector.broadcast %235 : vector<1x64xf32> to vector<16x64xf32>
    %237 = arith.addf %233, %236 : vector<16x64xf32>
    %238 = arith.addf %237, %22 : vector<16x64xf32>
    %c0_77 = arith.constant 0 : index
    %c0_78 = arith.constant 0 : index
    %c0_79 = arith.constant 0 : index
    %239 = vector.load %arg8[%c0_77, %c0_78, %c0_79] : memref<2x1x64xf32, #tpu.memory_space<vmem>>, vector<1x1x64xf32>
    %240 = vector.shape_cast %239 : vector<1x1x64xf32> to vector<1x64xf32>
    %c0_80 = arith.constant 0 : index
    %c0_81 = arith.constant 0 : index
    %c0_82 = arith.constant 0 : index
    %241 = vector.load %arg9[%c0_80, %c0_81, %c0_82] : memref<2x1x64xf32, #tpu.memory_space<vmem>>, vector<1x1x64xf32>
    %242 = vector.shape_cast %241 : vector<1x1x64xf32> to vector<1x64xf32>
    %cst_83 = arith.constant dense<0.000000e+00> : vector<16xf32>
    %243 = vector.multi_reduction <add>, %238, %cst_83 [1] : vector<16x64xf32> to vector<16xf32>
    %244 = vector.shape_cast %243 : vector<16xf32> to vector<16x1xf32>
    %cst_84 = arith.constant 6.400000e+01 : f32
    %245 = vector.broadcast %cst_84 : f32 to vector<16x1xf32>
    %246 = arith.divf %244, %245 : vector<16x1xf32>
    %247 = vector.broadcast %246 : vector<16x1xf32> to vector<16x64xf32>
    %248 = arith.subf %238, %247 : vector<16x64xf32>
    %249 = arith.mulf %248, %248 : vector<16x64xf32>
    %cst_85 = arith.constant dense<0.000000e+00> : vector<16xf32>
    %250 = vector.multi_reduction <add>, %249, %cst_85 [1] : vector<16x64xf32> to vector<16xf32>
    %251 = vector.shape_cast %250 : vector<16xf32> to vector<16x1xf32>
    %cst_86 = arith.constant 6.400000e+01 : f32
    %252 = vector.broadcast %cst_86 : f32 to vector<16x1xf32>
    %253 = arith.divf %251, %252 : vector<16x1xf32>
    %cst_87 = arith.constant 9.99999974E-6 : f32
    %254 = vector.broadcast %cst_87 : f32 to vector<16x1xf32>
    %255 = arith.addf %253, %254 : vector<16x1xf32>
    %256 = math.rsqrt %255 : vector<16x1xf32>
    %257 = vector.broadcast %256 : vector<16x1xf32> to vector<16x64xf32>
    %258 = arith.mulf %248, %257 : vector<16x64xf32>
    %259 = vector.broadcast %240 : vector<1x64xf32> to vector<16x64xf32>
    %260 = arith.mulf %258, %259 : vector<16x64xf32>
    %261 = vector.broadcast %242 : vector<1x64xf32> to vector<16x64xf32>
    %262 = arith.addf %260, %261 : vector<16x64xf32>
    %263 = arith.truncf %262 : vector<16x64xf32> to vector<16x64xbf16>
    %c0_88 = arith.constant 0 : index
    %c0_89 = arith.constant 0 : index
    %c0_90 = arith.constant 0 : index
    %264 = vector.load %arg10[%c0_88, %c0_89, %c0_90] : memref<2x64x128xbf16, #tpu.memory_space<vmem>>, vector<1x64x128xbf16>
    %265 = vector.shape_cast %264 : vector<1x64x128xbf16> to vector<64x128xbf16>
    %cst_91 = arith.constant dense<0.000000e+00> : vector<16x128xf32>
    %266 = tpu.matmul %263, %265, %cst_91 {dimension_numbers = #tpu.dot_dimension_numbers<[1], [0], [0], [1], [0, 0, 1, 1], [], []>} : vector<16x64xbf16>, vector<64x128xbf16>, vector<16x128xf32> -> vector<16x128xf32>
    %c0_92 = arith.constant 0 : index
    %c0_93 = arith.constant 0 : index
    %c0_94 = arith.constant 0 : index
    %267 = vector.load %arg11[%c0_92, %c0_93, %c0_94] : memref<2x1x128xf32, #tpu.memory_space<vmem>>, vector<1x1x128xf32>
    %268 = vector.shape_cast %267 : vector<1x1x128xf32> to vector<1x128xf32>
    %269 = vector.broadcast %268 : vector<1x128xf32> to vector<16x128xf32>
    %270 = arith.addf %266, %269 : vector<16x128xf32>
    %cst_95 = arith.constant 5.000000e-01 : f32
    %271 = vector.broadcast %cst_95 : f32 to vector<16x128xf32>
    %272 = arith.mulf %271, %270 : vector<16x128xf32>
    %cst_96 = arith.constant 4.471500e-02 : f32
    %273 = vector.broadcast %cst_96 : f32 to vector<16x128xf32>
    %274 = arith.mulf %273, %270 : vector<16x128xf32>
    %275 = arith.mulf %274, %270 : vector<16x128xf32>
    %276 = arith.mulf %275, %270 : vector<16x128xf32>
    %277 = arith.addf %270, %276 : vector<16x128xf32>
    %cst_97 = arith.constant 0.797884583 : f32
    %278 = vector.broadcast %cst_97 : f32 to vector<16x128xf32>
    %279 = arith.mulf %278, %277 : vector<16x128xf32>
    %280 = math.tanh %279 : vector<16x128xf32>
    %cst_98 = arith.constant 1.000000e+00 : f32
    %281 = vector.broadcast %cst_98 : f32 to vector<16x128xf32>
    %282 = arith.addf %281, %280 : vector<16x128xf32>
    %283 = arith.mulf %272, %282 : vector<16x128xf32>
    %284 = arith.truncf %283 : vector<16x128xf32> to vector<16x128xbf16>
    %c0_99 = arith.constant 0 : index
    %c0_100 = arith.constant 0 : index
    %c0_101 = arith.constant 0 : index
    %285 = vector.load %arg12[%c0_99, %c0_100, %c0_101] : memref<2x128x64xbf16, #tpu.memory_space<vmem>>, vector<1x128x64xbf16>
    %286 = vector.shape_cast %285 : vector<1x128x64xbf16> to vector<128x64xbf16>
    %cst_102 = arith.constant dense<0.000000e+00> : vector<16x64xf32>
    %287 = tpu.matmul %284, %286, %cst_102 {dimension_numbers = #tpu.dot_dimension_numbers<[1], [0], [0], [1], [0, 0, 1, 1], [], []>} : vector<16x128xbf16>, vector<128x64xbf16>, vector<16x64xf32> -> vector<16x64xf32>
    %c0_103 = arith.constant 0 : index
    %c0_104 = arith.constant 0 : index
    %c0_105 = arith.constant 0 : index
    %288 = vector.load %arg13[%c0_103, %c0_104, %c0_105] : memref<2x1x64xf32, #tpu.memory_space<vmem>>, vector<1x1x64xf32>
    %289 = vector.shape_cast %288 : vector<1x1x64xf32> to vector<1x64xf32>
    %290 = vector.broadcast %289 : vector<1x64xf32> to vector<16x64xf32>
    %291 = arith.addf %287, %290 : vector<16x64xf32>
    %292 = arith.addf %291, %262 : vector<16x64xf32>
    %c0_106 = arith.constant 0 : index
    %c0_107 = arith.constant 0 : index
    %c0_108 = arith.constant 0 : index
    %293 = vector.load %arg14[%c0_106, %c0_107, %c0_108] : memref<2x1x64xf32, #tpu.memory_space<vmem>>, vector<1x1x64xf32>
    %294 = vector.shape_cast %293 : vector<1x1x64xf32> to vector<1x64xf32>
    %c0_109 = arith.constant 0 : index
    %c0_110 = arith.constant 0 : index
    %c0_111 = arith.constant 0 : index
    %295 = vector.load %arg15[%c0_109, %c0_110, %c0_111] : memref<2x1x64xf32, #tpu.memory_space<vmem>>, vector<1x1x64xf32>
    %296 = vector.shape_cast %295 : vector<1x1x64xf32> to vector<1x64xf32>
    %cst_112 = arith.constant dense<0.000000e+00> : vector<16xf32>
    %297 = vector.multi_reduction <add>, %292, %cst_112 [1] : vector<16x64xf32> to vector<16xf32>
    %298 = vector.shape_cast %297 : vector<16xf32> to vector<16x1xf32>
    %cst_113 = arith.constant 6.400000e+01 : f32
    %299 = vector.broadcast %cst_113 : f32 to vector<16x1xf32>
    %300 = arith.divf %298, %299 : vector<16x1xf32>
    %301 = vector.broadcast %300 : vector<16x1xf32> to vector<16x64xf32>
    %302 = arith.subf %292, %301 : vector<16x64xf32>
    %303 = arith.mulf %302, %302 : vector<16x64xf32>
    %cst_114 = arith.constant dense<0.000000e+00> : vector<16xf32>
    %304 = vector.multi_reduction <add>, %303, %cst_114 [1] : vector<16x64xf32> to vector<16xf32>
    %305 = vector.shape_cast %304 : vector<16xf32> to vector<16x1xf32>
    %cst_115 = arith.constant 6.400000e+01 : f32
    %306 = vector.broadcast %cst_115 : f32 to vector<16x1xf32>
    %307 = arith.divf %305, %306 : vector<16x1xf32>
    %cst_116 = arith.constant 9.99999974E-6 : f32
    %308 = vector.broadcast %cst_116 : f32 to vector<16x1xf32>
    %309 = arith.addf %307, %308 : vector<16x1xf32>
    %310 = math.rsqrt %309 : vector<16x1xf32>
    %311 = vector.broadcast %310 : vector<16x1xf32> to vector<16x64xf32>
    %312 = arith.mulf %302, %311 : vector<16x64xf32>
    %313 = vector.broadcast %294 : vector<1x64xf32> to vector<16x64xf32>
    %314 = arith.mulf %312, %313 : vector<16x64xf32>
    %315 = vector.broadcast %296 : vector<1x64xf32> to vector<16x64xf32>
    %316 = arith.addf %314, %315 : vector<16x64xf32>
    %317 = arith.truncf %316 : vector<16x64xf32> to vector<16x64xbf16>
    %c1_117 = arith.constant 1 : index
    %c0_118 = arith.constant 0 : index
    %c0_119 = arith.constant 0 : index
    %318 = vector.load %arg4[%c1_117, %c0_118, %c0_119] : memref<2x64x192xbf16, #tpu.memory_space<vmem>>, vector<1x64x192xbf16>
    %319 = vector.shape_cast %318 : vector<1x64x192xbf16> to vector<64x192xbf16>
    %cst_120 = arith.constant dense<0.000000e+00> : vector<16x192xf32>
    %320 = tpu.matmul %317, %319, %cst_120 {dimension_numbers = #tpu.dot_dimension_numbers<[1], [0], [0], [1], [0, 0, 1, 1], [], []>} : vector<16x64xbf16>, vector<64x192xbf16>, vector<16x192xf32> -> vector<16x192xf32>
    %c1_121 = arith.constant 1 : index
    %c0_122 = arith.constant 0 : index
    %c0_123 = arith.constant 0 : index
    %321 = vector.load %arg5[%c1_121, %c0_122, %c0_123] : memref<2x1x192xf32, #tpu.memory_space<vmem>>, vector<1x1x192xf32>
    %322 = vector.shape_cast %321 : vector<1x1x192xf32> to vector<1x192xf32>
    %323 = vector.broadcast %322 : vector<1x192xf32> to vector<16x192xf32>
    %324 = arith.addf %320, %323 : vector<16x192xf32>
    %c1_124 = arith.constant 1 : index
    %c0_125 = arith.constant 0 : index
    %c0_126 = arith.constant 0 : index
    %325 = vector.load %arg6[%c1_124, %c0_125, %c0_126] : memref<2x64x64xbf16, #tpu.memory_space<vmem>>, vector<1x64x64xbf16>
    %326 = vector.shape_cast %325 : vector<1x64x64xbf16> to vector<64x64xbf16>
    %327 = vector.extract_strided_slice %324 {offsets = [0, 0], sizes = [8, 192], strides = [1, 1]} : vector<16x192xf32> to vector<8x192xf32>
    %c0_127 = arith.constant 0 : index
    %c0_128 = arith.constant 0 : index
    %c0_129 = arith.constant 0 : index
    %328 = vector.load %arg1[%c0_127, %c0_128, %c0_129] : memref<2x1x8xf32, #tpu.memory_space<vmem>>, vector<1x1x8xf32>
    %329 = vector.shape_cast %328 : vector<1x1x8xf32> to vector<1x8xf32>
    %cst_130 = arith.constant 0.000000e+00 : f32
    %330 = vector.broadcast %cst_130 : f32 to vector<8x64xf32>
    %331 = vector.extract_strided_slice %327 {offsets = [0, 0], sizes = [8, 16], strides = [1, 1]} : vector<8x192xf32> to vector<8x16xf32>
    %332 = vector.extract_strided_slice %327 {offsets = [0, 64], sizes = [8, 16], strides = [1, 1]} : vector<8x192xf32> to vector<8x16xf32>
    %333 = vector.extract_strided_slice %327 {offsets = [0, 128], sizes = [8, 16], strides = [1, 1]} : vector<8x192xf32> to vector<8x16xf32>
    %334 = tpu.transpose %332, [1, 0] : vector<8x16xf32> -> vector<16x8xf32>
    %cst_131 = arith.constant dense<0.000000e+00> : vector<8x8xf32>
    %335 = tpu.matmul %331, %334, %cst_131 {dimension_numbers = #tpu.dot_dimension_numbers<[1], [0], [0], [1], [0, 0, 1, 1], [], []>} : vector<8x16xf32>, vector<16x8xf32>, vector<8x8xf32> -> vector<8x8xf32>
    %cst_132 = arith.constant 2.500000e-01 : f32
    %336 = vector.broadcast %cst_132 : f32 to vector<8x8xf32>
    %337 = arith.mulf %335, %336 : vector<8x8xf32>
    %338 = vector.broadcast %329 : vector<1x8xf32> to vector<8x8xf32>
    %339 = arith.addf %337, %338 : vector<8x8xf32>
    %cst_133 = arith.constant dense<0xFF800000> : vector<8xf32>
    %340 = vector.multi_reduction <maximumf>, %339, %cst_133 [1] : vector<8x8xf32> to vector<8xf32>
    %341 = vector.shape_cast %340 : vector<8xf32> to vector<8x1xf32>
    %342 = vector.broadcast %341 : vector<8x1xf32> to vector<8x8xf32>
    %343 = arith.subf %339, %342 : vector<8x8xf32>
    %344 = math.exp %343 : vector<8x8xf32>
    %cst_134 = arith.constant dense<0.000000e+00> : vector<8xf32>
    %345 = vector.multi_reduction <add>, %344, %cst_134 [1] : vector<8x8xf32> to vector<8xf32>
    %346 = vector.shape_cast %345 : vector<8xf32> to vector<8x1xf32>
    %347 = tpu.reciprocal %346 {approx = true} : vector<8x1xf32> -> vector<8x1xf32>
    %348 = vector.broadcast %347 : vector<8x1xf32> to vector<8x8xf32>
    %349 = arith.mulf %344, %348 : vector<8x8xf32>
    %cst_135 = arith.constant dense<0.000000e+00> : vector<8x16xf32>
    %350 = tpu.matmul %349, %333, %cst_135 {dimension_numbers = #tpu.dot_dimension_numbers<[1], [0], [0], [1], [0, 0, 1, 1], [], []>} : vector<8x8xf32>, vector<8x16xf32>, vector<8x16xf32> -> vector<8x16xf32>
    %351 = arith.truncf %350 : vector<8x16xf32> to vector<8x16xbf16>
    %352 = vector.extract_strided_slice %326 {offsets = [0, 0], sizes = [16, 64], strides = [1, 1]} : vector<64x64xbf16> to vector<16x64xbf16>
    %cst_136 = arith.constant dense<0.000000e+00> : vector<8x64xf32>
    %353 = tpu.matmul %351, %352, %cst_136 {dimension_numbers = #tpu.dot_dimension_numbers<[1], [0], [0], [1], [0, 0, 1, 1], [], []>} : vector<8x16xbf16>, vector<16x64xbf16>, vector<8x64xf32> -> vector<8x64xf32>
    %354 = arith.addf %330, %353 : vector<8x64xf32>
    %355 = vector.extract_strided_slice %327 {offsets = [0, 16], sizes = [8, 16], strides = [1, 1]} : vector<8x192xf32> to vector<8x16xf32>
    %356 = vector.extract_strided_slice %327 {offsets = [0, 80], sizes = [8, 16], strides = [1, 1]} : vector<8x192xf32> to vector<8x16xf32>
    %357 = vector.extract_strided_slice %327 {offsets = [0, 144], sizes = [8, 16], strides = [1, 1]} : vector<8x192xf32> to vector<8x16xf32>
    %358 = tpu.transpose %356, [1, 0] : vector<8x16xf32> -> vector<16x8xf32>
    %cst_137 = arith.constant dense<0.000000e+00> : vector<8x8xf32>
    %359 = tpu.matmul %355, %358, %cst_137 {dimension_numbers = #tpu.dot_dimension_numbers<[1], [0], [0], [1], [0, 0, 1, 1], [], []>} : vector<8x16xf32>, vector<16x8xf32>, vector<8x8xf32> -> vector<8x8xf32>
    %cst_138 = arith.constant 2.500000e-01 : f32
    %360 = vector.broadcast %cst_138 : f32 to vector<8x8xf32>
    %361 = arith.mulf %359, %360 : vector<8x8xf32>
    %362 = vector.broadcast %329 : vector<1x8xf32> to vector<8x8xf32>
    %363 = arith.addf %361, %362 : vector<8x8xf32>
    %cst_139 = arith.constant dense<0xFF800000> : vector<8xf32>
    %364 = vector.multi_reduction <maximumf>, %363, %cst_139 [1] : vector<8x8xf32> to vector<8xf32>
    %365 = vector.shape_cast %364 : vector<8xf32> to vector<8x1xf32>
    %366 = vector.broadcast %365 : vector<8x1xf32> to vector<8x8xf32>
    %367 = arith.subf %363, %366 : vector<8x8xf32>
    %368 = math.exp %367 : vector<8x8xf32>
    %cst_140 = arith.constant dense<0.000000e+00> : vector<8xf32>
    %369 = vector.multi_reduction <add>, %368, %cst_140 [1] : vector<8x8xf32> to vector<8xf32>
    %370 = vector.shape_cast %369 : vector<8xf32> to vector<8x1xf32>
    %371 = tpu.reciprocal %370 {approx = true} : vector<8x1xf32> -> vector<8x1xf32>
    %372 = vector.broadcast %371 : vector<8x1xf32> to vector<8x8xf32>
    %373 = arith.mulf %368, %372 : vector<8x8xf32>
    %cst_141 = arith.constant dense<0.000000e+00> : vector<8x16xf32>
    %374 = tpu.matmul %373, %357, %cst_141 {dimension_numbers = #tpu.dot_dimension_numbers<[1], [0], [0], [1], [0, 0, 1, 1], [], []>} : vector<8x8xf32>, vector<8x16xf32>, vector<8x16xf32> -> vector<8x16xf32>
    %375 = arith.truncf %374 : vector<8x16xf32> to vector<8x16xbf16>
    %376 = vector.extract_strided_slice %326 {offsets = [16, 0], sizes = [16, 64], strides = [1, 1]} : vector<64x64xbf16> to vector<16x64xbf16>
    %cst_142 = arith.constant dense<0.000000e+00> : vector<8x64xf32>
    %377 = tpu.matmul %375, %376, %cst_142 {dimension_numbers = #tpu.dot_dimension_numbers<[1], [0], [0], [1], [0, 0, 1, 1], [], []>} : vector<8x16xbf16>, vector<16x64xbf16>, vector<8x64xf32> -> vector<8x64xf32>
    %378 = arith.addf %354, %377 : vector<8x64xf32>
    %379 = vector.extract_strided_slice %327 {offsets = [0, 32], sizes = [8, 16], strides = [1, 1]} : vector<8x192xf32> to vector<8x16xf32>
    %380 = vector.extract_strided_slice %327 {offsets = [0, 96], sizes = [8, 16], strides = [1, 1]} : vector<8x192xf32> to vector<8x16xf32>
    %381 = vector.extract_strided_slice %327 {offsets = [0, 160], sizes = [8, 16], strides = [1, 1]} : vector<8x192xf32> to vector<8x16xf32>
    %382 = tpu.transpose %380, [1, 0] : vector<8x16xf32> -> vector<16x8xf32>
    %cst_143 = arith.constant dense<0.000000e+00> : vector<8x8xf32>
    %383 = tpu.matmul %379, %382, %cst_143 {dimension_numbers = #tpu.dot_dimension_numbers<[1], [0], [0], [1], [0, 0, 1, 1], [], []>} : vector<8x16xf32>, vector<16x8xf32>, vector<8x8xf32> -> vector<8x8xf32>
    %cst_144 = arith.constant 2.500000e-01 : f32
    %384 = vector.broadcast %cst_144 : f32 to vector<8x8xf32>
    %385 = arith.mulf %383, %384 : vector<8x8xf32>
    %386 = vector.broadcast %329 : vector<1x8xf32> to vector<8x8xf32>
    %387 = arith.addf %385, %386 : vector<8x8xf32>
    %cst_145 = arith.constant dense<0xFF800000> : vector<8xf32>
    %388 = vector.multi_reduction <maximumf>, %387, %cst_145 [1] : vector<8x8xf32> to vector<8xf32>
    %389 = vector.shape_cast %388 : vector<8xf32> to vector<8x1xf32>
    %390 = vector.broadcast %389 : vector<8x1xf32> to vector<8x8xf32>
    %391 = arith.subf %387, %390 : vector<8x8xf32>
    %392 = math.exp %391 : vector<8x8xf32>
    %cst_146 = arith.constant dense<0.000000e+00> : vector<8xf32>
    %393 = vector.multi_reduction <add>, %392, %cst_146 [1] : vector<8x8xf32> to vector<8xf32>
    %394 = vector.shape_cast %393 : vector<8xf32> to vector<8x1xf32>
    %395 = tpu.reciprocal %394 {approx = true} : vector<8x1xf32> -> vector<8x1xf32>
    %396 = vector.broadcast %395 : vector<8x1xf32> to vector<8x8xf32>
    %397 = arith.mulf %392, %396 : vector<8x8xf32>
    %cst_147 = arith.constant dense<0.000000e+00> : vector<8x16xf32>
    %398 = tpu.matmul %397, %381, %cst_147 {dimension_numbers = #tpu.dot_dimension_numbers<[1], [0], [0], [1], [0, 0, 1, 1], [], []>} : vector<8x8xf32>, vector<8x16xf32>, vector<8x16xf32> -> vector<8x16xf32>
    %399 = arith.truncf %398 : vector<8x16xf32> to vector<8x16xbf16>
    %400 = vector.extract_strided_slice %326 {offsets = [32, 0], sizes = [16, 64], strides = [1, 1]} : vector<64x64xbf16> to vector<16x64xbf16>
    %cst_148 = arith.constant dense<0.000000e+00> : vector<8x64xf32>
    %401 = tpu.matmul %399, %400, %cst_148 {dimension_numbers = #tpu.dot_dimension_numbers<[1], [0], [0], [1], [0, 0, 1, 1], [], []>} : vector<8x16xbf16>, vector<16x64xbf16>, vector<8x64xf32> -> vector<8x64xf32>
    %402 = arith.addf %378, %401 : vector<8x64xf32>
    %403 = vector.extract_strided_slice %327 {offsets = [0, 48], sizes = [8, 16], strides = [1, 1]} : vector<8x192xf32> to vector<8x16xf32>
    %404 = vector.extract_strided_slice %327 {offsets = [0, 112], sizes = [8, 16], strides = [1, 1]} : vector<8x192xf32> to vector<8x16xf32>
    %405 = vector.extract_strided_slice %327 {offsets = [0, 176], sizes = [8, 16], strides = [1, 1]} : vector<8x192xf32> to vector<8x16xf32>
    %406 = tpu.transpose %404, [1, 0] : vector<8x16xf32> -> vector<16x8xf32>
    %cst_149 = arith.constant dense<0.000000e+00> : vector<8x8xf32>
    %407 = tpu.matmul %403, %406, %cst_149 {dimension_numbers = #tpu.dot_dimension_numbers<[1], [0], [0], [1], [0, 0, 1, 1], [], []>} : vector<8x16xf32>, vector<16x8xf32>, vector<8x8xf32> -> vector<8x8xf32>
    %cst_150 = arith.constant 2.500000e-01 : f32
    %408 = vector.broadcast %cst_150 : f32 to vector<8x8xf32>
    %409 = arith.mulf %407, %408 : vector<8x8xf32>
    %410 = vector.broadcast %329 : vector<1x8xf32> to vector<8x8xf32>
    %411 = arith.addf %409, %410 : vector<8x8xf32>
    %cst_151 = arith.constant dense<0xFF800000> : vector<8xf32>
    %412 = vector.multi_reduction <maximumf>, %411, %cst_151 [1] : vector<8x8xf32> to vector<8xf32>
    %413 = vector.shape_cast %412 : vector<8xf32> to vector<8x1xf32>
    %414 = vector.broadcast %413 : vector<8x1xf32> to vector<8x8xf32>
    %415 = arith.subf %411, %414 : vector<8x8xf32>
    %416 = math.exp %415 : vector<8x8xf32>
    %cst_152 = arith.constant dense<0.000000e+00> : vector<8xf32>
    %417 = vector.multi_reduction <add>, %416, %cst_152 [1] : vector<8x8xf32> to vector<8xf32>
    %418 = vector.shape_cast %417 : vector<8xf32> to vector<8x1xf32>
    %419 = tpu.reciprocal %418 {approx = true} : vector<8x1xf32> -> vector<8x1xf32>
    %420 = vector.broadcast %419 : vector<8x1xf32> to vector<8x8xf32>
    %421 = arith.mulf %416, %420 : vector<8x8xf32>
    %cst_153 = arith.constant dense<0.000000e+00> : vector<8x16xf32>
    %422 = tpu.matmul %421, %405, %cst_153 {dimension_numbers = #tpu.dot_dimension_numbers<[1], [0], [0], [1], [0, 0, 1, 1], [], []>} : vector<8x8xf32>, vector<8x16xf32>, vector<8x16xf32> -> vector<8x16xf32>
    %423 = arith.truncf %422 : vector<8x16xf32> to vector<8x16xbf16>
    %424 = vector.extract_strided_slice %326 {offsets = [48, 0], sizes = [16, 64], strides = [1, 1]} : vector<64x64xbf16> to vector<16x64xbf16>
    %cst_154 = arith.constant dense<0.000000e+00> : vector<8x64xf32>
    %425 = tpu.matmul %423, %424, %cst_154 {dimension_numbers = #tpu.dot_dimension_numbers<[1], [0], [0], [1], [0, 0, 1, 1], [], []>} : vector<8x16xbf16>, vector<16x64xbf16>, vector<8x64xf32> -> vector<8x64xf32>
    %426 = arith.addf %402, %425 : vector<8x64xf32>
    %427 = vector.extract_strided_slice %324 {offsets = [8, 0], sizes = [8, 192], strides = [1, 1]} : vector<16x192xf32> to vector<8x192xf32>
    %c1_155 = arith.constant 1 : index
    %c0_156 = arith.constant 0 : index
    %c0_157 = arith.constant 0 : index
    %428 = vector.load %arg1[%c1_155, %c0_156, %c0_157] : memref<2x1x8xf32, #tpu.memory_space<vmem>>, vector<1x1x8xf32>
    %429 = vector.shape_cast %428 : vector<1x1x8xf32> to vector<1x8xf32>
    %cst_158 = arith.constant 0.000000e+00 : f32
    %430 = vector.broadcast %cst_158 : f32 to vector<8x64xf32>
    %431 = vector.extract_strided_slice %427 {offsets = [0, 0], sizes = [8, 16], strides = [1, 1]} : vector<8x192xf32> to vector<8x16xf32>
    %432 = vector.extract_strided_slice %427 {offsets = [0, 64], sizes = [8, 16], strides = [1, 1]} : vector<8x192xf32> to vector<8x16xf32>
    %433 = vector.extract_strided_slice %427 {offsets = [0, 128], sizes = [8, 16], strides = [1, 1]} : vector<8x192xf32> to vector<8x16xf32>
    %434 = tpu.transpose %432, [1, 0] : vector<8x16xf32> -> vector<16x8xf32>
    %cst_159 = arith.constant dense<0.000000e+00> : vector<8x8xf32>
    %435 = tpu.matmul %431, %434, %cst_159 {dimension_numbers = #tpu.dot_dimension_numbers<[1], [0], [0], [1], [0, 0, 1, 1], [], []>} : vector<8x16xf32>, vector<16x8xf32>, vector<8x8xf32> -> vector<8x8xf32>
    %cst_160 = arith.constant 2.500000e-01 : f32
    %436 = vector.broadcast %cst_160 : f32 to vector<8x8xf32>
    %437 = arith.mulf %435, %436 : vector<8x8xf32>
    %438 = vector.broadcast %429 : vector<1x8xf32> to vector<8x8xf32>
    %439 = arith.addf %437, %438 : vector<8x8xf32>
    %cst_161 = arith.constant dense<0xFF800000> : vector<8xf32>
    %440 = vector.multi_reduction <maximumf>, %439, %cst_161 [1] : vector<8x8xf32> to vector<8xf32>
    %441 = vector.shape_cast %440 : vector<8xf32> to vector<8x1xf32>
    %442 = vector.broadcast %441 : vector<8x1xf32> to vector<8x8xf32>
    %443 = arith.subf %439, %442 : vector<8x8xf32>
    %444 = math.exp %443 : vector<8x8xf32>
    %cst_162 = arith.constant dense<0.000000e+00> : vector<8xf32>
    %445 = vector.multi_reduction <add>, %444, %cst_162 [1] : vector<8x8xf32> to vector<8xf32>
    %446 = vector.shape_cast %445 : vector<8xf32> to vector<8x1xf32>
    %447 = tpu.reciprocal %446 {approx = true} : vector<8x1xf32> -> vector<8x1xf32>
    %448 = vector.broadcast %447 : vector<8x1xf32> to vector<8x8xf32>
    %449 = arith.mulf %444, %448 : vector<8x8xf32>
    %cst_163 = arith.constant dense<0.000000e+00> : vector<8x16xf32>
    %450 = tpu.matmul %449, %433, %cst_163 {dimension_numbers = #tpu.dot_dimension_numbers<[1], [0], [0], [1], [0, 0, 1, 1], [], []>} : vector<8x8xf32>, vector<8x16xf32>, vector<8x16xf32> -> vector<8x16xf32>
    %451 = arith.truncf %450 : vector<8x16xf32> to vector<8x16xbf16>
    %452 = vector.extract_strided_slice %326 {offsets = [0, 0], sizes = [16, 64], strides = [1, 1]} : vector<64x64xbf16> to vector<16x64xbf16>
    %cst_164 = arith.constant dense<0.000000e+00> : vector<8x64xf32>
    %453 = tpu.matmul %451, %452, %cst_164 {dimension_numbers = #tpu.dot_dimension_numbers<[1], [0], [0], [1], [0, 0, 1, 1], [], []>} : vector<8x16xbf16>, vector<16x64xbf16>, vector<8x64xf32> -> vector<8x64xf32>
    %454 = arith.addf %430, %453 : vector<8x64xf32>
    %455 = vector.extract_strided_slice %427 {offsets = [0, 16], sizes = [8, 16], strides = [1, 1]} : vector<8x192xf32> to vector<8x16xf32>
    %456 = vector.extract_strided_slice %427 {offsets = [0, 80], sizes = [8, 16], strides = [1, 1]} : vector<8x192xf32> to vector<8x16xf32>
    %457 = vector.extract_strided_slice %427 {offsets = [0, 144], sizes = [8, 16], strides = [1, 1]} : vector<8x192xf32> to vector<8x16xf32>
    %458 = tpu.transpose %456, [1, 0] : vector<8x16xf32> -> vector<16x8xf32>
    %cst_165 = arith.constant dense<0.000000e+00> : vector<8x8xf32>
    %459 = tpu.matmul %455, %458, %cst_165 {dimension_numbers = #tpu.dot_dimension_numbers<[1], [0], [0], [1], [0, 0, 1, 1], [], []>} : vector<8x16xf32>, vector<16x8xf32>, vector<8x8xf32> -> vector<8x8xf32>
    %cst_166 = arith.constant 2.500000e-01 : f32
    %460 = vector.broadcast %cst_166 : f32 to vector<8x8xf32>
    %461 = arith.mulf %459, %460 : vector<8x8xf32>
    %462 = vector.broadcast %429 : vector<1x8xf32> to vector<8x8xf32>
    %463 = arith.addf %461, %462 : vector<8x8xf32>
    %cst_167 = arith.constant dense<0xFF800000> : vector<8xf32>
    %464 = vector.multi_reduction <maximumf>, %463, %cst_167 [1] : vector<8x8xf32> to vector<8xf32>
    %465 = vector.shape_cast %464 : vector<8xf32> to vector<8x1xf32>
    %466 = vector.broadcast %465 : vector<8x1xf32> to vector<8x8xf32>
    %467 = arith.subf %463, %466 : vector<8x8xf32>
    %468 = math.exp %467 : vector<8x8xf32>
    %cst_168 = arith.constant dense<0.000000e+00> : vector<8xf32>
    %469 = vector.multi_reduction <add>, %468, %cst_168 [1] : vector<8x8xf32> to vector<8xf32>
    %470 = vector.shape_cast %469 : vector<8xf32> to vector<8x1xf32>
    %471 = tpu.reciprocal %470 {approx = true} : vector<8x1xf32> -> vector<8x1xf32>
    %472 = vector.broadcast %471 : vector<8x1xf32> to vector<8x8xf32>
    %473 = arith.mulf %468, %472 : vector<8x8xf32>
    %cst_169 = arith.constant dense<0.000000e+00> : vector<8x16xf32>
    %474 = tpu.matmul %473, %457, %cst_169 {dimension_numbers = #tpu.dot_dimension_numbers<[1], [0], [0], [1], [0, 0, 1, 1], [], []>} : vector<8x8xf32>, vector<8x16xf32>, vector<8x16xf32> -> vector<8x16xf32>
    %475 = arith.truncf %474 : vector<8x16xf32> to vector<8x16xbf16>
    %476 = vector.extract_strided_slice %326 {offsets = [16, 0], sizes = [16, 64], strides = [1, 1]} : vector<64x64xbf16> to vector<16x64xbf16>
    %cst_170 = arith.constant dense<0.000000e+00> : vector<8x64xf32>
    %477 = tpu.matmul %475, %476, %cst_170 {dimension_numbers = #tpu.dot_dimension_numbers<[1], [0], [0], [1], [0, 0, 1, 1], [], []>} : vector<8x16xbf16>, vector<16x64xbf16>, vector<8x64xf32> -> vector<8x64xf32>
    %478 = arith.addf %454, %477 : vector<8x64xf32>
    %479 = vector.extract_strided_slice %427 {offsets = [0, 32], sizes = [8, 16], strides = [1, 1]} : vector<8x192xf32> to vector<8x16xf32>
    %480 = vector.extract_strided_slice %427 {offsets = [0, 96], sizes = [8, 16], strides = [1, 1]} : vector<8x192xf32> to vector<8x16xf32>
    %481 = vector.extract_strided_slice %427 {offsets = [0, 160], sizes = [8, 16], strides = [1, 1]} : vector<8x192xf32> to vector<8x16xf32>
    %482 = tpu.transpose %480, [1, 0] : vector<8x16xf32> -> vector<16x8xf32>
    %cst_171 = arith.constant dense<0.000000e+00> : vector<8x8xf32>
    %483 = tpu.matmul %479, %482, %cst_171 {dimension_numbers = #tpu.dot_dimension_numbers<[1], [0], [0], [1], [0, 0, 1, 1], [], []>} : vector<8x16xf32>, vector<16x8xf32>, vector<8x8xf32> -> vector<8x8xf32>
    %cst_172 = arith.constant 2.500000e-01 : f32
    %484 = vector.broadcast %cst_172 : f32 to vector<8x8xf32>
    %485 = arith.mulf %483, %484 : vector<8x8xf32>
    %486 = vector.broadcast %429 : vector<1x8xf32> to vector<8x8xf32>
    %487 = arith.addf %485, %486 : vector<8x8xf32>
    %cst_173 = arith.constant dense<0xFF800000> : vector<8xf32>
    %488 = vector.multi_reduction <maximumf>, %487, %cst_173 [1] : vector<8x8xf32> to vector<8xf32>
    %489 = vector.shape_cast %488 : vector<8xf32> to vector<8x1xf32>
    %490 = vector.broadcast %489 : vector<8x1xf32> to vector<8x8xf32>
    %491 = arith.subf %487, %490 : vector<8x8xf32>
    %492 = math.exp %491 : vector<8x8xf32>
    %cst_174 = arith.constant dense<0.000000e+00> : vector<8xf32>
    %493 = vector.multi_reduction <add>, %492, %cst_174 [1] : vector<8x8xf32> to vector<8xf32>
    %494 = vector.shape_cast %493 : vector<8xf32> to vector<8x1xf32>
    %495 = tpu.reciprocal %494 {approx = true} : vector<8x1xf32> -> vector<8x1xf32>
    %496 = vector.broadcast %495 : vector<8x1xf32> to vector<8x8xf32>
    %497 = arith.mulf %492, %496 : vector<8x8xf32>
    %cst_175 = arith.constant dense<0.000000e+00> : vector<8x16xf32>
    %498 = tpu.matmul %497, %481, %cst_175 {dimension_numbers = #tpu.dot_dimension_numbers<[1], [0], [0], [1], [0, 0, 1, 1], [], []>} : vector<8x8xf32>, vector<8x16xf32>, vector<8x16xf32> -> vector<8x16xf32>
    %499 = arith.truncf %498 : vector<8x16xf32> to vector<8x16xbf16>
    %500 = vector.extract_strided_slice %326 {offsets = [32, 0], sizes = [16, 64], strides = [1, 1]} : vector<64x64xbf16> to vector<16x64xbf16>
    %cst_176 = arith.constant dense<0.000000e+00> : vector<8x64xf32>
    %501 = tpu.matmul %499, %500, %cst_176 {dimension_numbers = #tpu.dot_dimension_numbers<[1], [0], [0], [1], [0, 0, 1, 1], [], []>} : vector<8x16xbf16>, vector<16x64xbf16>, vector<8x64xf32> -> vector<8x64xf32>
    %502 = arith.addf %478, %501 : vector<8x64xf32>
    %503 = vector.extract_strided_slice %427 {offsets = [0, 48], sizes = [8, 16], strides = [1, 1]} : vector<8x192xf32> to vector<8x16xf32>
    %504 = vector.extract_strided_slice %427 {offsets = [0, 112], sizes = [8, 16], strides = [1, 1]} : vector<8x192xf32> to vector<8x16xf32>
    %505 = vector.extract_strided_slice %427 {offsets = [0, 176], sizes = [8, 16], strides = [1, 1]} : vector<8x192xf32> to vector<8x16xf32>
    %506 = tpu.transpose %504, [1, 0] : vector<8x16xf32> -> vector<16x8xf32>
    %cst_177 = arith.constant dense<0.000000e+00> : vector<8x8xf32>
    %507 = tpu.matmul %503, %506, %cst_177 {dimension_numbers = #tpu.dot_dimension_numbers<[1], [0], [0], [1], [0, 0, 1, 1], [], []>} : vector<8x16xf32>, vector<16x8xf32>, vector<8x8xf32> -> vector<8x8xf32>
    %cst_178 = arith.constant 2.500000e-01 : f32
    %508 = vector.broadcast %cst_178 : f32 to vector<8x8xf32>
    %509 = arith.mulf %507, %508 : vector<8x8xf32>
    %510 = vector.broadcast %429 : vector<1x8xf32> to vector<8x8xf32>
    %511 = arith.addf %509, %510 : vector<8x8xf32>
    %cst_179 = arith.constant dense<0xFF800000> : vector<8xf32>
    %512 = vector.multi_reduction <maximumf>, %511, %cst_179 [1] : vector<8x8xf32> to vector<8xf32>
    %513 = vector.shape_cast %512 : vector<8xf32> to vector<8x1xf32>
    %514 = vector.broadcast %513 : vector<8x1xf32> to vector<8x8xf32>
    %515 = arith.subf %511, %514 : vector<8x8xf32>
    %516 = math.exp %515 : vector<8x8xf32>
    %cst_180 = arith.constant dense<0.000000e+00> : vector<8xf32>
    %517 = vector.multi_reduction <add>, %516, %cst_180 [1] : vector<8x8xf32> to vector<8xf32>
    %518 = vector.shape_cast %517 : vector<8xf32> to vector<8x1xf32>
    %519 = tpu.reciprocal %518 {approx = true} : vector<8x1xf32> -> vector<8x1xf32>
    %520 = vector.broadcast %519 : vector<8x1xf32> to vector<8x8xf32>
    %521 = arith.mulf %516, %520 : vector<8x8xf32>
    %cst_181 = arith.constant dense<0.000000e+00> : vector<8x16xf32>
    %522 = tpu.matmul %521, %505, %cst_181 {dimension_numbers = #tpu.dot_dimension_numbers<[1], [0], [0], [1], [0, 0, 1, 1], [], []>} : vector<8x8xf32>, vector<8x16xf32>, vector<8x16xf32> -> vector<8x16xf32>
    %523 = arith.truncf %522 : vector<8x16xf32> to vector<8x16xbf16>
    %524 = vector.extract_strided_slice %326 {offsets = [48, 0], sizes = [16, 64], strides = [1, 1]} : vector<64x64xbf16> to vector<16x64xbf16>
    %cst_182 = arith.constant dense<0.000000e+00> : vector<8x64xf32>
    %525 = tpu.matmul %523, %524, %cst_182 {dimension_numbers = #tpu.dot_dimension_numbers<[1], [0], [0], [1], [0, 0, 1, 1], [], []>} : vector<8x16xbf16>, vector<16x64xbf16>, vector<8x64xf32> -> vector<8x64xf32>
    %526 = arith.addf %502, %525 : vector<8x64xf32>
    %527 = tpu.concatenate %426, %526 in 0 : vector<8x64xf32>, vector<8x64xf32> -> vector<16x64xf32>
    %c1_183 = arith.constant 1 : index
    %c0_184 = arith.constant 0 : index
    %c0_185 = arith.constant 0 : index
    %528 = vector.load %arg7[%c1_183, %c0_184, %c0_185] : memref<2x1x64xf32, #tpu.memory_space<vmem>>, vector<1x1x64xf32>
    %529 = vector.shape_cast %528 : vector<1x1x64xf32> to vector<1x64xf32>
    %530 = vector.broadcast %529 : vector<1x64xf32> to vector<16x64xf32>
    %531 = arith.addf %527, %530 : vector<16x64xf32>
    %532 = arith.addf %531, %316 : vector<16x64xf32>
    %c1_186 = arith.constant 1 : index
    %c0_187 = arith.constant 0 : index
    %c0_188 = arith.constant 0 : index
    %533 = vector.load %arg8[%c1_186, %c0_187, %c0_188] : memref<2x1x64xf32, #tpu.memory_space<vmem>>, vector<1x1x64xf32>
    %534 = vector.shape_cast %533 : vector<1x1x64xf32> to vector<1x64xf32>
    %c1_189 = arith.constant 1 : index
    %c0_190 = arith.constant 0 : index
    %c0_191 = arith.constant 0 : index
    %535 = vector.load %arg9[%c1_189, %c0_190, %c0_191] : memref<2x1x64xf32, #tpu.memory_space<vmem>>, vector<1x1x64xf32>
    %536 = vector.shape_cast %535 : vector<1x1x64xf32> to vector<1x64xf32>
    %cst_192 = arith.constant dense<0.000000e+00> : vector<16xf32>
    %537 = vector.multi_reduction <add>, %532, %cst_192 [1] : vector<16x64xf32> to vector<16xf32>
    %538 = vector.shape_cast %537 : vector<16xf32> to vector<16x1xf32>
    %cst_193 = arith.constant 6.400000e+01 : f32
    %539 = vector.broadcast %cst_193 : f32 to vector<16x1xf32>
    %540 = arith.divf %538, %539 : vector<16x1xf32>
    %541 = vector.broadcast %540 : vector<16x1xf32> to vector<16x64xf32>
    %542 = arith.subf %532, %541 : vector<16x64xf32>
    %543 = arith.mulf %542, %542 : vector<16x64xf32>
    %cst_194 = arith.constant dense<0.000000e+00> : vector<16xf32>
    %544 = vector.multi_reduction <add>, %543, %cst_194 [1] : vector<16x64xf32> to vector<16xf32>
    %545 = vector.shape_cast %544 : vector<16xf32> to vector<16x1xf32>
    %cst_195 = arith.constant 6.400000e+01 : f32
    %546 = vector.broadcast %cst_195 : f32 to vector<16x1xf32>
    %547 = arith.divf %545, %546 : vector<16x1xf32>
    %cst_196 = arith.constant 9.99999974E-6 : f32
    %548 = vector.broadcast %cst_196 : f32 to vector<16x1xf32>
    %549 = arith.addf %547, %548 : vector<16x1xf32>
    %550 = math.rsqrt %549 : vector<16x1xf32>
    %551 = vector.broadcast %550 : vector<16x1xf32> to vector<16x64xf32>
    %552 = arith.mulf %542, %551 : vector<16x64xf32>
    %553 = vector.broadcast %534 : vector<1x64xf32> to vector<16x64xf32>
    %554 = arith.mulf %552, %553 : vector<16x64xf32>
    %555 = vector.broadcast %536 : vector<1x64xf32> to vector<16x64xf32>
    %556 = arith.addf %554, %555 : vector<16x64xf32>
    %557 = arith.truncf %556 : vector<16x64xf32> to vector<16x64xbf16>
    %c1_197 = arith.constant 1 : index
    %c0_198 = arith.constant 0 : index
    %c0_199 = arith.constant 0 : index
    %558 = vector.load %arg10[%c1_197, %c0_198, %c0_199] : memref<2x64x128xbf16, #tpu.memory_space<vmem>>, vector<1x64x128xbf16>
    %559 = vector.shape_cast %558 : vector<1x64x128xbf16> to vector<64x128xbf16>
    %cst_200 = arith.constant dense<0.000000e+00> : vector<16x128xf32>
    %560 = tpu.matmul %557, %559, %cst_200 {dimension_numbers = #tpu.dot_dimension_numbers<[1], [0], [0], [1], [0, 0, 1, 1], [], []>} : vector<16x64xbf16>, vector<64x128xbf16>, vector<16x128xf32> -> vector<16x128xf32>
    %c1_201 = arith.constant 1 : index
    %c0_202 = arith.constant 0 : index
    %c0_203 = arith.constant 0 : index
    %561 = vector.load %arg11[%c1_201, %c0_202, %c0_203] : memref<2x1x128xf32, #tpu.memory_space<vmem>>, vector<1x1x128xf32>
    %562 = vector.shape_cast %561 : vector<1x1x128xf32> to vector<1x128xf32>
    %563 = vector.broadcast %562 : vector<1x128xf32> to vector<16x128xf32>
    %564 = arith.addf %560, %563 : vector<16x128xf32>
    %cst_204 = arith.constant 5.000000e-01 : f32
    %565 = vector.broadcast %cst_204 : f32 to vector<16x128xf32>
    %566 = arith.mulf %565, %564 : vector<16x128xf32>
    %cst_205 = arith.constant 4.471500e-02 : f32
    %567 = vector.broadcast %cst_205 : f32 to vector<16x128xf32>
    %568 = arith.mulf %567, %564 : vector<16x128xf32>
    %569 = arith.mulf %568, %564 : vector<16x128xf32>
    %570 = arith.mulf %569, %564 : vector<16x128xf32>
    %571 = arith.addf %564, %570 : vector<16x128xf32>
    %cst_206 = arith.constant 0.797884583 : f32
    %572 = vector.broadcast %cst_206 : f32 to vector<16x128xf32>
    %573 = arith.mulf %572, %571 : vector<16x128xf32>
    %574 = math.tanh %573 : vector<16x128xf32>
    %cst_207 = arith.constant 1.000000e+00 : f32
    %575 = vector.broadcast %cst_207 : f32 to vector<16x128xf32>
    %576 = arith.addf %575, %574 : vector<16x128xf32>
    %577 = arith.mulf %566, %576 : vector<16x128xf32>
    %578 = arith.truncf %577 : vector<16x128xf32> to vector<16x128xbf16>
    %c1_208 = arith.constant 1 : index
    %c0_209 = arith.constant 0 : index
    %c0_210 = arith.constant 0 : index
    %579 = vector.load %arg12[%c1_208, %c0_209, %c0_210] : memref<2x128x64xbf16, #tpu.memory_space<vmem>>, vector<1x128x64xbf16>
    %580 = vector.shape_cast %579 : vector<1x128x64xbf16> to vector<128x64xbf16>
    %cst_211 = arith.constant dense<0.000000e+00> : vector<16x64xf32>
    %581 = tpu.matmul %578, %580, %cst_211 {dimension_numbers = #tpu.dot_dimension_numbers<[1], [0], [0], [1], [0, 0, 1, 1], [], []>} : vector<16x128xbf16>, vector<128x64xbf16>, vector<16x64xf32> -> vector<16x64xf32>
    %c1_212 = arith.constant 1 : index
    %c0_213 = arith.constant 0 : index
    %c0_214 = arith.constant 0 : index
    %582 = vector.load %arg13[%c1_212, %c0_213, %c0_214] : memref<2x1x64xf32, #tpu.memory_space<vmem>>, vector<1x1x64xf32>
    %583 = vector.shape_cast %582 : vector<1x1x64xf32> to vector<1x64xf32>
    %584 = vector.broadcast %583 : vector<1x64xf32> to vector<16x64xf32>
    %585 = arith.addf %581, %584 : vector<16x64xf32>
    %586 = arith.addf %585, %556 : vector<16x64xf32>
    %587 = tpu.iota {dimensions = array<i32: 0>} : vector<2x16xi32>
    %588 = tpu.iota {dimensions = array<i32: 1>} : vector<2x16xi32>
    %c8_i32 = arith.constant 8 : i32
    %589 = vector.broadcast %c8_i32 : i32 to vector<2x16xi32>
    %590 = arith.muli %587, %589 : vector<2x16xi32>
    %591 = arith.cmpi eq, %588, %590 : vector<2x16xi32>
    %592 = arith.extui %591 : vector<2x16xi1> to vector<2x16xi32>
    %593 = arith.sitofp %592 : vector<2x16xi32> to vector<2x16xf32>
    %cst_215 = arith.constant dense<0.000000e+00> : vector<2x64xf32>
    %594 = tpu.matmul %593, %586, %cst_215 {dimension_numbers = #tpu.dot_dimension_numbers<[1], [0], [0], [1], [0, 0, 1, 1], [], []>} : vector<2x16xf32>, vector<16x64xf32>, vector<2x64xf32> -> vector<2x64xf32>
    %c1_216 = arith.constant 1 : index
    %c0_217 = arith.constant 0 : index
    %c0_218 = arith.constant 0 : index
    %595 = vector.load %arg14[%c1_216, %c0_217, %c0_218] : memref<2x1x64xf32, #tpu.memory_space<vmem>>, vector<1x1x64xf32>
    %596 = vector.shape_cast %595 : vector<1x1x64xf32> to vector<1x64xf32>
    %c1_219 = arith.constant 1 : index
    %c0_220 = arith.constant 0 : index
    %c0_221 = arith.constant 0 : index
    %597 = vector.load %arg15[%c1_219, %c0_220, %c0_221] : memref<2x1x64xf32, #tpu.memory_space<vmem>>, vector<1x1x64xf32>
    %598 = vector.shape_cast %597 : vector<1x1x64xf32> to vector<1x64xf32>
    %cst_222 = arith.constant dense<0.000000e+00> : vector<2xf32>
    %599 = vector.multi_reduction <add>, %594, %cst_222 [1] : vector<2x64xf32> to vector<2xf32>
    %600 = vector.shape_cast %599 : vector<2xf32> to vector<2x1xf32>
    %cst_223 = arith.constant 6.400000e+01 : f32
    %601 = vector.broadcast %cst_223 : f32 to vector<2x1xf32>
    %602 = arith.divf %600, %601 : vector<2x1xf32>
    %603 = vector.broadcast %602 : vector<2x1xf32> to vector<2x64xf32>
    %604 = arith.subf %594, %603 : vector<2x64xf32>
    %605 = arith.mulf %604, %604 : vector<2x64xf32>
    %cst_224 = arith.constant dense<0.000000e+00> : vector<2xf32>
    %606 = vector.multi_reduction <add>, %605, %cst_224 [1] : vector<2x64xf32> to vector<2xf32>
    %607 = vector.shape_cast %606 : vector<2xf32> to vector<2x1xf32>
    %cst_225 = arith.constant 6.400000e+01 : f32
    %608 = vector.broadcast %cst_225 : f32 to vector<2x1xf32>
    %609 = arith.divf %607, %608 : vector<2x1xf32>
    %cst_226 = arith.constant 9.99999974E-6 : f32
    %610 = vector.broadcast %cst_226 : f32 to vector<2x1xf32>
    %611 = arith.addf %609, %610 : vector<2x1xf32>
    %612 = math.rsqrt %611 : vector<2x1xf32>
    %613 = vector.broadcast %612 : vector<2x1xf32> to vector<2x64xf32>
    %614 = arith.mulf %604, %613 : vector<2x64xf32>
    %615 = vector.broadcast %596 : vector<1x64xf32> to vector<2x64xf32>
    %616 = arith.mulf %614, %615 : vector<2x64xf32>
    %617 = vector.broadcast %598 : vector<1x64xf32> to vector<2x64xf32>
    %618 = arith.addf %616, %617 : vector<2x64xf32>
    %c0_227 = arith.constant 0 : index
    %c0_228 = arith.constant 0 : index
    %619 = vector.load %arg16[%c0_227, %c0_228] : memref<2x64xf32, #tpu.memory_space<vmem>>, vector<2x64xf32>
    tpu.vector_store %arg16[%c0_227, %c0_228], %618 {strides = array<i32>} : memref<2x64xf32, #tpu.memory_space<vmem>>, vector<2x64xf32>,
    return
  }
}

</mosaic_0001>

<bundles_post_ra>
// kernel: roberta_encoder_forward.1
= control target key start
LH: loop header
LB: loop body
LE: loop exit
PB: predicated region body
PF: predicated region fallthrough
CT: control target
= control target key end

     0   :  { %s6177_s0 = inlined_call_operand.vmem [shape: f32[16,64], index: 0, kind: input, shape index: {}]   ;;  %s6178_s1 = inlined_call_operand.vmem [shape: f32[2,1,8], index: 1, kind: input, shape index: {}]   ;;  %s6179_s2 = inlined_call_operand.vmem [shape: f32[1,64], index: 2, kind: input, shape index: {}]   ;;  %s6180_s3 = inlined_call_operand.vmem [shape: f32[1,64], index: 3, kind: input, shape index: {}]   ;;  %s6181_s4 = inlined_call_operand.vmem [shape: bf16[2,64,192], index: 4, kind: input, shape index: {}]   ;;  %s6182_s5 = inlined_call_operand.vmem [shape: f32[2,1,192], index: 5, kind: input, shape index: {}]   ;;  %s6183_s6 = inlined_call_operand.vmem [shape: bf16[2,64,64], index: 6, kind: input, shape index: {}]   ;;  %s6184_s7 = inlined_call_operand.vmem [shape: f32[2,1,64], index: 7, kind: input, shape index: {}]   ;;  %s6185_s8 = inlined_call_operand.vmem [shape: f32[2,1,64], index: 8, kind: input, shape index: {}]   ;;  %s6186_s9 = inlined_call_operand.vmem [shape: f32[2,1,64], index: 9, kind: input, shape index: {}]   ;;  %s6187_s10 = inlined_call_operand.vmem [shape: bf16[2,64,128], index: 10, kind: input, shape index: {}]   ;;  %s6188_s11 = inlined_call_operand.vmem [shape: f32[2,1,128], index: 11, kind: input, shape index: {}]   ;;  %s6189_s12 = inlined_call_operand.vmem [shape: bf16[2,128,64], index: 12, kind: input, shape index: {}]   ;;  %s6190_s13 = inlined_call_operand.vmem [shape: f32[2,1,64], index: 13, kind: input, shape index: {}]   ;;  %s6191_s14 = inlined_call_operand.vmem [shape: f32[2,1,64], index: 14, kind: input, shape index: {}]   ;;  %s6192_s15 = inlined_call_operand.vmem [shape: f32[2,1,64], index: 15, kind: input, shape index: {}]   ;;  %s6193_s16 = inlined_call_operand.hbm [shape: f32[2,64], index: 16, kind: output, shape index: {}]  }
   0x1   :  { %6195 = sst [smem:[#allocation5_spill]] %s6177_s0 }
   0x2   :  { %s6196_s23 = sld [smem:[#allocation5_spill]]  ;;  %vm59_vm0 = vcmask 523264  }
   0x8   :  { %v55_v0 = vld [vmem:[%s6196_s23] sm:$0xff]  ;;  %v56_v1 = vld [vmem:[%s6196_s23 + $0x8] sm:$0xff] }
   0x9   :  { %v60_v2 = vsel %vm59_vm0, %v55_v0, 0.0  ;;  %v63_v3 = vsel %vm59_vm0, %v56_v1, 0.0 }
   0xa   :  { %61 = vadd.xlane.f32.xlu0 %v60_v2 }
   0xe   :  { %64 = vadd.xlane.f32.xlu0 %v63_v3 }
   0xf   :  { %21 = vsyncpa [#allocation3], 0  ;;  %v5146_v14 = vld [vmem:[%s6181_s4 + $0x34] ss:$8 sps:$4 sm:$0xff]   ;;  %v5148_v15 = vld [vmem:[%s6181_s4 + $0x30] ss:$8 sps:$4 sm:$0xff]   ;;  %v114_v41 = vlaneseq }
  0x10   :  { %v5149_v16 = vld [vmem:[%s6181_s4 + $0x24] ss:$8 sps:$4 sm:$0xff]   ;;  %175 = vmatprep.subr.bf16.mxu0 %v5146_v14  ;;  %v5151_v17 = vld [vmem:[%s6181_s4 + $0x20] ss:$8 sps:$4 sm:$0xff]   ;;  %v5316_v18 = vmov 0   ;;  %v5317_v40 = vmov 0.0  }
  0x11   :  { %176 = vmatpush1.bf16.msra.mxu0 %v5148_v15  ;;  %199 = vmatprep.mubr.bf16.mxu0 %v5316_v18  ;;  %v5152_v19 = vld [vmem:[%s6181_s4 + $0x14] ss:$8 sps:$4 sm:$0xff]   ;;  %v5154_v20 = vld [vmem:[%s6181_s4 + $0x10] ss:$8 sps:$4 sm:$0xff]   ;;  %v5155_v21 = vld [vmem:[%s6181_s4 + $0x4] ss:$8 sps:$4 sm:$0xff]  }
  0x12   :  { %177 = vmatprep.subr.bf16.mxu0 %v5149_v16  ;;  %v5157_v22 = vld [vmem:[%s6181_s4] ss:$8 sps:$4 sm:$0xff]   ;;  %4808 = vmatprep.subr.mxu1 %v5317_v40  ;;  %v5463_v42 = vshrl.u32 %v114_v41, 7  ;;  %vm5318_vm1 = vmmov 0   ;;  %s5319_s0 = smov 64   ;;  %s5320_s17 = smov 112  }
  0x13   :  { %v4496_v31 = vld [vmem:[%s6179_s2] ss:$0 sm:$0xff]  ;;  %4810 = vmatprep.mubr.msk.f32.mxu1 %vm5318_vm1, %v5317_v40  ;;  %vm222_vm2 = vcmask 130048   ;;  %vm305_vm3 = vcmask 64512   ;;  %s5321_s20 = smov 48   ;;  %s5322_s21 = smov 32  }
  0x14   :  { %v4497_v35 = vld [vmem:[%s6180_s3] ss:$0 sm:$0xff]  ;;  %v116_v43 = vsub.s32 0, %v5463_v42  ;;  %v120_v48 = vsub.s32 1, %v5463_v42  ;;  %s5323_s22 = smov 96   ;;  %s5324_s27 = smov 80  }
  0x15   :  { %178 = vmatpush1.bf16.msra.mxu0 %v5151_v17  ;;  %v112_v44 = vld [vmem:[%s6182_s5] sm:$0x3]  ;;  %s5325_s28 = smov 16   ;;  %vm4453_vm5 = vcmask 517120  }
  0x16   :  { %179 = vmatprep.subr.bf16.mxu0 %v5152_v19  ;;  %v5475_v45 = vrot.slane %v112_v44, %v116_v43  ;;  %v5487_v49 = vrot.slane %v112_v44, %v120_v48  ;;  %v5503_v54 = vld [vmem:[%s6178_s1] ss:$0 sm:$0xff] }
  0x19   :  { %180 = vmatpush1.bf16.msra.mxu0 %v5154_v20 }
  0x1a   :  { %181 = vmatprep.subr.bf16.mxu0 %v5155_v21 }
  0x1d   :  { %182 = vmatpush1.bf16.msra.mxu0 %v5157_v22  ;;  %v5534_v22 = vld [vmem:[%s6183_s6 + $0x8] sm:$0xff]  }
  0x1e   :  { %4845 = vmatprep.subr.mxu0 %v5317_v40 }
  0x93   :  { %v62_v4 = vpop.xlane.xlu0 %61 }
  0x94   :  { %v67_v5 = vmul.f32 0.015625, %v62_v4 }
  0x96   :  { %v69_v6 = vsub.f32 %v55_v0, %v67_v5 }
  0x97   :  { %v65_v7 = vpop.xlane.xlu0 %64 }
  0x98   :  { %v68_v8 = vmul.f32 0.015625, %v65_v7  ;;  %v71_v9 = vmul.f32 %v69_v6, %v69_v6 }
  0x9a   :  { %v70_v10 = vsub.f32 %v56_v1, %v68_v8  ;;  %v73_v11 = vsel %vm59_vm0, %v71_v9, 0.0 }
  0x9b   :  { %74 = vadd.xlane.f32.xlu1 %v73_v11 }
  0x9c   :  { %v72_v12 = vmul.f32 %v70_v10, %v70_v10 }
  0x9e   :  { %v76_v13 = vsel %vm59_vm0, %v72_v12, 0.0 }
  0x9f   :  { %77 = vadd.xlane.f32.xlu1 %v76_v13 }
 0x124   :  { %v75_v23 = vpop.xlane.xlu1 %74 }
 0x125   :  { %v79_v24 = vmul.f32 0.015625, %v75_v23 }
 0x127   :  { %v81_v25 = vadd.f32 1e-05, %v79_v24  ;;  %v5541_v24 = vld [vmem:[%s6183_s6] sm:$0xff]  }
 0x128   :  { %v78_v26 = vpop.xlane.xlu1 %77 }
 0x129   :  { %5202 = vrsqrt.f32 %v81_v25  ;;  %v80_v27 = vmul.f32 0.015625, %v78_v26 }
 0x12b   :  { %v82_v28 = vadd.f32 1e-05, %v80_v27 }
 0x12d   :  { %5204 = vrsqrt.f32 %v82_v28 }
 0x136   :  { %v5203_v29 = vpop.eup %5202 }
 0x137   :  { %v85_v30 = vmul.f32 %v5203_v29, %v69_v6 }
 0x139   :  { %v93_v34 = vmul.f32 %v4496_v31, %v85_v30 }
 0x13a   :  { %v5205_v32 = vpop.eup %5204 }
 0x13b   :  { %v86_v33 = vmul.f32 %v5205_v32, %v70_v10  ;;  %v5453_v37 = vadd.f32 %v4497_v35, %v93_v34 }
 0x13d   :  { %v94_v36 = vmul.f32 %v4496_v31, %v86_v33 }
 0x13f   :  { %v5455_v38 = vadd.f32 %v4497_v35, %v94_v36 }
 0x141   :  { %v103_v39 = vpack.c.bf16 %v5455_v38, %v5453_v37 }
 0x143   :  { %4506 = vmatmul.mubr.msk.bf16.vlgmr.msra.gmra.mxu0 %vm59_vm0, %v103_v39 }
 0x144   :  { %4847 = vmatprep.mubr.msk.f32.mxu0 %vm5318_vm1, %v5317_v40 }
 0x203   :  { %v201_v46 = vpop.f32.mrf.mxu0 }
 0x204   :  { %v5478_v47 = vadd.f32 %v201_v46, %v5475_v45 }
 0x205   :  { %v203_v50 = vpop.f32.mrf.mxu0 }
 0x206   :  { %220 = vrot.lane.b32.xlu0 %v5478_v47, %s5319_s0  ;;  %v5492_v52 = vadd.f32 %v203_v50, %v5487_v49 }
 0x20a   :  { %391 = vrot.lane.b32.xlu0 %v5478_v47, %s5320_s17 }
 0x278   :  { %v221_v51 = vpop.permute.xlu0 %220 }
 0x279   :  { %4809 = vmatpush3.xpose.msk.msra.mxu1 %vm222_vm2, %v221_v51 }
 0x27a   :  { %4813 = vmatprep.subr.mxu1 %v5317_v40 }
 0x27c   :  { %4811 = vmatmul.mubr.msk.f32.vlgmr.msra.gmra.mxu1 %vm222_vm2, %v5478_v47  ;;  %v392_v4 = vpop.permute.xlu0 %391 }
 0x27d   :  { %4814 = vmatpush3.msra.mxu1 %v5492_v52  ;;  %4815 = vmatprep.mubr.msk.f32.mxu1 %vm5318_vm1, %v5317_v40 }
 0x27e   :  { %4818 = vmatprep.subr.mxu1 %v5317_v40 }
 0x33c   :  { %v293_v53 = vpop.f32.mrf.mxu1 }
 0x33d   :  { %v297_v55 = vmul.f32 0.25, %v293_v53 }
 0x33e   :  { %v4812_v56 = vpop.f32.mrf.mxu1 }
 0x33f   :  { %v304_v57 = vadd.f32 %v5503_v54, %v297_v55 }
 0x341   :  { %v306_v58 = vsel %vm305_vm3, %v304_v57, -inf }
 0x342   :  { %307 = vmax.xlane.f32.xlu1 %v306_v58 }
 0x3cb   :  { %v308_v59 = vpop.xlane.xlu1 %307 }
 0x3cc   :  { %v309_v60 = vsub.f32 %v304_v57, %v308_v59 }
 0x3ce   :  { %v310_v61 = vmul.f32 1.442695, %v309_v60 }
 0x3d0   :  { %5206 = vpow2.f32 %v310_v61 }
 0x3dd   :  { %v5207_v62 = vpop.eup %5206 }
 0x3de   :  { %v312_v63 = vsel %vm305_vm3, %v5207_v62, 0.0 }
 0x3df   :  { %313 = vadd.xlane.f32.xlu1 %v312_v63 }
 0x3f0   :  { %393 = vrot.lane.b32.xlu1 %v5478_v47, %s5321_s20 }
 0x468   :  { %v314_v0 = vpop.xlane.xlu1 %313 }
 0x469   :  { %5208 = vrcp.f32 %v314_v0 }
 0x46c   :  { %v394_v3 = vpop.permute.xlu1 %393 }
 0x476   :  { %v5209_v1 = vpop.eup %5208 }
 0x477   :  { %v316_v2 = vmul.f32 %v5209_v1, %v5207_v62 }
 0x479   :  { %4816 = vmatmul.mubr.msk.f32.vlgmr.msra.gmra.mxu1 %vm305_vm3, %v316_v2 }
 0x47a   :  { %4819 = vmatpush3.xpose.msk.msra.mxu1 %vm222_vm2, %v394_v3  ;;  %4820 = vmatprep.mubr.msk.f32.mxu1 %vm5318_vm1, %v5317_v40  ;;  %v205_v3 = vpop.f32.mrf.mxu0 }
 0x47b   :  { %4823 = vmatprep.subr.mxu1 %v5317_v40 }
 0x47d   :  { %4821 = vmatmul.mubr.msk.f32.vlgmr.msra.gmra.mxu1 %vm222_vm2, %v392_v4  ;;  %v207_v4 = vpop.f32.mrf.mxu0 }
 0x47e   :  { %4825 = vmatprep.mubr.msk.f32.mxu1 %vm5318_vm1, %v5317_v40 }
 0x539   :  { %v386_v5 = vpop.f32.mrf.mxu1 }
 0x53a   :  { %v390_v27 = vpack.c.bf16 %v386_v5, %v386_v5 }
 0x53b   :  { %v4817_v6 = vpop.f32.mrf.mxu1 }
 0x53d   :  { %v465_v7 = vpop.f32.mrf.mxu1 }
 0x53e   :  { %v469_v8 = vmul.f32 0.25, %v465_v7 }
 0x53f   :  { %v4822_v9 = vpop.f32.mrf.mxu1 }
 0x540   :  { %v470_v10 = vadd.f32 %v5503_v54, %v469_v8 }
 0x542   :  { %v471_v11 = vsel %vm305_vm3, %v470_v10, -inf }
 0x543   :  { %472 = vmax.xlane.f32.xlu1 %v471_v11 }
 0x554   :  { %660 = vrot.lane.b32.xlu1 %v5478_v47, %s5322_s21 }
 0x558   :  { %658 = vrot.lane.b32.xlu1 %v5478_v47, %s5323_s22 }
 0x5cc   :  { %v473_v12 = vpop.xlane.xlu1 %472 }
 0x5cd   :  { %v474_v13 = vsub.f32 %v470_v10, %v473_v12 }
 0x5cf   :  { %v475_v14 = vmul.f32 1.442695, %v474_v13  ;;  %v5589_v13 = vadd.f32 %v205_v3, %v5475_v45 }
 0x5d0   :  { %v661_v28 = vpop.permute.xlu1 %660 }
 0x5d1   :  { %5210 = vpow2.f32 %v475_v14 }
 0x5d4   :  { %v659_v29 = vpop.permute.xlu1 %658 }
 0x5de   :  { %v5211_v15 = vpop.eup %5210 }
 0x5df   :  { %v477_v16 = vsel %vm305_vm3, %v5211_v15, 0.0 }
 0x5e0   :  { %478 = vadd.xlane.f32.xlu0 %v477_v16 }
 0x5f6   :  { %483 = vrot.lane.b32.xlu0 %v5492_v52, %s5320_s17 }
 0x669   :  { %v479_v17 = vpop.xlane.xlu0 %478 }
 0x66a   :  { %5212 = vrcp.f32 %v479_v17 }
 0x66d   :  { %v484_v19 = vpop.permute.xlu0 %483 }
 0x66e   :  { %4824 = vmatpush3.msra.mxu1 %v484_v19 }
 0x66f   :  { %4828 = vmatprep.subr.bf16.mxu1 %v5317_v40 }
 0x677   :  { %v5213_v20 = vpop.eup %5212 }
 0x678   :  { %v481_v21 = vmul.f32 %v5213_v20, %v5211_v15 }
 0x67a   :  { %4826 = vmatmul.mubr.msk.f32.vlgmr.msra.gmra.mxu1 %vm305_vm3, %v481_v21  ;;  %v5604_v21 = vld [vmem:[%s6183_s6 + $0x18] sm:$0xff]  }
 0x67b   :  { %4830 = vmatprep.mubr.msk.bf16.mxu1 %vm5318_vm1, %v5317_v40  ;;  %4829 = vmatpush3.bf16.msra.mxu1 %v5534_v22 }
 0x67c   :  { %4834 = vmatprep.subr.bf16.mxu1 %v5317_v40 }
 0x73a   :  { %v555_v23 = vpop.f32.mrf.mxu1 }
 0x73b   :  { %v559_v25 = vpack.c.bf16 %v555_v23, %v555_v23 }
 0x73c   :  { %v4827_v26 = vpop.f32.mrf.mxu1 }
 0x73d   :  { %4831 = vmatmul.mubr.msk.bf16.vlgmr.msra.gmra.mxu1 %vm222_vm2, %v559_v25 }
 0x73e   :  { %4835 = vmatpush3.bf16.msra.mxu1 %v5541_v24  ;;  %4836 = vmatprep.mubr.msk.bf16.mxu1 %vm5318_vm1, %v5317_v40 }
 0x73f   :  { %4840 = vmatprep.subr.mxu1 %v5317_v40 }
 0x745   :  { %4837 = vmatmul.mubr.msk.bf16.vlgmr.msra.gmra.mxu1 %vm222_vm2, %v390_v27 }
 0x746   :  { %4841 = vmatpush3.xpose.msk.msra.mxu1 %vm222_vm2, %v661_v28  ;;  %4842 = vmatprep.mubr.msk.f32.mxu1 %vm5318_vm1, %v5317_v40 }
 0x747   :  { %4850 = vmatprep.subr.bf16.mxu1 %v5317_v40 }
 0x74d   :  { %4843 = vmatmul.mubr.msk.f32.vlgmr.msra.gmra.mxu1 %vm222_vm2, %v659_v29 }
 0x74e   :  { %4852 = vmatprep.mubr.msk.bf16.mxu1 %vm5318_vm1, %v5317_v40 }
 0x7fd   :  { %v603_v30 = vpop.f32.mrf.mxu1 }
 0x7ff   :  { %v4832_v31 = vpop.f32.mrf.mxu1 }
 0x801   :  { %v606_v32 = vpop.f32.mrf.mxu1 }
 0x803   :  { %v4833_v33 = vpop.f32.mrf.mxu1 }
 0x805   :  { %v652_v34 = vpop.f32.mrf.mxu1 }
 0x806   :  { %v5556_v35 = vadd.f32 %v652_v34, %v603_v30  ;;  %v5615_v30 = vadd.f32 %v207_v4, %v5487_v49 }
 0x807   :  { %v4838_v36 = vpop.f32.mrf.mxu1 }
 0x809   :  { %v655_v39 = vpop.f32.mrf.mxu1 }
 0x80b   :  { %v4839_v44 = vpop.f32.mrf.mxu1 }
 0x80d   :  { %v732_v46 = vpop.f32.mrf.mxu1 }
 0x80e   :  { %v736_v50 = vmul.f32 0.25, %v732_v46 }
 0x80f   :  { %v4844_v51 = vpop.f32.mrf.mxu1 }
 0x810   :  { %v737_v53 = vadd.f32 %v5503_v54, %v736_v50 }
 0x812   :  { %v738_v55 = vsel %vm305_vm3, %v737_v53, -inf }
 0x813   :  { %739 = vmax.xlane.f32.xlu0 %v738_v55 }
 0x829   :  { %749 = vrot.lane.b32.xlu0 %v5492_v52, %s5323_s22 }
 0x82d   :  { %876 = vrot.lane.b32.xlu0 %v5478_v47, %s5324_s27 }
 0x89c   :  { %v740_v56 = vpop.xlane.xlu0 %739 }
 0x89d   :  { %v741_v57 = vsub.f32 %v737_v53, %v740_v56 }
 0x89f   :  { %v742_v58 = vmul.f32 1.442695, %v741_v57 }
 0x8a0   :  { %v750_v59 = vpop.permute.xlu0 %749 }
 0x8a1   :  { %5214 = vpow2.f32 %v742_v58  ;;  %4846 = vmatpush3.msra.mxu0 %v750_v59 }
 0x8a2   :  { %4856 = vmatprep.subr.mxu0 %v5317_v40 }
 0x8a4   :  { %v877_v2 = vpop.permute.xlu0 %876 }
 0x8ae   :  { %v5215_v60 = vpop.eup %5214 }
 0x8af   :  { %v744_v61 = vsel %vm305_vm3, %v5215_v60, 0.0 }
 0x8b0   :  { %745 = vadd.xlane.f32.xlu1 %v744_v61 }
 0x8c1   :  { %878 = vrot.lane.b32.xlu1 %v5478_v47, %s5325_s28  ;;  %v5579_v47 = vld [vmem:[%s6183_s6 + $0x10] sm:$0xff]  }
 0x8c2   :  { %4851 = vmatpush3.bf16.msra.mxu1 %v5579_v47 }
 0x8c3   :  { %4866 = vmatprep.subr.bf16.mxu1 %v5317_v40 }
 0x939   :  { %v746_v62 = vpop.xlane.xlu1 %745 }
 0x93a   :  { %5216 = vrcp.f32 %v746_v62 }
 0x93d   :  { %v879_v1 = vpop.permute.xlu1 %878 }
 0x947   :  { %v5217_v63 = vpop.eup %5216 }
 0x948   :  { %v748_v0 = vmul.f32 %v5217_v63, %v5215_v60 }
 0x94a   :  { %4848 = vmatmul.mubr.msk.f32.vlgmr.msra.gmra.mxu0 %vm305_vm3, %v748_v0 }
 0x94b   :  { %4857 = vmatpush3.xpose.msk.msra.mxu0 %vm222_vm2, %v879_v1  ;;  %4858 = vmatprep.mubr.msk.f32.mxu0 %vm5318_vm1, %v5317_v40 }
 0x94c   :  { %4861 = vmatprep.subr.mxu0 %v5317_v40 }
 0x94e   :  { %4859 = vmatmul.mubr.msk.f32.vlgmr.msra.gmra.mxu0 %vm222_vm2, %v877_v2 }
 0x94f   :  { %4863 = vmatprep.mubr.msk.f32.mxu0 %vm5318_vm1, %v5317_v40 }
 0xa0a   :  { %v821_v5 = vpop.f32.mrf.mxu0 }
 0xa0b   :  { %v825_v6 = vpack.c.bf16 %v821_v5, %v821_v5 }
 0xa0c   :  { %v4849_v7 = vpop.f32.mrf.mxu0 }
 0xa0d   :  { %4853 = vmatmul.mubr.msk.bf16.vlgmr.msra.gmra.mxu1 %vm222_vm2, %v825_v6 }
 0xa0e   :  { %v950_v8 = vpop.f32.mrf.mxu0  ;;  %4868 = vmatprep.mubr.msk.bf16.mxu1 %vm5318_vm1, %v5317_v40  ;;  %4867 = vmatpush3.bf16.msra.mxu1 %v5604_v21 }
 0xa0f   :  { %v954_v9 = vmul.f32 0.25, %v950_v8  ;;  %4882 = vmatprep.subr.mxu1 %v5317_v40 }
 0xa10   :  { %v4860_v10 = vpop.f32.mrf.mxu0 }
 0xa11   :  { %v955_v11 = vadd.f32 %v5503_v54, %v954_v9 }
 0xa13   :  { %v956_v12 = vsel %vm305_vm3, %v955_v11, -inf }
 0xa14   :  { %957 = vmax.xlane.f32.xlu1 %v956_v12 }
 0xa25   :  { %1097 = vrot.lane.b32.xlu1 %v5589_v13, %s5319_s0 }
 0xa29   :  { %1268 = vrot.lane.b32.xlu1 %v5589_v13, %s5321_s20 }
 0xa9d   :  { %v958_v14 = vpop.xlane.xlu1 %957 }
 0xa9e   :  { %v959_v15 = vsub.f32 %v955_v11, %v958_v14 }
 0xaa0   :  { %v960_v16 = vmul.f32 1.442695, %v959_v15 }
 0xaa1   :  { %v1098_v29 = vpop.permute.xlu1 %1097 }
 0xaa2   :  { %5218 = vpow2.f32 %v960_v16 }
 0xaa5   :  { %v1269_v34 = vpop.permute.xlu1 %1268 }
 0xaaf   :  { %v5219_v17 = vpop.eup %5218 }
 0xab0   :  { %v962_v19 = vsel %vm305_vm3, %v5219_v17, 0.0 }
 0xab1   :  { %963 = vadd.xlane.f32.xlu0 %v962_v19 }
 0xac7   :  { %967 = vrot.lane.b32.xlu0 %v5492_v52, %s5324_s27 }
 0xacb   :  { %1266 = vrot.lane.b32.xlu0 %v5589_v13, %s5320_s17 }
 0xacd   :  { %v869_v45 = vpop.f32.mrf.mxu1 }
 0xace   :  { %v875_v54 = vadd.f32 %v869_v45, %v5556_v35  ;;  %v5630_v35 = vld [vmem:[%s6178_s1 + $0x1] ss:$0 sm:$0xff] }
 0xacf   :  { %v4854_v20 = vpop.f32.mrf.mxu1 }
 0xad1   :  { %v872_v23 = vpop.f32.mrf.mxu1 }
 0xad3   :  { %v4855_v25 = vpop.f32.mrf.mxu1 }
 0xb3a   :  { %v964_v26 = vpop.xlane.xlu0 %963 }
 0xb3b   :  { %5220 = vrcp.f32 %v964_v26 }
 0xb3e   :  { %v968_v52 = vpop.permute.xlu0 %967 }
 0xb3f   :  { %4862 = vmatpush3.msra.mxu0 %v968_v52 }
 0xb40   :  { %4872 = vmatprep.subr.mxu0 %v5317_v40 }
 0xb42   :  { %v1267_v50 = vpop.permute.xlu0 %1266 }
 0xb48   :  { %v5221_v27 = vpop.eup %5220 }
 0xb49   :  { %v966_v28 = vmul.f32 %v5221_v27, %v5219_v17 }
 0xb4b   :  { %4864 = vmatmul.mubr.msk.f32.vlgmr.msra.gmra.mxu0 %vm305_vm3, %v966_v28 }
 0xb4c   :  { %4873 = vmatpush3.xpose.msk.msra.mxu0 %vm222_vm2, %v1098_v29  ;;  %4874 = vmatprep.mubr.msk.f32.mxu0 %vm5318_vm1, %v5317_v40 }
 0xb4d   :  { %4877 = vmatprep.subr.mxu0 %v5317_v40 }
 0xb4f   :  { %4875 = vmatmul.mubr.msk.f32.vlgmr.msra.gmra.mxu0 %vm222_vm2, %v5589_v13 }
 0xb50   :  { %4878 = vmatpush3.msra.mxu0 %v5615_v30  ;;  %4879 = vmatprep.mubr.msk.f32.mxu0 %vm5318_vm1, %v5317_v40 }
 0xb51   :  { %4887 = vmatprep.subr.mxu0 %v5317_v40 }
 0xc0b   :  { %v1039_v31 = vpop.f32.mrf.mxu0 }
 0xc0c   :  { %v1043_v32 = vpack.c.bf16 %v1039_v31, %v1039_v31 }
 0xc0d   :  { %v4865_v33 = vpop.f32.mrf.mxu0 }
 0xc0e   :  { %4869 = vmatmul.mubr.msk.bf16.vlgmr.msra.gmra.mxu1 %vm222_vm2, %v1043_v32 }
 0xc0f   :  { %4883 = vmatpush3.xpose.msk.msra.mxu1 %vm222_vm2, %v1269_v34  ;;  %v1169_v49 = vpop.f32.mrf.mxu0  ;;  %4884 = vmatprep.mubr.msk.f32.mxu1 %vm5318_vm1, %v5317_v40 }
 0xc10   :  { %v1173_v36 = vmul.f32 0.25, %v1169_v49  ;;  %4892 = vmatprep.subr.bf16.mxu1 %v5317_v40 }
 0xc11   :  { %v4876_v39 = vpop.f32.mrf.mxu0 }
 0xc12   :  { %v1180_v44 = vadd.f32 %v5630_v35, %v1173_v36 }
 0xc14   :  { %v1181_v46 = vsel %vm305_vm3, %v1180_v44, -inf }
 0xc15   :  { %1182 = vmax.xlane.f32.xlu1 %v1181_v46 }
 0xc16   :  { %4885 = vmatmul.mubr.msk.f32.vlgmr.msra.gmra.mxu1 %vm222_vm2, %v1267_v50 }
 0xc17   :  { %4893 = vmatpush3.bf16.msra.mxu1 %v5534_v22  ;;  %4894 = vmatprep.mubr.msk.bf16.mxu1 %vm5318_vm1, %v5317_v40 }
 0xc18   :  { %4904 = vmatprep.subr.mxu1 %v5317_v40 }
 0xc26   :  { %1358 = vrot.lane.b32.xlu1 %v5615_v30, %s5320_s17 }
 0xc2a   :  { %1521 = vrot.lane.b32.xlu1 %v5589_v13, %s5323_s22 }
 0xc9e   :  { %v1183_v51 = vpop.xlane.xlu1 %1182 }
 0xc9f   :  { %v1184_v53 = vsub.f32 %v1180_v44, %v1183_v51 }
 0xca1   :  { %v1185_v55 = vmul.f32 1.442695, %v1184_v53 }
 0xca2   :  { %v1359_v11 = vpop.permute.xlu1 %1358 }
 0xca3   :  { %5222 = vpow2.f32 %v1185_v55 }
 0xcb0   :  { %v5223_v1 = vpop.eup %5222 }
 0xcb1   :  { %v1187_v2 = vsel %vm305_vm3, %v5223_v1, 0.0 }
 0xcce   :  { %v1087_v56 = vpop.f32.mrf.mxu1 }
 0xccf   :  { %v5644_v57 = vadd.f32 %v1087_v56, %v875_v54 }
 0xcd0   :  { %v4870_v58 = vpop.f32.mrf.mxu1 }
 0xcd2   :  { %v1090_v22 = vpop.f32.mrf.mxu1 }
 0xcd4   :  { %v4871_v59 = vpop.f32.mrf.mxu1 }
 0xcd6   :  { %v1340_v60 = vpop.f32.mrf.mxu1 }
 0xcd7   :  { %v1344_v61 = vmul.f32 0.25, %v1340_v60 }
 0xcd8   :  { %v4886_v62 = vpop.f32.mrf.mxu1 }
 0xcd9   :  { %v1345_v63 = vadd.f32 %v5630_v35, %v1344_v61  ;;  %v4546_v61 = vld [vmem:[%s6184_s7] ss:$0 sm:$0xff] }
 0xcdb   :  { %v1346_v0 = vsel %vm305_vm3, %v1345_v63, -inf }
 0xcdc   :  { %1347 = vmax.xlane.f32.xlu0 %v1346_v0  ;;  %v1952_v0 = vadd.f32 %v4546_v61, %v5644_v57 }
 0xce0   :  { %1188 = vadd.xlane.f32.xlu0 %v1187_v2 }
 0xd65   :  { %v1348_v3 = vpop.xlane.xlu0 %1347 }
 0xd66   :  { %v1349_v4 = vsub.f32 %v1345_v63, %v1348_v3 }
 0xd68   :  { %v1350_v5 = vmul.f32 1.442695, %v1349_v4 }
 0xd69   :  { %v1189_v6 = vpop.xlane.xlu0 %1188 }
 0xd6a   :  { %5224 = vpow2.f32 %v1350_v5  ;;  %v1954_v5 = vadd.f32 %v1952_v0, %v5453_v37 }
 0xd6b   :  { %5226 = vrcp.f32 %v1189_v6 }
 0xd6c   :  { %v1958_v6 = vsel %vm59_vm0, %v1954_v5, 0.0 }
 0xd77   :  { %v5225_v7 = vpop.eup %5224 }
 0xd78   :  { %v5227_v8 = vpop.eup %5226  ;;  %v1352_v9 = vsel %vm305_vm3, %v5225_v7, 0.0 }
 0xd79   :  { %1353 = vadd.xlane.f32.xlu0 %v1352_v9  ;;  %v1191_v10 = vmul.f32 %v5227_v8, %v5223_v1 }
 0xd7b   :  { %4880 = vmatmul.mubr.msk.f32.vlgmr.msra.gmra.mxu0 %vm305_vm3, %v1191_v10 }
 0xd7c   :  { %4888 = vmatpush3.msra.mxu0 %v1359_v11  ;;  %4889 = vmatprep.mubr.msk.f32.mxu0 %vm5318_vm1, %v5317_v40 }
 0xd7d   :  { %4898 = vmatprep.subr.bf16.mxu0 %v5317_v40 }
 0xd8f   :  { %1523 = vrot.lane.b32.xlu0 %v5589_v13, %s5322_s21 }
 0xe02   :  { %v1354_v12 = vpop.xlane.xlu0 %1353 }
 0xe03   :  { %5228 = vrcp.f32 %v1354_v12 }
 0xe06   :  { %v1524_v23 = vpop.permute.xlu0 %1523 }
 0xe10   :  { %v5229_v14 = vpop.eup %5228 }
 0xe11   :  { %v1356_v15 = vmul.f32 %v5229_v14, %v5225_v7 }
 0xe13   :  { %4890 = vmatmul.mubr.msk.f32.vlgmr.msra.gmra.mxu0 %vm305_vm3, %v1356_v15 }
 0xe14   :  { %4899 = vmatpush3.bf16.msra.mxu0 %v5541_v24  ;;  %4900 = vmatprep.mubr.msk.bf16.mxu0 %vm5318_vm1, %v5317_v40  ;;  %v1522_v24 = vpop.permute.xlu1 %1521 }
 0xe15   :  { %4909 = vmatprep.subr.mxu0 %v5317_v40 }
 0xe3b   :  { %v1261_v16 = vpop.f32.mrf.mxu0 }
 0xe3c   :  { %v1265_v17 = vpack.c.bf16 %v1261_v16, %v1261_v16 }
 0xe3d   :  { %v4881_v19 = vpop.f32.mrf.mxu0 }
 0xe3e   :  { %4901 = vmatmul.mubr.msk.bf16.vlgmr.msra.gmra.mxu0 %vm222_vm2, %v1265_v17 }
 0xe3f   :  { %4911 = vmatprep.mubr.msk.f32.mxu0 %vm5318_vm1, %v5317_v40 }
 0xed3   :  { %v1430_v45 = vpop.f32.mrf.mxu0 }
 0xed4   :  { %v1434_v54 = vpack.c.bf16 %v1430_v45, %v1430_v45 }
 0xed5   :  { %v4891_v20 = vpop.f32.mrf.mxu0 }
 0xed6   :  { %4895 = vmatmul.mubr.msk.bf16.vlgmr.msra.gmra.mxu1 %vm222_vm2, %v1434_v54 }
 0xed7   :  { %4905 = vmatpush3.xpose.msk.msra.mxu1 %vm222_vm2, %v1524_v23  ;;  %4906 = vmatprep.mubr.msk.f32.mxu1 %vm5318_vm1, %v5317_v40 }
 0xed8   :  { %4914 = vmatprep.subr.bf16.mxu1 %v5317_v40 }
 0xede   :  { %4907 = vmatmul.mubr.msk.f32.vlgmr.msra.gmra.mxu1 %vm222_vm2, %v1522_v24 }
 0xedf   :  { %4915 = vmatpush3.bf16.msra.mxu1 %v5579_v47  ;;  %4916 = vmatprep.mubr.msk.bf16.mxu1 %vm5318_vm1, %v5317_v40 }
 0xee0   :  { %4930 = vmatprep.subr.bf16.mxu1 %v5317_v40 }
 0xefe   :  { %v5674_v25 = vpop.f32.mrf.mxu0 }
 0xf00   :  { %v4902_v26 = vpop.f32.mrf.mxu0 }
 0xf02   :  { %v1518_v52 = vpop.f32.mrf.mxu0 }
 0xf04   :  { %v4903_v27 = vpop.f32.mrf.mxu0 }
 0xf96   :  { %v1472_v28 = vpop.f32.mrf.mxu1 }
 0xf98   :  { %v4896_v29 = vpop.f32.mrf.mxu1 }
 0xf9a   :  { %v1475_v31 = vpop.f32.mrf.mxu1 }
 0xf9c   :  { %v4897_v32 = vpop.f32.mrf.mxu1 }
 0xf9e   :  { %v1595_v33 = vpop.f32.mrf.mxu1 }
 0xf9f   :  { %v1599_v34 = vmul.f32 0.25, %v1595_v33 }
 0xfa0   :  { %v4908_v49 = vpop.f32.mrf.mxu1 }
 0xfa1   :  { %v1600_v36 = vadd.f32 %v5630_v35, %v1599_v34 }
 0xfa3   :  { %v1601_v47 = vsel %vm305_vm3, %v1600_v36, -inf }
 0xfa4   :  { %1602 = vmax.xlane.f32.xlu1 %v1601_v47 }
 0xfb5   :  { %1735 = vrot.lane.b32.xlu1 %v5589_v13, %s5325_s28 }
 0xfb9   :  { %1733 = vrot.lane.b32.xlu1 %v5589_v13, %s5324_s27 }
0x102d   :  { %v1603_v39 = vpop.xlane.xlu1 %1602 }
0x102e   :  { %v1604_v44 = vsub.f32 %v1600_v36, %v1603_v39 }
0x1030   :  { %v1605_v46 = vmul.f32 1.442695, %v1604_v44 }
0x1031   :  { %v1736_v58 = vpop.permute.xlu1 %1735 }
0x1032   :  { %5230 = vpow2.f32 %v1605_v46  ;;  %v5162_v46 = vld [vmem:[%s6187_s10 + $0x18] sm:$0xff]  }
0x1035   :  { %v1734_v22 = vpop.permute.xlu1 %1733 }
0x103f   :  { %v5231_v50 = vpop.eup %5230 }
0x1040   :  { %v1607_v51 = vsel %vm305_vm3, %v5231_v50, 0.0 }
0x1041   :  { %1608 = vadd.xlane.f32.xlu0 %v1607_v51  ;;  %v5165_v51 = vld [vmem:[%s6187_s10] sm:$0xff]  }
0x1057   :  { %1612 = vrot.lane.b32.xlu0 %v5615_v30, %s5323_s22 }
0x10ca   :  { %v1609_v53 = vpop.xlane.xlu0 %1608 }
0x10cb   :  { %5232 = vrcp.f32 %v1609_v53 }
0x10ce   :  { %v1613_v55 = vpop.permute.xlu0 %1612 }
0x10cf   :  { %4910 = vmatpush3.msra.mxu0 %v1613_v55 }
0x10d0   :  { %4920 = vmatprep.subr.mxu0 %v5317_v40 }
0x10d8   :  { %v5233_v56 = vpop.eup %5232 }
0x10d9   :  { %v1611_v13 = vmul.f32 %v5233_v56, %v5231_v50  ;;  %v5164_v50 = vld [vmem:[%s6187_s10 + $0x8] sm:$0xff]  }
0x10db   :  { %4912 = vmatmul.mubr.msk.f32.vlgmr.msra.gmra.mxu0 %vm305_vm3, %v1611_v13 }
0x10dc   :  { %4921 = vmatpush3.xpose.msk.msra.mxu0 %vm222_vm2, %v1736_v58  ;;  %4922 = vmatprep.mubr.msk.f32.mxu0 %vm5318_vm1, %v5317_v40 }
0x10dd   :  { %4925 = vmatprep.subr.mxu0 %v5317_v40 }
0x10df   :  { %4923 = vmatmul.mubr.msk.f32.vlgmr.msra.gmra.mxu0 %vm222_vm2, %v1734_v22 }
0x10e0   :  { %4927 = vmatprep.mubr.msk.f32.mxu0 %vm5318_vm1, %v5317_v40 }
0x119b   :  { %v1684_v59 = vpop.f32.mrf.mxu0 }
0x119c   :  { %v1688_v60 = vpack.c.bf16 %v1684_v59, %v1684_v59 }
0x119d   :  { %v4913_v62 = vpop.f32.mrf.mxu0 }
0x119e   :  { %4917 = vmatmul.mubr.msk.bf16.vlgmr.msra.gmra.mxu1 %vm222_vm2, %v1688_v60 }
0x119f   :  { %v1807_v63 = vpop.f32.mrf.mxu0  ;;  %4931 = vmatpush3.bf16.msra.mxu1 %v5604_v21  ;;  %4932 = vmatprep.mubr.msk.bf16.mxu1 %vm5318_vm1, %v5317_v40 }
0x11a0   :  { %v1811_v1 = vmul.f32 0.25, %v1807_v63  ;;  %4948 = vmatprep.subr.bf16.mxu1 %v5317_v40 }
0x11a1   :  { %v4924_v2 = vpop.f32.mrf.mxu0 }
0x11a2   :  { %v1812_v3 = vadd.f32 %v5630_v35, %v1811_v1  ;;  %v1516_v35 = vadd.f32 %v5674_v25, %v1472_v28  ;;  %v4548_v1 = vld [vmem:[%s6186_s9] ss:$0 sm:$0xff] }
0x11a4   :  { %v1813_v4 = vsel %vm305_vm3, %v1812_v3, -inf }
0x11a5   :  { %1814 = vmax.xlane.f32.xlu1 %v1813_v4 }
0x11a9   :  { %1959 = vadd.xlane.f32.xlu1 %v1958_v6  ;;  %v5166_v6 = vld [vmem:[%s6189_s12 + $0x38] sm:$0xff]  }
0x122e   :  { %v1815_v21 = vpop.xlane.xlu1 %1814 }
0x122f   :  { %v1816_v7 = vsub.f32 %v1812_v3, %v1815_v21  ;;  %v5167_v21 = vld [vmem:[%s6189_s12 + $0x30] sm:$0xff]  }
0x1231   :  { %v1817_v8 = vmul.f32 1.442695, %v1816_v7  ;;  %v5168_v7 = vld [vmem:[%s6189_s12 + $0x28] sm:$0xff]  }
0x1232   :  { %v1960_v20 = vpop.xlane.xlu1 %1959 }
0x1233   :  { %5234 = vpow2.f32 %v1817_v8  ;;  %v1964_v23 = vmul.f32 0.015625, %v1960_v20  ;;  %v5170_v8 = vld [vmem:[%s6189_s12 + $0x18] sm:$0xff]  }
0x1235   :  { %v1966_v52 = vsub.f32 %v1954_v5, %v1964_v23 }
0x1237   :  { %v1968_v33 = vmul.f32 %v1966_v52, %v1966_v52 }
0x1239   :  { %v1970_v34 = vsel %vm59_vm0, %v1968_v33, 0.0 }
0x1240   :  { %v5235_v9 = vpop.eup %5234 }
0x1241   :  { %v1819_v57 = vsel %vm305_vm3, %v5235_v9, 0.0 }
0x1242   :  { %1820 = vadd.xlane.f32.xlu0 %v1819_v57  ;;  %v5172_v57 = vld [vmem:[%s6189_s12 + $0x8] sm:$0xff]  }
0x1258   :  { %1824 = vrot.lane.b32.xlu0 %v5615_v30, %s5324_s27 }
0x125e   :  { %v1726_v10 = vpop.f32.mrf.mxu1 }
0x125f   :  { %v1732_v11 = vadd.f32 %v1726_v10, %v1516_v35  ;;  %v5173_v35 = vld [vmem:[%s6189_s12] sm:$0xff]  }
0x1260   :  { %v4918_v37 = vpop.f32.mrf.mxu1  ;;  %v4549_v10 = vld [vmem:[%s6188_s11] ss:$0 sm:$0xff] }
0x1262   :  { %v1729_v12 = vpop.f32.mrf.mxu1 }
0x1264   :  { %v4919_v14 = vpop.f32.mrf.mxu1 }
0x12cb   :  { %v1821_v15 = vpop.xlane.xlu0 %1820 }
0x12cc   :  { %5236 = vrcp.f32 %v1821_v15 }
0x12cf   :  { %v1825_v16 = vpop.permute.xlu0 %1824 }
0x12d0   :  { %4926 = vmatpush3.msra.mxu0 %v1825_v16 }
0x12d1   :  { %4936 = vmatprep.subr.bf16.mxu0 %v5317_v40 }
0x12d9   :  { %v5237_v17 = vpop.eup %5236 }
0x12da   :  { %v1823_v19 = vmul.f32 %v5237_v17, %v5235_v9  ;;  %v5171_v9 = vld [vmem:[%s6189_s12 + $0x10] sm:$0xff]  }
0x12dc   :  { %4928 = vmatmul.mubr.msk.f32.vlgmr.msra.gmra.mxu0 %vm305_vm3, %v1823_v19 }
0x12dd   :  { %4944 = vmatprep.mubr.msk.bf16.mxu0 %vm5318_vm1, %v5317_v40  ;;  %4937 = vmatpush3.bf16.msra.mxu0 %v5162_v46 }
0x12de   :  { %4938 = vmatprep.subr.bf16.mxu0 %v5317_v40 }
0x139c   :  { %v1896_v30 = vpop.f32.mrf.mxu0 }
0x139d   :  { %v1900_v45 = vpack.c.bf16 %v1896_v30, %v1896_v30 }
0x139e   :  { %v4929_v54 = vpop.f32.mrf.mxu0 }
0x139f   :  { %4933 = vmatmul.mubr.msk.bf16.vlgmr.msra.gmra.mxu1 %vm222_vm2, %v1900_v45 }
0x13a0   :  { %4964 = vmatprep.mubr.msk.bf16.mxu1 %vm5318_vm1, %v5317_v40  ;;  %4949 = vmatpush3.bf16.msra.mxu1 %v5166_v6  ;;  %v5180_v6 = vld [vmem:[%s6181_s4 + $0x50] ss:$8 sps:$4 sm:$0xff]  }
0x13a1   :  { %4950 = vmatprep.subr.bf16.mxu1 %v5317_v40 }
0x13a4   :  { %4951 = vmatpush3.bf16.msra.mxu1 %v5167_v21  ;;  %v5182_v21 = vld [vmem:[%s6181_s4 + $0x54] ss:$8 sps:$4 sm:$0xff]  }
0x13a5   :  { %4952 = vmatprep.subr.bf16.mxu1 %v5317_v40 }
0x13a8   :  { %4953 = vmatpush3.bf16.msra.mxu1 %v5168_v7  ;;  %v5185_v7 = vld [vmem:[%s6181_s4 + $0x44] ss:$8 sps:$4 sm:$0xff]  }
0x13a9   :  { %4954 = vmatprep.subr.bf16.mxu1 %v5317_v40 }
0x145f   :  { %v1938_v24 = vpop.f32.mrf.mxu1 }
0x1460   :  { %v1944_v25 = vadd.f32 %v1938_v24, %v1732_v11 }
0x1461   :  { %v4934_v26 = vpop.f32.mrf.mxu1 }
0x1462   :  { %v1953_v27 = vadd.f32 %v4546_v61, %v1944_v25  ;;  %v4547_v61 = vld [vmem:[%s6185_s8] ss:$0 sm:$0xff] }
0x1463   :  { %v1941_v28 = vpop.f32.mrf.mxu1 }
0x1464   :  { %v1955_v29 = vadd.f32 %v1953_v27, %v5455_v38  ;;  %v5163_v38 = vld [vmem:[%s6187_s10 + $0x10] sm:$0xff]  }
0x1465   :  { %v4935_v31 = vpop.f32.mrf.mxu1  ;;  %4939 = vmatpush3.bf16.msra.mxu0 %v5163_v38 }
0x1466   :  { %v1961_v32 = vsel %vm59_vm0, %v1955_v29, 0.0  ;;  %4940 = vmatprep.subr.bf16.mxu0 %v5317_v40 }
0x1467   :  { %1962 = vadd.xlane.f32.xlu1 %v1961_v32 }
0x1469   :  { %4941 = vmatpush3.bf16.msra.mxu0 %v5164_v50 }
0x146a   :  { %4942 = vmatprep.subr.bf16.mxu0 %v5317_v40 }
0x146b   :  { %1971 = vadd.xlane.f32.xlu1 %v1970_v34 }
0x146d   :  { %4943 = vmatpush3.bf16.msra.mxu0 %v5165_v51 }
0x14f0   :  { %v1963_v49 = vpop.xlane.xlu1 %1962 }
0x14f1   :  { %v1965_v36 = vmul.f32 0.015625, %v1963_v49 }
0x14f3   :  { %v1967_v47 = vsub.f32 %v1955_v29, %v1965_v36  ;;  %v4555_v36 = vld [vmem:[%s6190_s13] ss:$0 sm:$0xff] }
0x14f4   :  { %v1972_v53 = vpop.xlane.xlu1 %1971 }
0x14f5   :  { %v1969_v39 = vmul.f32 %v1967_v47, %v1967_v47  ;;  %v1976_v55 = vmul.f32 0.015625, %v1972_v53 }
0x14f7   :  { %v1973_v44 = vsel %vm59_vm0, %v1969_v39, 0.0  ;;  %v1978_v56 = vadd.f32 1e-05, %v1976_v55 }
0x14f8   :  { %1974 = vadd.xlane.f32.xlu1 %v1973_v44 }
0x14f9   :  { %5238 = vrsqrt.f32 %v1978_v56 }
0x1506   :  { %v5239_v59 = vpop.eup %5238 }
0x1507   :  { %v1982_v60 = vmul.f32 %v5239_v59, %v1966_v52 }
0x1509   :  { %v1990_v0 = vmul.f32 %v4547_v61, %v1982_v60 }
0x150b   :  { %v5743_v3 = vadd.f32 %v4548_v1, %v1990_v0 }
0x1581   :  { %v1975_v58 = vpop.xlane.xlu1 %1974 }
0x1582   :  { %v1977_v13 = vmul.f32 0.015625, %v1975_v58 }
0x1584   :  { %v1979_v22 = vadd.f32 1e-05, %v1977_v13 }
0x1586   :  { %5240 = vrsqrt.f32 %v1979_v22 }
0x1593   :  { %v5241_v62 = vpop.eup %5240 }
0x1594   :  { %v1983_v63 = vmul.f32 %v5241_v62, %v1967_v47 }
0x1596   :  { %v1991_v2 = vmul.f32 %v4547_v61, %v1983_v63 }
0x1598   :  { %v5745_v4 = vadd.f32 %v4548_v1, %v1991_v2  ;;  %v5176_v2 = vld [vmem:[%s6181_s4 + $0x74] ss:$8 sps:$4 sm:$0xff]  }
0x1599   :  { %2335 = vmatprep.subr.bf16.mxu0 %v5176_v2 }
0x159a   :  { %v2000_v5 = vpack.c.bf16 %v5745_v4, %v5743_v3 }
0x159c   :  { %4945 = vmatmul.mubr.msk.bf16.vlgmr.msra.gmra.mxu0 %vm59_vm0, %v2000_v5  ;;  %v5177_v5 = vld [vmem:[%s6181_s4 + $0x60] ss:$8 sps:$4 sm:$0xff]  }
0x159d   :  { %2359 = vmatprep.mubr.bf16.mxu0 %v5316_v18  ;;  %v5169_v18 = vld [vmem:[%s6189_s12 + $0x20] sm:$0xff]  }
0x159e   :  { %4955 = vmatpush3.bf16.msra.mxu1 %v5169_v18  ;;  %v5183_v18 = vld [vmem:[%s6181_s4 + $0x40] ss:$8 sps:$4 sm:$0xff]  }
0x159f   :  { %4956 = vmatprep.subr.bf16.mxu1 %v5317_v40 }
0x15a2   :  { %4957 = vmatpush3.bf16.msra.mxu1 %v5170_v8 }
0x15a3   :  { %4958 = vmatprep.subr.bf16.mxu1 %v5317_v40 }
0x15a6   :  { %4959 = vmatpush3.bf16.msra.mxu1 %v5171_v9 }
0x15a7   :  { %4960 = vmatprep.subr.bf16.mxu1 %v5317_v40 }
0x15aa   :  { %4961 = vmatpush3.bf16.msra.mxu1 %v5172_v57 }
0x15ab   :  { %4962 = vmatprep.subr.bf16.mxu1 %v5317_v40 }
0x15ae   :  { %4963 = vmatpush3.bf16.msra.mxu1 %v5173_v35 }
0x15af   :  { %4973 = vmatprep.subr.mxu1 %v5317_v40 }
0x165c   :  { %v2077_v11 = vpop.f32.mrf.mxu0 }
0x165d   :  { %v2078_v37 = vadd.f32 %v4549_v10, %v2077_v11 }
0x165e   :  { %v4946_v12 = vpop.f32.mrf.mxu0 }
0x165f   :  { %v2086_v14 = vmul.f32 0.044715, %v2078_v37  ;;  %v2084_v29 = vmul.f32 0.5, %v2078_v37 }
0x1660   :  { %v2080_v15 = vpop.f32.mrf.mxu0 }
0x1661   :  { %v2088_v16 = vmul.f32 %v2086_v14, %v2078_v37  ;;  %v2081_v17 = vadd.f32 %v4549_v10, %v2080_v15  ;;  %v4564_v14 = vld [vmem:[%s6191_s14] ss:$0 sm:$0xff] }
0x1662   :  { %v4947_v19 = vpop.f32.mrf.mxu0 }
0x1663   :  { %v2090_v30 = vmul.f32 %v2088_v16, %v2078_v37  ;;  %v2087_v45 = vmul.f32 0.044715, %v2081_v17  ;;  %v2085_v31 = vmul.f32 0.5, %v2081_v17  ;;  %v4565_v19 = vld [vmem:[%s6192_s15] ss:$0 sm:$0xff] }
0x1665   :  { %v2092_v54 = vadd.f32 %v2090_v30, %v2078_v37  ;;  %v2089_v20 = vmul.f32 %v2087_v45, %v2081_v17 }
0x1667   :  { %v2094_v23 = vmul.f32 0.7978846, %v2092_v54  ;;  %v2091_v24 = vmul.f32 %v2089_v20, %v2081_v17 }
0x1669   :  { %5242 = vtanh.f32 %v2094_v23  ;;  %v2093_v25 = vadd.f32 %v2091_v24, %v2081_v17  ;;  %v4574_v23 = vld [vmem:[%s6182_s5 + $0x2] sm:$0x3]  ;;  %s5326_s5 = smov [#allocation2]  }
0x166a   :  { %v2277_v24 = vrot.slane %v4574_v23, %v116_v43  ;;  %s4488_s30 = sshll.u32 %s5326_s5, 4  ;;  %s4489_s30 = int_to_ptr.vmem [resolvable:$true] %s4488_s30 }
0x166b   :  { %v2095_v26 = vmul.f32 0.7978846, %v2093_v25  ;;  %v5844_v25 = vrot.slane %v4574_v23, %v120_v48  ;;  %p5299_p1 = scmp.lt.s32.totalorder %s4489_s30, %s4489_s30 }
0x166d   :  { %5244 = vtanh.f32 %v2095_v26 }
0x1676   :  { %v5243_v52 = vpop.eup %5242 }
0x1677   :  { %v2098_v27 = vadd.f32 1.0, %v5243_v52 }
0x1679   :  { %v2100_v33 = vmul.f32 %v2098_v27, %v2084_v29 }
0x167a   :  { %v5245_v28 = vpop.eup %5244 }
0x167b   :  { %v2099_v32 = vadd.f32 1.0, %v5245_v28 }
0x167d   :  { %v2101_v34 = vmul.f32 %v2099_v32, %v2085_v31 }
0x167f   :  { %v2102_v49 = vpack.c.bf16 %v2101_v34, %v2100_v33 }
0x1681   :  { %4965 = vmatmul.mubr.bf16.vlgmr.msra.gmra.mxu1 %v2102_v49 }
0x1682   :  { %4975 = vmatprep.mubr.msk.f32.mxu1 %vm5318_vm1, %v5317_v40 }
0x1741   :  { %v2208_v47 = vpop.f32.mrf.mxu1 }
0x1742   :  { %v2209_v39 = vadd.f32 %v4555_v36, %v2208_v47  ;;  %v5877_v47 = vld [vmem:[%s6178_s1] ss:$0 sm:$0xff] }
0x1743   :  { %v4966_v44 = vpop.f32.mrf.mxu1 }
0x1744   :  { %v2215_v46 = vadd.f32 %v2209_v39, %v5743_v3  ;;  %v5174_v3 = vld [vmem:[%s6181_s4 + $0x70] ss:$8 sps:$4 sm:$0xff]  }
0x1745   :  { %v2211_v38 = vpop.f32.mrf.mxu1  ;;  %2336 = vmatpush1.bf16.msra.mxu0 %v5174_v3 }
0x1746   :  { %v2212_v50 = vadd.f32 %v4555_v36, %v2211_v38  ;;  %v2219_v51 = vsel %vm59_vm0, %v2215_v46, 0.0 }
0x1747   :  { %2220 = vadd.xlane.f32.xlu1 %v2219_v51  ;;  %v4967_v53 = vpop.f32.mrf.mxu1 }
0x1748   :  { %v2216_v55 = vadd.f32 %v2212_v50, %v5745_v4  ;;  %v5179_v4 = vld [vmem:[%s6181_s4 + $0x64] ss:$8 sps:$4 sm:$0xff]  }
0x1749   :  { %2337 = vmatprep.subr.bf16.mxu0 %v5179_v4 }
0x174a   :  { %v2222_v56 = vsel %vm59_vm0, %v2216_v55, 0.0  ;;  %2338 = vmatpush1.bf16.msra.mxu0 %v5177_v5 }
0x174b   :  { %2223 = vadd.xlane.f32.xlu0 %v2222_v56  ;;  %2339 = vmatprep.subr.bf16.mxu0 %v5182_v21  ;;  %v5901_v21 = vld [vmem:[%s6183_s6 + $0x20] sm:$0xff]  }
0x174e   :  { %2340 = vmatpush1.bf16.msra.mxu0 %v5180_v6 }
0x174f   :  { %2341 = vmatprep.subr.bf16.mxu0 %v5185_v7  ;;  %v5907_v7 = vld [vmem:[%s6183_s6 + $0x28] sm:$0xff]  }
0x1752   :  { %2342 = vmatpush1.bf16.msra.mxu0 %v5183_v18 }
0x1753   :  { %4968 = vmatprep.subr.mxu0 %v5317_v40 }
0x17d0   :  { %v2221_v58 = vpop.xlane.xlu1 %2220 }
0x17d1   :  { %v2225_v13 = vmul.f32 0.015625, %v2221_v58 }
0x17d3   :  { %v2227_v22 = vsub.f32 %v2215_v46, %v2225_v13 }
0x17d4   :  { %v2224_v59 = vpop.xlane.xlu0 %2223 }
0x17d5   :  { %v2226_v60 = vmul.f32 0.015625, %v2224_v59  ;;  %v2229_v61 = vmul.f32 %v2227_v22, %v2227_v22 }
0x17d7   :  { %v2228_v62 = vsub.f32 %v2216_v55, %v2226_v60  ;;  %v2231_v63 = vsel %vm59_vm0, %v2229_v61, 0.0 }
0x17d8   :  { %2232 = vadd.xlane.f32.xlu1 %v2231_v63 }
0x17d9   :  { %v2230_v0 = vmul.f32 %v2228_v62, %v2228_v62 }
0x17db   :  { %v2234_v1 = vsel %vm59_vm0, %v2230_v0, 0.0 }
0x17dc   :  { %2235 = vadd.xlane.f32.xlu1 %v2234_v1 }
0x1861   :  { %v2233_v8 = vpop.xlane.xlu1 %2232 }
0x1862   :  { %v2237_v9 = vmul.f32 0.015625, %v2233_v8 }
0x1864   :  { %v2239_v57 = vadd.f32 1e-05, %v2237_v9 }
0x1865   :  { %v2236_v35 = vpop.xlane.xlu1 %2235 }
0x1866   :  { %5246 = vrsqrt.f32 %v2239_v57  ;;  %v2238_v10 = vmul.f32 0.015625, %v2236_v35 }
0x1868   :  { %v2240_v11 = vadd.f32 1e-05, %v2238_v10 }
0x186a   :  { %5248 = vrsqrt.f32 %v2240_v11 }
0x1873   :  { %v5247_v37 = vpop.eup %5246 }
0x1874   :  { %v2243_v12 = vmul.f32 %v5247_v37, %v2227_v22 }
0x1876   :  { %v2251_v17 = vmul.f32 %v4564_v14, %v2243_v12 }
0x1877   :  { %v5249_v15 = vpop.eup %5248 }
0x1878   :  { %v2244_v16 = vmul.f32 %v5249_v15, %v2228_v62  ;;  %v5828_v45 = vadd.f32 %v4565_v19, %v2251_v17 }
0x187a   :  { %v2252_v30 = vmul.f32 %v4564_v14, %v2244_v16 }
0x187c   :  { %v5830_v54 = vadd.f32 %v4565_v19, %v2252_v30 }
0x187e   :  { %v2261_v20 = vpack.c.bf16 %v5830_v54, %v5828_v45 }
0x1880   :  { %4583 = vmatmul.mubr.msk.bf16.vlgmr.msra.gmra.mxu0 %vm59_vm0, %v2261_v20 }
0x1881   :  { %4970 = vmatprep.mubr.msk.f32.mxu0 %vm5318_vm1, %v5317_v40 }
0x1940   :  { %v2361_v26 = vpop.f32.mrf.mxu0 }
0x1941   :  { %v5846_v52 = vadd.f32 %v2361_v26, %v2277_v24 }
0x1942   :  { %v2363_v27 = vpop.f32.mrf.mxu0 }
0x1943   :  { %v5849_v28 = vadd.f32 %v2363_v27, %v5844_v25  ;;  %2543 = vrot.lane.b32.xlu0 %v5846_v52, %s5320_s17  ;;  %2380 = vrot.lane.b32.xlu1 %v5846_v52, %s5319_s0 }
0x1944   :  { %v2365_v29 = vpop.f32.mrf.mxu0 }
0x1945   :  { %v5855_v31 = vadd.f32 %v2365_v29, %v2277_v24  ;;  %4974 = vmatpush3.msra.mxu1 %v5849_v28 }
0x1946   :  { %4983 = vmatprep.subr.mxu1 %v5317_v40  ;;  %v5872_v33 = vpop.f32.mrf.mxu0 }
0x1947   :  { %2545 = vrot.lane.b32.xlu1 %v5846_v52, %s5321_s20 }
0x19b5   :  { %v2381_v43 = vpop.permute.xlu1 %2380  ;;  %v2544_v32 = vpop.permute.xlu0 %2543 }
0x19b6   :  { %4969 = vmatpush3.xpose.msk.msra.mxu0 %vm222_vm2, %v2381_v43 }
0x19b7   :  { %4978 = vmatprep.subr.mxu0 %v5317_v40 }
0x19b9   :  { %4971 = vmatmul.mubr.msk.f32.vlgmr.msra.gmra.mxu0 %vm222_vm2, %v5846_v52  ;;  %v2546_v48 = vpop.permute.xlu1 %2545 }
0x19ba   :  { %4979 = vmatpush3.xpose.msk.msra.mxu0 %vm222_vm2, %v2546_v48  ;;  %4980 = vmatprep.mubr.msk.f32.mxu0 %vm5318_vm1, %v5317_v40 }
0x19bb   :  { %4988 = vmatprep.subr.bf16.mxu0 %v5317_v40 }
0x19bd   :  { %4981 = vmatmul.mubr.msk.f32.vlgmr.msra.gmra.mxu0 %vm222_vm2, %v2544_v32 }
0x19be   :  { %4990 = vmatprep.mubr.msk.bf16.mxu0 %vm5318_vm1, %v5317_v40  ;;  %4989 = vmatpush3.bf16.msra.mxu0 %v5907_v7 }
0x19bf   :  { %5000 = vmatprep.subr.mxu0 %v5317_v40 }
0x1a79   :  { %v2452_v34 = vpop.f32.mrf.mxu0 }
0x1a7a   :  { %v2456_v49 = vmul.f32 0.25, %v2452_v34 }
0x1a7b   :  { %v4972_v36 = vpop.f32.mrf.mxu0 }
0x1a7c   :  { %v2457_v39 = vadd.f32 %v5877_v47, %v2456_v49 }
0x1a7d   :  { %v2617_v44 = vpop.f32.mrf.mxu0 }
0x1a7e   :  { %v2621_v46 = vmul.f32 0.25, %v2617_v44  ;;  %v2458_v38 = vsel %vm305_vm3, %v2457_v39, -inf }
0x1a7f   :  { %2459 = vmax.xlane.f32.xlu1 %v2458_v38  ;;  %v4982_v50 = vpop.f32.mrf.mxu0 }
0x1a80   :  { %v2622_v51 = vadd.f32 %v5877_v47, %v2621_v46 }
0x1a82   :  { %v2623_v53 = vsel %vm305_vm3, %v2622_v51, -inf }
0x1a83   :  { %2624 = vmax.xlane.f32.xlu0 %v2623_v53 }
0x1a99   :  { %2812 = vrot.lane.b32.xlu0 %v5846_v52, %s5322_s21 }
0x1b08   :  { %v2460_v55 = vpop.xlane.xlu1 %2459 }
0x1b09   :  { %v2461_v56 = vsub.f32 %v2457_v39, %v2460_v55 }
0x1b0b   :  { %v2462_v58 = vmul.f32 1.442695, %v2461_v56 }
0x1b0c   :  { %v2625_v13 = vpop.xlane.xlu0 %2624 }
0x1b0d   :  { %5250 = vpow2.f32 %v2462_v58  ;;  %v2626_v22 = vsub.f32 %v2622_v51, %v2625_v13 }
0x1b0f   :  { %v2627_v59 = vmul.f32 1.442695, %v2626_v22 }
0x1b10   :  { %v2813_v11 = vpop.permute.xlu0 %2812 }
0x1b11   :  { %5252 = vpow2.f32 %v2627_v59 }
0x1b1a   :  { %v5251_v60 = vpop.eup %5250 }
0x1b1b   :  { %v2464_v61 = vsel %vm305_vm3, %v5251_v60, 0.0 }
0x1b1c   :  { %2465 = vadd.xlane.f32.xlu1 %v2464_v61 }
0x1b1e   :  { %v5253_v62 = vpop.eup %5252 }
0x1b1f   :  { %v2629_v63 = vsel %vm305_vm3, %v5253_v62, 0.0 }
0x1b20   :  { %2630 = vadd.xlane.f32.xlu1 %v2629_v63 }
0x1b31   :  { %2635 = vrot.lane.b32.xlu1 %v5849_v28, %s5320_s17 }
0x1b35   :  { %2810 = vrot.lane.b32.xlu1 %v5846_v52, %s5323_s22 }
0x1ba5   :  { %v2466_v0 = vpop.xlane.xlu1 %2465 }
0x1ba6   :  { %5254 = vrcp.f32 %v2466_v0 }
0x1ba9   :  { %v2631_v1 = vpop.xlane.xlu1 %2630 }
0x1baa   :  { %5256 = vrcp.f32 %v2631_v1 }
0x1bad   :  { %v2636_v4 = vpop.permute.xlu1 %2635 }
0x1bb1   :  { %v2811_v37 = vpop.permute.xlu1 %2810 }
0x1bb3   :  { %v5255_v2 = vpop.eup %5254 }
0x1bb4   :  { %v2468_v3 = vmul.f32 %v5255_v2, %v5251_v60 }
0x1bb6   :  { %4976 = vmatmul.mubr.msk.f32.vlgmr.msra.gmra.mxu1 %vm305_vm3, %v2468_v3 }
0x1bb7   :  { %v5257_v5 = vpop.eup %5256  ;;  %4984 = vmatpush3.msra.mxu1 %v2636_v4  ;;  %4985 = vmatprep.mubr.msk.f32.mxu1 %vm5318_vm1, %v5317_v40  ;;  %v5969_v4 = vld [vmem:[%s6183_s6 + $0x38] sm:$0xff]  }
0x1bb8   :  { %v2633_v6 = vmul.f32 %v5257_v5, %v5253_v62  ;;  %4994 = vmatprep.subr.bf16.mxu1 %v5317_v40 }
0x1bba   :  { %4986 = vmatmul.mubr.msk.f32.vlgmr.msra.gmra.mxu1 %vm305_vm3, %v2633_v6 }
0x1bbb   :  { %4996 = vmatprep.mubr.msk.bf16.mxu1 %vm5318_vm1, %v5317_v40  ;;  %4995 = vmatpush3.bf16.msra.mxu1 %v5901_v21 }
0x1bbc   :  { %5005 = vmatprep.subr.mxu1 %v5317_v40 }
0x1c76   :  { %v2538_v18 = vpop.f32.mrf.mxu1 }
0x1c77   :  { %v2542_v8 = vpack.c.bf16 %v2538_v18, %v2538_v18 }
0x1c78   :  { %v4977_v9 = vpop.f32.mrf.mxu1 }
0x1c79   :  { %4997 = vmatmul.mubr.msk.bf16.vlgmr.msra.gmra.mxu1 %vm222_vm2, %v2542_v8 }
0x1c7a   :  { %v2707_v57 = vpop.f32.mrf.mxu1  ;;  %5007 = vmatprep.mubr.msk.f32.mxu1 %vm5318_vm1, %v5317_v40 }
0x1c7b   :  { %v2711_v35 = vpack.c.bf16 %v2707_v57, %v2707_v57 }
0x1c7c   :  { %v4987_v10 = vpop.f32.mrf.mxu1 }
0x1c7d   :  { %4991 = vmatmul.mubr.msk.bf16.vlgmr.msra.gmra.mxu0 %vm222_vm2, %v2711_v35  ;;  %v5980_v35 = vadd.f32 %v5872_v33, %v5844_v25 }
0x1c7e   :  { %5001 = vmatpush3.xpose.msk.msra.mxu0 %vm222_vm2, %v2813_v11  ;;  %5002 = vmatprep.mubr.msk.f32.mxu0 %vm5318_vm1, %v5317_v40 }
0x1c7f   :  { %5010 = vmatprep.subr.bf16.mxu0 %v5317_v40 }
0x1c85   :  { %5003 = vmatmul.mubr.msk.f32.vlgmr.msra.gmra.mxu0 %vm222_vm2, %v2811_v37 }
0x1c86   :  { %5012 = vmatprep.mubr.msk.bf16.mxu0 %vm5318_vm1, %v5317_v40 }
0x1d39   :  { %v2804_v12 = vpop.f32.mrf.mxu1 }
0x1d3b   :  { %v4998_v14 = vpop.f32.mrf.mxu1 }
0x1d3d   :  { %v2755_v15 = vpop.f32.mrf.mxu0  ;;  %v2807_v16 = vpop.f32.mrf.mxu1 }
0x1d3e   :  { %v5923_v17 = vadd.f32 %v2804_v12, %v2755_v15  ;;  %v5996_v15 = vld [vmem:[%s6178_s1 + $0x1] ss:$0 sm:$0xff] }
0x1d3f   :  { %v4992_v19 = vpop.f32.mrf.mxu0  ;;  %v4999_v30 = vpop.f32.mrf.mxu1 }
0x1d41   :  { %v2758_v20 = vpop.f32.mrf.mxu0 }
0x1d43   :  { %v4993_v23 = vpop.f32.mrf.mxu0 }
0x1d45   :  { %v2884_v24 = vpop.f32.mrf.mxu0 }
0x1d46   :  { %v2888_v26 = vmul.f32 0.25, %v2884_v24 }
0x1d47   :  { %v5004_v27 = vpop.f32.mrf.mxu0 }
0x1d48   :  { %v2889_v29 = vadd.f32 %v5877_v47, %v2888_v26 }
0x1d4a   :  { %v2890_v43 = vsel %vm305_vm3, %v2889_v29, -inf }
0x1d4b   :  { %2891 = vmax.xlane.f32.xlu1 %v2890_v43 }
0x1d5c   :  { %2901 = vrot.lane.b32.xlu1 %v5849_v28, %s5323_s22 }
0x1d60   :  { %3028 = vrot.lane.b32.xlu1 %v5846_v52, %s5324_s27 }
0x1dd4   :  { %v2892_v48 = vpop.xlane.xlu1 %2891 }
0x1dd5   :  { %v2893_v32 = vsub.f32 %v2889_v29, %v2892_v48 }
0x1dd7   :  { %v2894_v34 = vmul.f32 1.442695, %v2893_v32 }
0x1dd8   :  { %v2902_v49 = vpop.permute.xlu1 %2901 }
0x1dd9   :  { %5258 = vpow2.f32 %v2894_v34  ;;  %5006 = vmatpush3.msra.mxu1 %v2902_v49 }
0x1dda   :  { %5016 = vmatprep.subr.mxu1 %v5317_v40 }
0x1ddc   :  { %v3029_v51 = vpop.permute.xlu1 %3028 }
0x1de6   :  { %v5259_v36 = vpop.eup %5258 }
0x1de7   :  { %v2896_v39 = vsel %vm305_vm3, %v5259_v36, 0.0 }
0x1de8   :  { %2897 = vadd.xlane.f32.xlu0 %v2896_v39 }
0x1dfe   :  { %3030 = vrot.lane.b32.xlu0 %v5846_v52, %s5325_s28  ;;  %v5946_v52 = vld [vmem:[%s6183_s6 + $0x30] sm:$0xff]  }
0x1dff   :  { %5011 = vmatpush3.bf16.msra.mxu0 %v5946_v52 }
0x1e00   :  { %5026 = vmatprep.subr.bf16.mxu0 %v5317_v40 }
0x1e71   :  { %v2898_v44 = vpop.xlane.xlu0 %2897 }
0x1e72   :  { %5260 = vrcp.f32 %v2898_v44 }
0x1e75   :  { %v3031_v50 = vpop.permute.xlu0 %3030 }
0x1e7f   :  { %v5261_v46 = vpop.eup %5260 }
0x1e80   :  { %v2900_v38 = vmul.f32 %v5261_v46, %v5259_v36 }
0x1e82   :  { %5008 = vmatmul.mubr.msk.f32.vlgmr.msra.gmra.mxu1 %vm305_vm3, %v2900_v38 }
0x1e83   :  { %5017 = vmatpush3.xpose.msk.msra.mxu1 %vm222_vm2, %v3031_v50  ;;  %5018 = vmatprep.mubr.msk.f32.mxu1 %vm5318_vm1, %v5317_v40 }
0x1e84   :  { %5021 = vmatprep.subr.mxu1 %v5317_v40 }
0x1e86   :  { %5019 = vmatmul.mubr.msk.f32.vlgmr.msra.gmra.mxu1 %vm222_vm2, %v3029_v51 }
0x1e87   :  { %5023 = vmatprep.mubr.msk.f32.mxu1 %vm5318_vm1, %v5317_v40 }
0x1f42   :  { %v2973_v53 = vpop.f32.mrf.mxu1 }
0x1f43   :  { %v2977_v55 = vpack.c.bf16 %v2973_v53, %v2973_v53 }
0x1f44   :  { %v5009_v56 = vpop.f32.mrf.mxu1 }
0x1f45   :  { %5013 = vmatmul.mubr.msk.bf16.vlgmr.msra.gmra.mxu0 %vm222_vm2, %v2977_v55 }
0x1f46   :  { %v3102_v58 = vpop.f32.mrf.mxu1  ;;  %5028 = vmatprep.mubr.msk.bf16.mxu0 %vm5318_vm1, %v5317_v40  ;;  %5027 = vmatpush3.bf16.msra.mxu0 %v5969_v4 }
0x1f47   :  { %v3106_v13 = vmul.f32 0.25, %v3102_v58  ;;  %5042 = vmatprep.subr.mxu0 %v5317_v40 }
0x1f48   :  { %v5020_v22 = vpop.f32.mrf.mxu1 }
0x1f49   :  { %v3107_v59 = vadd.f32 %v5877_v47, %v3106_v13 }
0x1f4b   :  { %v3108_v60 = vsel %vm305_vm3, %v3107_v59, -inf }
0x1f4c   :  { %3109 = vmax.xlane.f32.xlu1 %v3108_v60 }
0x1f5d   :  { %3119 = vrot.lane.b32.xlu1 %v5849_v28, %s5324_s27 }
0x1f61   :  { %3412 = vrot.lane.b32.xlu1 %v5855_v31, %s5321_s20 }
0x1f65   :  { %3410 = vrot.lane.b32.xlu1 %v5855_v31, %s5320_s17 }
0x1fd5   :  { %v3110_v61 = vpop.xlane.xlu1 %3109 }
0x1fd6   :  { %v3111_v62 = vsub.f32 %v3107_v59, %v3110_v61 }
0x1fd8   :  { %v3112_v63 = vmul.f32 1.442695, %v3111_v62 }
0x1fd9   :  { %v3120_v0 = vpop.permute.xlu1 %3119 }
0x1fda   :  { %5262 = vpow2.f32 %v3112_v63  ;;  %5022 = vmatpush3.msra.mxu1 %v3120_v0 }
0x1fdb   :  { %5032 = vmatprep.subr.mxu1 %v5317_v40 }
0x1fdd   :  { %v3413_v12 = vpop.permute.xlu1 %3412 }
0x1fe1   :  { %v3411_v19 = vpop.permute.xlu1 %3410 }
0x1fe7   :  { %v5263_v47 = vpop.eup %5262 }
0x1fe8   :  { %v3114_v1 = vsel %vm305_vm3, %v5263_v47, 0.0 }
0x1fe9   :  { %3115 = vadd.xlane.f32.xlu0 %v3114_v1 }
0x1fff   :  { %3247 = vrot.lane.b32.xlu0 %v5855_v31, %s5319_s0 }
0x2005   :  { %v3021_v28 = vpop.f32.mrf.mxu0 }
0x2006   :  { %v3027_v2 = vadd.f32 %v3021_v28, %v5923_v17 }
0x2007   :  { %v5014_v3 = vpop.f32.mrf.mxu0 }
0x2009   :  { %v3024_v5 = vpop.f32.mrf.mxu0 }
0x200b   :  { %v5015_v6 = vpop.f32.mrf.mxu0 }
0x2072   :  { %v3116_v18 = vpop.xlane.xlu0 %3115 }
0x2073   :  { %5264 = vrcp.f32 %v3116_v18 }
0x2076   :  { %v3248_v57 = vpop.permute.xlu0 %3247 }
0x2080   :  { %v5265_v8 = vpop.eup %5264 }
0x2081   :  { %v3118_v9 = vmul.f32 %v5265_v8, %v5263_v47 }
0x2083   :  { %5024 = vmatmul.mubr.msk.f32.vlgmr.msra.gmra.mxu1 %vm305_vm3, %v3118_v9 }
0x2084   :  { %5033 = vmatpush3.xpose.msk.msra.mxu1 %vm222_vm2, %v3248_v57  ;;  %5034 = vmatprep.mubr.msk.f32.mxu1 %vm5318_vm1, %v5317_v40 }
0x2085   :  { %5037 = vmatprep.subr.mxu1 %v5317_v40 }
0x2087   :  { %5035 = vmatmul.mubr.msk.f32.vlgmr.msra.gmra.mxu1 %vm222_vm2, %v5855_v31 }
0x2088   :  { %5038 = vmatpush3.msra.mxu1 %v5980_v35  ;;  %5039 = vmatprep.mubr.msk.f32.mxu1 %vm5318_vm1, %v5317_v40 }
0x2089   :  { %5047 = vmatprep.subr.mxu1 %v5317_v40 }
0x2143   :  { %v3191_v10 = vpop.f32.mrf.mxu1 }
0x2144   :  { %v3195_v11 = vpack.c.bf16 %v3191_v10, %v3191_v10 }
0x2145   :  { %v5025_v37 = vpop.f32.mrf.mxu1 }
0x2146   :  { %5029 = vmatmul.mubr.msk.bf16.vlgmr.msra.gmra.mxu0 %vm222_vm2, %v3195_v11 }
0x2147   :  { %5043 = vmatpush3.xpose.msk.msra.mxu0 %vm222_vm2, %v3413_v12  ;;  %v3319_v25 = vpop.f32.mrf.mxu1  ;;  %5044 = vmatprep.mubr.msk.f32.mxu0 %vm5318_vm1, %v5317_v40 }
0x2148   :  { %v3323_v33 = vmul.f32 0.25, %v3319_v25  ;;  %5052 = vmatprep.subr.bf16.mxu0 %v5317_v40 }
0x2149   :  { %v5036_v14 = vpop.f32.mrf.mxu1 }
0x214a   :  { %v3324_v16 = vadd.f32 %v5996_v15, %v3323_v33 }
0x214c   :  { %v3325_v17 = vsel %vm305_vm3, %v3324_v16, -inf }
0x214d   :  { %3326 = vmax.xlane.f32.xlu0 %v3325_v17 }
0x214e   :  { %5045 = vmatmul.mubr.msk.f32.vlgmr.msra.gmra.mxu0 %vm222_vm2, %v3411_v19 }
0x214f   :  { %5053 = vmatpush3.bf16.msra.mxu0 %v5907_v7  ;;  %5054 = vmatprep.mubr.msk.bf16.mxu0 %vm5318_vm1, %v5317_v40 }
0x2150   :  { %5064 = vmatprep.subr.mxu0 %v5317_v40 }
0x21d6   :  { %v3327_v30 = vpop.xlane.xlu0 %3326 }
0x21d7   :  { %v3328_v20 = vsub.f32 %v3324_v16, %v3327_v30 }
0x21d9   :  { %v3329_v23 = vmul.f32 1.442695, %v3328_v20 }
0x21db   :  { %5266 = vpow2.f32 %v3329_v23 }
0x21e8   :  { %v5267_v24 = vpop.eup %5266 }
0x21e9   :  { %v3331_v26 = vsel %vm305_vm3, %v5267_v24, 0.0 }
0x21ea   :  { %3332 = vadd.xlane.f32.xlu0 %v3331_v26 }
0x2206   :  { %v3239_v27 = vpop.f32.mrf.mxu0 }
0x2207   :  { %v6006_v29 = vadd.f32 %v3239_v27, %v3027_v2 }
0x2208   :  { %v5030_v43 = vpop.f32.mrf.mxu0 }
0x220a   :  { %v3242_v48 = vpop.f32.mrf.mxu0 }
0x220c   :  { %v5031_v32 = vpop.f32.mrf.mxu0 }
0x220e   :  { %v3484_v7 = vpop.f32.mrf.mxu0 }
0x220f   :  { %v3488_v34 = vmul.f32 0.25, %v3484_v7 }
0x2210   :  { %v5046_v49 = vpop.f32.mrf.mxu0 }
0x2211   :  { %v3489_v36 = vadd.f32 %v5996_v15, %v3488_v34 }
0x2213   :  { %v3490_v39 = vsel %vm305_vm3, %v3489_v36, -inf }
0x2214   :  { %3491 = vmax.xlane.f32.xlu1 %v3490_v39 }
0x2225   :  { %3502 = vrot.lane.b32.xlu1 %v5980_v35, %s5320_s17 }
0x2229   :  { %3665 = vrot.lane.b32.xlu1 %v5855_v31, %s5323_s22 }
0x2273   :  { %v3333_v44 = vpop.xlane.xlu0 %3332 }
0x2274   :  { %5268 = vrcp.f32 %v3333_v44 }
0x2281   :  { %v5269_v46 = vpop.eup %5268 }
0x2282   :  { %v3335_v38 = vmul.f32 %v5269_v46, %v5267_v24 }
0x2284   :  { %5040 = vmatmul.mubr.msk.f32.vlgmr.msra.gmra.mxu1 %vm305_vm3, %v3335_v38 }
0x2285   :  { %5049 = vmatprep.mubr.msk.f32.mxu1 %vm5318_vm1, %v5317_v40 }
0x229d   :  { %v3492_v50 = vpop.xlane.xlu1 %3491 }
0x229e   :  { %v3493_v51 = vsub.f32 %v3489_v36, %v3492_v50 }
0x22a0   :  { %v3494_v53 = vmul.f32 1.442695, %v3493_v51 }
0x22a1   :  { %v3503_v55 = vpop.permute.xlu1 %3502 }
0x22a2   :  { %5270 = vpow2.f32 %v3494_v53  ;;  %5048 = vmatpush3.msra.mxu1 %v3503_v55 }
0x22a3   :  { %5058 = vmatprep.subr.bf16.mxu1 %v5317_v40 }
0x22a5   :  { %v3666_v3 = vpop.permute.xlu1 %3665 }
0x22af   :  { %v5271_v56 = vpop.eup %5270 }
0x22b0   :  { %v3496_v58 = vsel %vm305_vm3, %v5271_v56, 0.0 }
0x22b1   :  { %3497 = vadd.xlane.f32.xlu0 %v3496_v58 }
0x22c7   :  { %3667 = vrot.lane.b32.xlu0 %v5855_v31, %s5322_s21 }
0x233a   :  { %v3498_v13 = vpop.xlane.xlu0 %3497 }
0x233b   :  { %5272 = vrcp.f32 %v3498_v13 }
0x233e   :  { %v3668_v1 = vpop.permute.xlu0 %3667 }
0x2344   :  { %v3405_v22 = vpop.f32.mrf.mxu1 }
0x2345   :  { %v3409_v62 = vpack.c.bf16 %v3405_v22, %v3405_v22 }
0x2346   :  { %v5041_v59 = vpop.f32.mrf.mxu1 }
0x2348   :  { %v5273_v60 = vpop.eup %5272 }
0x2349   :  { %v3500_v61 = vmul.f32 %v5273_v60, %v5271_v56 }
0x234b   :  { %5050 = vmatmul.mubr.msk.f32.vlgmr.msra.gmra.mxu1 %vm305_vm3, %v3500_v61 }
0x234c   :  { %5059 = vmatpush3.bf16.msra.mxu1 %v5901_v21  ;;  %5060 = vmatprep.mubr.msk.bf16.mxu1 %vm5318_vm1, %v5317_v40 }
0x234d   :  { %5069 = vmatprep.subr.mxu1 %v5317_v40 }
0x234f   :  { %5061 = vmatmul.mubr.msk.bf16.vlgmr.msra.gmra.mxu1 %vm222_vm2, %v3409_v62 }
0x2350   :  { %5071 = vmatprep.mubr.msk.f32.mxu1 %vm5318_vm1, %v5317_v40 }
0x240b   :  { %v3574_v63 = vpop.f32.mrf.mxu1 }
0x240c   :  { %v3578_v0 = vpack.c.bf16 %v3574_v63, %v3574_v63 }
0x240d   :  { %v5051_v47 = vpop.f32.mrf.mxu1 }
0x240e   :  { %5055 = vmatmul.mubr.msk.bf16.vlgmr.msra.gmra.mxu0 %vm222_vm2, %v3578_v0 }
0x240f   :  { %5065 = vmatpush3.xpose.msk.msra.mxu0 %vm222_vm2, %v3668_v1  ;;  %v6031_v21 = vpop.f32.mrf.mxu1  ;;  %5066 = vmatprep.mubr.msk.f32.mxu0 %vm5318_vm1, %v5317_v40 }
0x2410   :  { %5074 = vmatprep.subr.bf16.mxu0 %v5317_v40 }
0x2411   :  { %v5062_v28 = vpop.f32.mrf.mxu1 }
0x2413   :  { %v3662_v2 = vpop.f32.mrf.mxu1 }
0x2415   :  { %v5063_v5 = vpop.f32.mrf.mxu1 }
0x2416   :  { %5067 = vmatmul.mubr.msk.f32.vlgmr.msra.gmra.mxu0 %vm222_vm2, %v3666_v3 }
0x2417   :  { %5075 = vmatpush3.bf16.msra.mxu0 %v5946_v52  ;;  %5076 = vmatprep.mubr.msk.bf16.mxu0 %vm5318_vm1, %v5317_v40 }
0x2418   :  { %5090 = vmatprep.subr.bf16.mxu0 %v5317_v40 }
0x24ce   :  { %v6041_v6 = vpop.f32.mrf.mxu0 }
0x24cf   :  { %v3660_v51 = vadd.f32 %v6031_v21, %v6041_v6 }
0x24d0   :  { %v5056_v18 = vpop.f32.mrf.mxu0 }
0x24d2   :  { %v3619_v8 = vpop.f32.mrf.mxu0 }
0x24d4   :  { %v5057_v9 = vpop.f32.mrf.mxu0 }
0x24d6   :  { %v3739_v57 = vpop.f32.mrf.mxu0 }
0x24d7   :  { %v3743_v10 = vmul.f32 0.25, %v3739_v57 }
0x24d8   :  { %v5068_v11 = vpop.f32.mrf.mxu0 }
0x24d9   :  { %v3744_v37 = vadd.f32 %v5996_v15, %v3743_v10 }
0x24db   :  { %v3745_v12 = vsel %vm305_vm3, %v3744_v37, -inf }
0x24dc   :  { %3746 = vmax.xlane.f32.xlu1 %v3745_v12  ;;  %v5190_v12 = vld [vmem:[%s6187_s10 + $0x38] sm:$0xff]  }
0x24ed   :  { %3879 = vrot.lane.b32.xlu1 %v5855_v31, %s5325_s28 }
0x24f1   :  { %3877 = vrot.lane.b32.xlu1 %v5855_v31, %s5324_s27 }
0x2565   :  { %v3747_v52 = vpop.xlane.xlu1 %3746 }
0x2566   :  { %v3748_v25 = vsub.f32 %v3744_v37, %v3747_v52  ;;  %v5192_v52 = vld [vmem:[%s6187_s10 + $0x28] sm:$0xff]  }
0x2568   :  { %v3749_v33 = vmul.f32 1.442695, %v3748_v25  ;;  %v5193_v25 = vld [vmem:[%s6187_s10 + $0x20] sm:$0xff]  }
0x2569   :  { %v3880_v20 = vpop.permute.xlu1 %3879 }
0x256a   :  { %5274 = vpow2.f32 %v3749_v33 }
0x256d   :  { %v3878_v23 = vpop.permute.xlu1 %3877 }
0x2577   :  { %v5275_v14 = vpop.eup %5274 }
0x2578   :  { %v3751_v16 = vsel %vm305_vm3, %v5275_v14, 0.0 }
0x2579   :  { %3752 = vadd.xlane.f32.xlu0 %v3751_v16 }
0x258f   :  { %3756 = vrot.lane.b32.xlu0 %v5980_v35, %s5323_s22 }
0x2602   :  { %v3753_v17 = vpop.xlane.xlu0 %3752 }
0x2603   :  { %5276 = vrcp.f32 %v3753_v17 }
0x2606   :  { %v3757_v19 = vpop.permute.xlu0 %3756 }
0x2607   :  { %5070 = vmatpush3.msra.mxu1 %v3757_v19 }
0x2608   :  { %5080 = vmatprep.subr.mxu1 %v5317_v40 }
0x2610   :  { %v5277_v30 = vpop.eup %5276 }
0x2611   :  { %v3755_v31 = vmul.f32 %v5277_v30, %v5275_v14 }
0x2613   :  { %5072 = vmatmul.mubr.msk.f32.vlgmr.msra.gmra.mxu1 %vm305_vm3, %v3755_v31 }
0x2614   :  { %5081 = vmatpush3.xpose.msk.msra.mxu1 %vm222_vm2, %v3880_v20  ;;  %5082 = vmatprep.mubr.msk.f32.mxu1 %vm5318_vm1, %v5317_v40 }
0x2615   :  { %5085 = vmatprep.subr.mxu1 %v5317_v40 }
0x2617   :  { %5083 = vmatmul.mubr.msk.f32.vlgmr.msra.gmra.mxu1 %vm222_vm2, %v3878_v23  ;;  %v4632_v23 = vld [vmem:[%s6185_s8 + $0x1] ss:$0 sm:$0xff] }
0x2618   :  { %5087 = vmatprep.mubr.msk.f32.mxu1 %vm5318_vm1, %v5317_v40 }
0x26d3   :  { %v3828_v24 = vpop.f32.mrf.mxu1 }
0x26d4   :  { %v3832_v26 = vpack.c.bf16 %v3828_v24, %v3828_v24 }
0x26d5   :  { %v5073_v27 = vpop.f32.mrf.mxu1 }
0x26d6   :  { %5077 = vmatmul.mubr.msk.bf16.vlgmr.msra.gmra.mxu0 %vm222_vm2, %v3832_v26 }
0x26d7   :  { %v3951_v43 = vpop.f32.mrf.mxu1  ;;  %5091 = vmatpush3.bf16.msra.mxu0 %v5969_v4  ;;  %5092 = vmatprep.mubr.msk.bf16.mxu0 %vm5318_vm1, %v5317_v40  ;;  %v4629_v4 = vld [vmem:[%s6184_s7 + $0x1] ss:$0 sm:$0xff] }
0x26d8   :  { %v3955_v48 = vmul.f32 0.25, %v3951_v43  ;;  %5108 = vmatprep.subr.bf16.mxu0 %v5317_v40  ;;  %v4633_v43 = vld [vmem:[%s6186_s9 + $0x1] ss:$0 sm:$0xff] }
0x26d9   :  { %v5084_v32 = vpop.f32.mrf.mxu1 }
0x26da   :  { %v3956_v7 = vadd.f32 %v5996_v15, %v3955_v48  ;;  %v4097_v15 = vadd.f32 %v4629_v4, %v6006_v29 }
0x26dc   :  { %v3957_v34 = vsel %vm305_vm3, %v3956_v7, -inf  ;;  %v4099_v50 = vadd.f32 %v4097_v15, %v5828_v45  ;;  %v5199_v15 = vld [vmem:[%s6189_s12 + $0x50] sm:$0xff]  }
0x26dd   :  { %3958 = vmax.xlane.f32.xlu0 %v3957_v34 }
0x26f3   :  { %3968 = vrot.lane.b32.xlu0 %v5980_v35, %s5324_s27  ;;  %v4105_v35 = vsel %vm59_vm0, %v4099_v50, 0.0 }
0x2766   :  { %v3959_v49 = vpop.xlane.xlu0 %3958 }
0x2767   :  { %v3960_v36 = vsub.f32 %v3956_v7, %v3959_v49  ;;  %v5194_v49 = vld [vmem:[%s6189_s12 + $0x78] sm:$0xff]  }
0x2769   :  { %v3961_v39 = vmul.f32 1.442695, %v3960_v36  ;;  %v5195_v36 = vld [vmem:[%s6189_s12 + $0x70] sm:$0xff]  }
0x276a   :  { %v3969_v44 = vpop.permute.xlu0 %3968 }
0x276b   :  { %5278 = vpow2.f32 %v3961_v39  ;;  %5086 = vmatpush3.msra.mxu1 %v3969_v44  ;;  %v5196_v39 = vld [vmem:[%s6189_s12 + $0x68] sm:$0xff]   ;;  %v5197_v44 = vld [vmem:[%s6189_s12 + $0x60] sm:$0xff]  }
0x276c   :  { %5096 = vmatprep.subr.bf16.mxu1 %v5317_v40 }
0x2778   :  { %v5279_v46 = vpop.eup %5278 }
0x2779   :  { %v3963_v38 = vsel %vm305_vm3, %v5279_v46, 0.0 }
0x277a   :  { %3964 = vadd.xlane.f32.xlu1 %v3963_v38  ;;  %v5201_v38 = vld [vmem:[%s6189_s12 + $0x40] sm:$0xff]  }
0x277e   :  { %4106 = vadd.xlane.f32.xlu1 %v4105_v35 }
0x2796   :  { %v3870_v53 = vpop.f32.mrf.mxu0 }
0x2797   :  { %v3876_v55 = vadd.f32 %v3870_v53, %v3660_v51 }
0x2798   :  { %v5078_v56 = vpop.f32.mrf.mxu0 }
0x279a   :  { %v3873_v58 = vpop.f32.mrf.mxu0 }
0x279c   :  { %v5079_v13 = vpop.f32.mrf.mxu0 }
0x2803   :  { %v3965_v22 = vpop.xlane.xlu1 %3964 }
0x2804   :  { %5280 = vrcp.f32 %v3965_v22 }
0x2807   :  { %v4107_v62 = vpop.xlane.xlu1 %4106 }
0x2808   :  { %v4111_v63 = vmul.f32 0.015625, %v4107_v62 }
0x280a   :  { %v4113_v21 = vsub.f32 %v4099_v50, %v4111_v63  ;;  %v4643_v50 = vld [vmem:[%s6188_s11 + $0x1] ss:$0 sm:$0xff] }
0x280c   :  { %v4115_v18 = vmul.f32 %v4113_v21, %v4113_v21 }
0x280e   :  { %v4117_v8 = vsel %vm59_vm0, %v4115_v18, 0.0 }
0x2811   :  { %v5281_v29 = vpop.eup %5280 }
0x2812   :  { %v3967_v59 = vmul.f32 %v5281_v29, %v5279_v46  ;;  %v5200_v46 = vld [vmem:[%s6189_s12 + $0x48] sm:$0xff]  }
0x2814   :  { %5088 = vmatmul.mubr.msk.f32.vlgmr.msra.gmra.mxu1 %vm305_vm3, %v3967_v59 }
0x2815   :  { %5104 = vmatprep.mubr.msk.bf16.mxu1 %vm5318_vm1, %v5317_v40  ;;  %5097 = vmatpush3.bf16.msra.mxu1 %v5190_v12 }
0x2816   :  { %5098 = vmatprep.subr.bf16.mxu1 %v5317_v40 }
0x28d4   :  { %v4040_v45 = vpop.f32.mrf.mxu1 }
0x28d5   :  { %v4044_v60 = vpack.c.bf16 %v4040_v45, %v4040_v45 }
0x28d6   :  { %v5089_v61 = vpop.f32.mrf.mxu1 }
0x28d7   :  { %5093 = vmatmul.mubr.msk.bf16.vlgmr.msra.gmra.mxu0 %vm222_vm2, %v4044_v60 }
0x28d8   :  { %5124 = vmatprep.mubr.msk.bf16.mxu0 %vm5318_vm1, %v5317_v40  ;;  %5109 = vmatpush3.bf16.msra.mxu0 %v5194_v49 }
0x28d9   :  { %5110 = vmatprep.subr.bf16.mxu0 %v5317_v40 }
0x28dc   :  { %5111 = vmatpush3.bf16.msra.mxu0 %v5195_v36 }
0x28dd   :  { %5112 = vmatprep.subr.bf16.mxu0 %v5317_v40 }
0x28e0   :  { %5113 = vmatpush3.bf16.msra.mxu0 %v5196_v39 }
0x28e1   :  { %5114 = vmatprep.subr.bf16.mxu0 %v5317_v40 }
0x28e4   :  { %5115 = vmatpush3.bf16.msra.mxu0 %v5197_v44 }
0x28e5   :  { %5116 = vmatprep.subr.bf16.mxu0 %v5317_v40 }
0x2997   :  { %v4082_v0 = vpop.f32.mrf.mxu0 }
0x2998   :  { %v4088_v47 = vadd.f32 %v4082_v0, %v3876_v55 }
0x2999   :  { %v5094_v1 = vpop.f32.mrf.mxu0 }
0x299a   :  { %v4098_v28 = vadd.f32 %v4629_v4, %v4088_v47  ;;  %v5198_v4 = vld [vmem:[%s6189_s12 + $0x58] sm:$0xff]  }
0x299b   :  { %v4085_v2 = vpop.f32.mrf.mxu0  ;;  %5117 = vmatpush3.bf16.msra.mxu0 %v5198_v4 }
0x299c   :  { %v4100_v3 = vadd.f32 %v4098_v28, %v5830_v54  ;;  %v5191_v54 = vld [vmem:[%s6187_s10 + $0x30] sm:$0xff]   ;;  %5118 = vmatprep.subr.bf16.mxu0 %v5317_v40  ;;  %s5294_s10 = scalar_lea.vmem %s4489_s30, 32 }
0x299d   :  { %v5095_v5 = vpop.f32.mrf.mxu0  ;;  %5099 = vmatpush3.bf16.msra.mxu1 %v5191_v54  ;;  %p5295_p0 = scmp.ne.s32.totalorder %s4489_s30, %s5294_s10  ;;  %p5300_p2 = scmp.lt.s32.totalorder %s5294_s10, %s5294_s10 }
0x299e   :  { %v4108_v6 = vsel %vm59_vm0, %v4100_v3, 0.0  ;;  %5100 = vmatprep.subr.bf16.mxu1 %v5317_v40 }
0x299f   :  { %4109 = vadd.xlane.f32.xlu1 %v4108_v6  ;;  %5119 = vmatpush3.bf16.msra.mxu0 %v5199_v15  ;;  %p5301_p3 = por %p5300_p2, %p5299_p1 }
0x29a0   :  { %5120 = vmatprep.subr.bf16.mxu0 %v5317_v40 }
0x29a1   :  { %5101 = vmatpush3.bf16.msra.mxu1 %v5192_v52  ;;  %p5302_p4 = pnand %p5301_p3, %p5295_p0 }
0x29a2   :  { %5102 = vmatprep.subr.bf16.mxu1 %v5317_v40 }
0x29a3   :  { %4118 = vadd.xlane.f32.xlu1 %v4117_v8  ;;  %5121 = vmatpush3.bf16.msra.mxu0 %v5200_v46 }
0x29a4   :  { %5122 = vmatprep.subr.bf16.mxu0 %v5317_v40 }
0x29a5   :  { %5103 = vmatpush3.bf16.msra.mxu1 %v5193_v25 }
0x29a6   :  { %5128 = vmatprep.subr.mxu1 %v5317_v40 }
0x29a7   :  { %5123 = vmatpush3.bf16.msra.mxu0 %v5201_v38 }
0x2a28   :  { %v4110_v9 = vpop.xlane.xlu1 %4109 }
0x2a29   :  { %v4112_v57 = vmul.f32 0.015625, %v4110_v9  ;;  %v4666_v9 = vld [vmem:[%s6190_s13 + $0x1] ss:$0 sm:$0xff] }
0x2a2b   :  { %v4114_v10 = vsub.f32 %v4100_v3, %v4112_v57 }
0x2a2c   :  { %v4119_v33 = vpop.xlane.xlu1 %4118 }
0x2a2d   :  { %v4116_v11 = vmul.f32 %v4114_v10, %v4114_v10  ;;  %v4123_v14 = vmul.f32 0.015625, %v4119_v33 }
0x2a2f   :  { %v4120_v37 = vsel %vm59_vm0, %v4116_v11, 0.0  ;;  %v4125_v16 = vadd.f32 1e-05, %v4123_v14  ;;  %v4372_v11 = vmul.u32 8, %v5463_v42 }
0x2a30   :  { %4121 = vadd.xlane.f32.xlu1 %v4120_v37 }
0x2a31   :  { %5282 = vrsqrt.f32 %v4125_v16 }
0x2a3e   :  { %v5283_v20 = vpop.eup %5282 }
0x2a3f   :  { %v4129_v31 = vmul.f32 %v5283_v20, %v4113_v21 }
0x2a41   :  { %v4137_v27 = vmul.f32 %v4632_v23, %v4129_v31 }
0x2a43   :  { %v6112_v32 = vadd.f32 %v4633_v43, %v4137_v27  ;;  %v4679_v27 = vld [vmem:[%s6191_s14 + $0x1] ss:$0 sm:$0xff] }
0x2ab9   :  { %v4122_v17 = vpop.xlane.xlu1 %4121 }
0x2aba   :  { %v4124_v19 = vmul.f32 0.015625, %v4122_v17 }
0x2abc   :  { %v4126_v30 = vadd.f32 1e-05, %v4124_v19 }
0x2abe   :  { %5284 = vrsqrt.f32 %v4126_v30 }
0x2acb   :  { %v5285_v24 = vpop.eup %5284 }
0x2acc   :  { %v4130_v26 = vmul.f32 %v5285_v24, %v4114_v10  ;;  %v4371_v10 = vand.u32 127, %v114_v41 }
0x2ace   :  { %v4138_v48 = vmul.f32 %v4632_v23, %v4130_v26  ;;  %vm4373_vm4 = vcmp.eq.s32.totalorder %v4371_v10, %v4372_v11 }
0x2acf   :  { %v4675_v14 = vsel %vm4373_vm4, 1.0, %v5317_v40 }
0x2ad0   :  { %v6114_v7 = vadd.f32 %v4633_v43, %v4138_v48  ;;  %v4680_v48 = vld [vmem:[%s6192_s15 + $0x1] ss:$0 sm:$0xff] }
0x2ad2   :  { %v4147_v34 = vpack.c.bf16 %v6114_v7, %v6112_v32 }
0x2ad4   :  { %5105 = vmatmul.mubr.msk.bf16.vlgmr.msra.gmra.mxu1 %vm59_vm0, %v4147_v34 }
0x2ad5   :  { %5132 = vmatprep.mubr.msk.f32.mxu1 %vm5318_vm1, %v5317_v40 }
0x2b94   :  { %v4226_v35 = vpop.f32.mrf.mxu1 }
0x2b95   :  { %v4227_v51 = vadd.f32 %v4643_v50, %v4226_v35 }
0x2b96   :  { %v5106_v53 = vpop.f32.mrf.mxu1 }
0x2b97   :  { %v4235_v55 = vmul.f32 0.044715, %v4227_v51  ;;  %v4233_v28 = vmul.f32 0.5, %v4227_v51 }
0x2b98   :  { %v4229_v56 = vpop.f32.mrf.mxu1 }
0x2b99   :  { %v4237_v58 = vmul.f32 %v4235_v55, %v4227_v51  ;;  %v4230_v13 = vadd.f32 %v4643_v50, %v4229_v56 }
0x2b9a   :  { %v5107_v22 = vpop.f32.mrf.mxu1 }
0x2b9b   :  { %v4239_v29 = vmul.f32 %v4237_v58, %v4227_v51  ;;  %v4236_v59 = vmul.f32 0.044715, %v4230_v13  ;;  %v4234_v2 = vmul.f32 0.5, %v4230_v13 }
0x2b9d   :  { %v4241_v45 = vadd.f32 %v4239_v29, %v4227_v51  ;;  %v4238_v60 = vmul.f32 %v4236_v59, %v4230_v13 }
0x2b9f   :  { %v4243_v61 = vmul.f32 0.7978846, %v4241_v45  ;;  %v4240_v62 = vmul.f32 %v4238_v60, %v4230_v13 }
0x2ba1   :  { %5286 = vtanh.f32 %v4243_v61  ;;  %v4242_v63 = vadd.f32 %v4240_v62, %v4230_v13 }
0x2ba3   :  { %v4244_v0 = vmul.f32 0.7978846, %v4242_v63 }
0x2ba5   :  { %5288 = vtanh.f32 %v4244_v0 }
0x2bae   :  { %v5287_v47 = vpop.eup %5286 }
0x2baf   :  { %v4247_v1 = vadd.f32 1.0, %v5287_v47 }
0x2bb1   :  { %v4249_v5 = vmul.f32 %v4247_v1, %v4233_v28 }
0x2bb2   :  { %v5289_v21 = vpop.eup %5288 }
0x2bb3   :  { %v4248_v3 = vadd.f32 1.0, %v5289_v21 }
0x2bb5   :  { %v4250_v6 = vmul.f32 %v4248_v3, %v4234_v2 }
0x2bb7   :  { %v4251_v18 = vpack.c.bf16 %v4250_v6, %v4249_v5 }
0x2bb9   :  { %5125 = vmatmul.mubr.bf16.vlgmr.msra.gmra.mxu0 %v4251_v18 }
0x2c79   :  { %v4359_v8 = vpop.f32.mrf.mxu0 }
0x2c7a   :  { %v4360_v12 = vadd.f32 %v4666_v9, %v4359_v8 }
0x2c7b   :  { %v5126_v57 = vpop.f32.mrf.mxu0 }
0x2c7c   :  { %v4366_v33 = vadd.f32 %v4360_v12, %v6112_v32 }
0x2c7d   :  { %v4362_v37 = vpop.f32.mrf.mxu0 }
0x2c7e   :  { %v4363_v54 = vadd.f32 %v4666_v9, %v4362_v37 }
0x2c7f   :  { %v5127_v52 = vpop.f32.mrf.mxu0 }
0x2c80   :  { %v4367_v25 = vadd.f32 %v4363_v54, %v6114_v7 }
0x2c82   :  { %5129 = vmatpush3.msra.mxu1 %v4367_v25 }
0x2c83   :  { %5130 = vmatprep.subr.mxu1 %v5317_v40 }
0x2c84   :  { %5131 = vmatpush3.msra.mxu1 %v4366_v33 }
0x2c85   :  { %5133 = vmatmul.mubr.msk.f32.vlgmr.msra.gmra.mxu1 %vm222_vm2, %v4675_v14 }
0x2d45   :  { %v4445_v41 = vpop.f32.mrf.mxu1 }
0x2d46   :  { %v4454_v42 = vsel %vm4453_vm5, %v4445_v41, 0.0 }
0x2d47   :  { %4455 = vadd.xlane.f32.xlu0 %v4454_v42  ;;  %v5134_v16 = vpop.f32.mrf.mxu1 }
0x2dd0   :  { %v4456_v17 = vpop.xlane.xlu0 %4455 }
0x2dd1   :  { %v4457_v19 = vmul.f32 0.015625, %v4456_v17 }
0x2dd3   :  { %v4458_v30 = vsub.f32 %v4445_v41, %v4457_v19 }
0x2dd5   :  { %v4459_v20 = vmul.f32 %v4458_v30, %v4458_v30 }
0x2dd7   :  { %v4460_v31 = vsel %vm4453_vm5, %v4459_v20, 0.0 }
0x2dd8   :  { %4461 = vadd.xlane.f32.xlu1 %v4460_v31 }
0x2e61   :  { %v4462_v23 = vpop.xlane.xlu1 %4461 }
0x2e62   :  { %v4463_v24 = vmul.f32 0.015625, %v4462_v23 }
0x2e64   :  { %v4464_v26 = vadd.f32 1e-05, %v4463_v24 }
0x2e66   :  { %5290 = vrsqrt.f32 %v4464_v26 }
0x2e73   :  { %v5291_v40 = vpop.eup %5290 }
0x2e74   :  { %v4466_v43 = vmul.f32 %v5291_v40, %v4458_v30 }
0x2e76   :  { %v4473_v32 = vmul.f32 %v4679_v27, %v4466_v43 }
0x2e78   :  { %v4480_v7 = vadd.f32 %v4680_v48, %v4473_v32 }
0x2e7a   :  { %4481 = vst.msk [vmem:[#allocation2] sm:$0x3] %vm4453_vm5, %v4480_v7 }
0x2e7b   :  { %5305 = shalt.err (!%p5302_p4)
}
0x2e7c   :  { %4491 = dma.vmem_to_hbm [thread:$0]  %s4489_s30, 32, %s6193_s16, [#allocation3]  }
0x2e7d   :  { %5314 = dma.done.wait [#allocation3], 32  }
0x2e7e   :  { %5315 = vsyncadd [#allocation3], 4294967264 }
0x2e7f   :  { %4495 = vsyncpa [#allocation3], 1 }

</bundles_post_ra>
